<compile_context>
chip_gen: v7x
topology: tpu7x:2x2x1
jax: 0.10.0
libtpu: 0.0.40
codegen_flags: <defaults>
</compile_context>

<pallas_src>
import functools

import jax
import jax.numpy as jnp
from jax.experimental import pallas as pl
from jax.experimental.pallas import tpu as pltpu


# ------------------------------ kernel ------------------------------------ #

def _dcn_kernel(x_ref, py_ref, px_ref, mod_ref, w_ref, b_ref, o_ref, col_ref,
                *, H, W, K, mxu_dtype):
    """Modulated deformable conv for one (batch, output-pixel-tile) grid cell.

    x_ref:   (1, Cin, H*W)   input feature map (full spatial extent)
    py_ref:  (1, K, TP)      absolute float row sampling position per tap
    px_ref:  (1, K, TP)      absolute float col sampling position per tap
    mod_ref: (1, K, TP)      modulator mask per tap
    w_ref:   (Cout, K*Cin)   regular conv weights, tap-major
    b_ref:   (Cout, 1)       regular conv bias
    o_ref:   (1, Cout, TP)
    col_ref: (K*Cin, TP)     VMEM scratch: im2col of the deformed samples
    """
    HW = H * W
    Cin = x_ref.shape[1]
    x = x_ref[0].astype(mxu_dtype)                      # (Cin, HW) bf16 @ MXU
    py = py_ref[0]                                      # (K, TP) f32
    px = px_ref[0]
    mod = mod_ref[0]
    TP = py.shape[-1]

    row_f = jax.lax.broadcasted_iota(jnp.int32, (H, TP), 0).astype(jnp.float32)
    col_f = jax.lax.broadcasted_iota(jnp.int32, (W, TP), 0).astype(jnp.float32)

    for k in range(K):                                  # static unroll, K small
        # Separable bilinear "hat" weights: relu(1 - |i - p|) equals the
        # bilinear weight of integer coordinate i for sample position p, and is
        # zero outside the image (zero padding) — so one (H,TP) and one (W,TP)
        # hat replace the 4 masked one-hot corners of size (HW,TP).
        gy = jnp.maximum(1.0 - jnp.abs(row_f - py[k:k + 1, :]), 0.0)   # (H, TP)
        gx = jnp.maximum(1.0 - jnp.abs(col_f - px[k:k + 1, :]), 0.0)   # (W, TP)
        gx = gx * mod[k:k + 1, :]             # fold modulator into col weights
        g = (gy[:, None, :] * gx[None, :, :]).reshape(HW, TP)   # one VPU pass
        g = g.astype(mxu_dtype)               # bf16 operand at the MXU boundary
        col_ref[k * Cin:(k + 1) * Cin, :] = jnp.dot(
            x, g, preferred_element_type=jnp.float32)            # (Cin, TP)

    # single batched projection: (Cout, K*Cin) @ (K*Cin, TP)
    out = jnp.dot(w_ref[...], col_ref[...],
                  preferred_element_type=jnp.float32) + b_ref[...]
    o_ref[0] = out.astype(o_ref.dtype)


# ------------------------------ wrapper ------------------------------------ #

def _conv2d_nchw(x, w, b, stride, padding, dilation):
    dn = jax.lax.conv_dimension_numbers(x.shape, w.shape, ("NCHW", "OIHW", "NCHW"))
    y = jax.lax.conv_general_dilated(
        x.astype(jnp.float32), w.astype(jnp.float32),
        window_strides=stride,
        padding=[(padding[0], padding[0]), (padding[1], padding[1])],
        rhs_dilation=dilation, dimension_numbers=dn)
    return y + b.astype(jnp.float32)[None, :, None, None]


def _vmem_capacity_bytes():
    try:
        cap = int(pltpu.get_tpu_info().vmem_capacity_bytes)
        if cap >= 16 * 1024 * 1024:
            return cap
    except Exception:
        pass
    return 64 * 1024 * 1024          # conservative (v7x per-TC) fallback


def _round_up(v, m):
    return ((v + m - 1) // m) * m


def _pick_tile_p(P, HW, Cin, Cout, K, mxu_itemsize, budget_bytes, batch):
    """Largest lane-dense (multiple-of-128) pixel tile whose per-cell VMEM
    footprint (double-buffered IO tiles + gather-matrix working set) fits the
    budget.  Keep >= 2 grid cells when batch == 1 so both v7x TCs get work."""
    p128 = _round_up(P, 128)
    tp = 128
    for t in (2048, 1024, 512, 256, 128):
        if t > p128:
            continue
        io = 2 * (Cin * HW * 4 + 3 * K * t * 4 + Cout * t * 4)     # double-buffered
        work = HW * t * (4 + mxu_itemsize) + (K * Cin + Cout) * t * 4
        if io + work <= budget_bytes:
            tp = t
            break
    if batch == 1:
        while tp > 128 and -(-P // tp) < 2:
            tp //= 2
    return tp


def deformable_conv2d(x, w_off, b_off, w_mod, b_mod, w_reg, b_reg=None,
                      stride=1, padding=1, dilation=1,
                      mxu_dtype=jnp.bfloat16):
    """Forward pass of the PyTorch DeformableConv2d module.

    x:      (B, Cin, H, W)
    w_off:  (2*K, Cin, kh, kw), b_off: (2*K,)      offset conv
    w_mod:  (K,   Cin, kh, kw), b_mod: (K,)        modulator conv
    w_reg:  (Cout, Cin, kh, kw), b_reg: (Cout,)|None
    """
    stride = stride if isinstance(stride, tuple) else (stride, stride)
    padding = padding if isinstance(padding, tuple) else (padding, padding)
    dilation = dilation if isinstance(dilation, tuple) else (dilation, dilation)
    sh, sw = stride
    ph, pw = padding
    dh, dw = dilation

    B, Cin, H, W = x.shape
    Cout, _, kh, kw = w_reg.shape
    K = kh * kw
    Ho = (H + 2 * ph - dh * (kh - 1) - 1) // sh + 1
    Wo = (W + 2 * pw - dw * (kw - 1) - 1) // sw + 1
    P = Ho * Wo
    HW = H * W
    f32 = jnp.float32

    if b_reg is None:
        b_reg = jnp.zeros((Cout,), f32)

    # ---- Stage A/B hoisted out of the kernel: static plain convs (XLA) ----
    offset = _conv2d_nchw(x, w_off, b_off, stride, padding, dilation)     # (B,2K,Ho,Wo)
    modulator = 2.0 * jax.nn.sigmoid(
        _conv2d_nchw(x, w_mod, b_mod, stride, padding, dilation))         # (B,K,Ho,Wo)
    off_y = offset[:, 0::2].reshape(B, K, P)
    off_x = offset[:, 1::2].reshape(B, K, P)
    mod = modulator.reshape(B, K, P).astype(f32)

    # ---- absolute float sampling positions: static base grid + offsets ----
    p_idx = jnp.arange(P, dtype=jnp.int32)
    ho = p_idx // Wo
    wo = p_idx % Wo
    ki = (jnp.arange(K, dtype=jnp.int32) // kw)[:, None]
    kj = (jnp.arange(K, dtype=jnp.int32) % kw)[:, None]
    base_y = (ho[None, :] * sh - ph + ki * dh).astype(f32)                # (K, P)
    base_x = (wo[None, :] * sw - pw + kj * dw).astype(f32)                # (K, P)
    py = base_y[None] + off_y.astype(f32)                                 # (B, K, P)
    px = base_x[None] + off_x.astype(f32)

    # ---- pad channels to sublane multiples, pixels to a lane-dense tile ----
    Cin_p = _round_up(Cin, 8)
    Cout_p = _round_up(Cout, 8)
    x3 = x.reshape(B, Cin, HW).astype(f32)
    if Cin_p != Cin:
        x3 = jnp.pad(x3, ((0, 0), (0, Cin_p - Cin), (0, 0)))

    mxu_itemsize = jnp.dtype(mxu_dtype).itemsize
    cap = _vmem_capacity_bytes()
    TP = _pick_tile_p(P, HW, Cin_p, Cout_p, K, mxu_itemsize, cap // 3, B)
    n_tiles = -(-P // TP)
    P_pad = n_tiles * TP
    if P_pad != P:
        pad = P_pad - P
        # padded pixels: positions far out of range -> gather weights are 0
        py = jnp.pad(py, ((0, 0), (0, 0), (0, pad)), constant_values=-2.0)
        px = jnp.pad(px, ((0, 0), (0, 0), (0, pad)), constant_values=-2.0)
        mod = jnp.pad(mod, ((0, 0), (0, 0), (0, pad)))

    # ---- regular conv weights: (Cout_p, K*Cin_p), tap-major ----
    w2 = w_reg.reshape(Cout, Cin, K).transpose(0, 2, 1).astype(f32)       # (Cout,K,Cin)
    w2 = jnp.pad(w2, ((0, Cout_p - Cout), (0, 0), (0, Cin_p - Cin)))
    w2 = w2.reshape(Cout_p, K * Cin_p)
    b2 = jnp.pad(b_reg.astype(f32), (0, Cout_p - Cout)).reshape(Cout_p, 1)

    grid = (B, P_pad // TP)

    flops = int(B * P_pad * (K * HW * (1 + 2 * Cin_p) + 2 * Cout_p * K * Cin_p))
    bytes_accessed = int(x3.size * 4 + 3 * B * K * P_pad * 4
                         + B * Cout_p * P_pad * x.dtype.itemsize
                         + (Cout_p * K * Cin_p + Cout_p) * 4)

    kernel = functools.partial(_dcn_kernel, H=H, W=W, K=K, mxu_dtype=mxu_dtype)

    out3 = pl.pallas_call(
        kernel,
        out_shape=jax.ShapeDtypeStruct((B, Cout_p, P_pad), x.dtype),
        grid_spec=pltpu.PrefetchScalarGridSpec(
            num_scalar_prefetch=0,
            grid=grid,
            in_specs=[
                pl.BlockSpec((1, Cin_p, HW), lambda b, t: (b, 0, 0)),      # x
                pl.BlockSpec((1, K, TP), lambda b, t: (b, 0, t)),          # py
                pl.BlockSpec((1, K, TP), lambda b, t: (b, 0, t)),          # px
                pl.BlockSpec((1, K, TP), lambda b, t: (b, 0, t)),          # modulator
                pl.BlockSpec((Cout_p, K * Cin_p), lambda b, t: (0, 0)),    # w_reg
                pl.BlockSpec((Cout_p, 1), lambda b, t: (0, 0)),            # b_reg
            ],
            out_specs=pl.BlockSpec((1, Cout_p, TP), lambda b, t: (b, 0, t)),
            scratch_shapes=[pltpu.VMEM((K * Cin_p, TP), jnp.float32)],
        ),
        compiler_params=pltpu.CompilerParams(
            dimension_semantics=("parallel", "parallel"),
            vmem_limit_bytes=min(int(cap * 0.6), 96 * 1024 * 1024),
        ),
        cost_estimate=pl.CostEstimate(flops=flops, transcendentals=0,
                                      bytes_accessed=bytes_accessed),
    )(x3, py, px, mod, w2, b2)

    return out3[:, :Cout, :P].reshape(B, Cout, Ho, Wo)


# ------------------------------ references --------------------------------- #

def _deform_conv2d_ref(x, offset, mask, weight, bias, stride, padding, dilation):
    B, Cin, H, W = x.shape
    Cout, _, kh, kw = weight.shape
    sh, sw = stride
    ph, pw = padding
    dh, dw = dilation
    Ho = (H + 2 * ph - dh * (kh - 1) - 1) // sh + 1
    Wo = (W + 2 * pw - dw * (kw - 1) - 1) // sw + 1
    K = kh * kw
    x_flat = x.reshape(B, Cin, H * W).astype(jnp.float32)
    ho = jnp.arange(Ho)
    wo = jnp.arange(Wo)
    cols = []
    for i in range(kh):
        for j in range(kw):
            k = i * kw + j
            py = (ho[:, None] * sh - ph + i * dh)[None] + offset[:, 2 * k]
            px = (wo[None, :] * sw - pw + j * dw)[None] + offset[:, 2 * k + 1]
            y0 = jnp.floor(py)
            x0 = jnp.floor(px)
            acc = jnp.zeros((B, Cin, Ho, Wo), jnp.float32)
            for dy in (0, 1):
                for dx in (0, 1):
                    yc = y0 + dy
                    xc = x0 + dx
                    wgt = (1.0 - jnp.abs(py - yc)) * (1.0 - jnp.abs(px - xc))
                    valid = (yc >= 0) & (yc <= H - 1) & (xc >= 0) & (xc <= W - 1)
                    wgt = jnp.where(valid, wgt, 0.0)
                    idx = (jnp.clip(yc, 0, H - 1) * W +
                           jnp.clip(xc, 0, W - 1)).astype(jnp.int32)
                    idx = idx.reshape(B, 1, Ho * Wo)
                    v = jnp.take_along_axis(
                        x_flat, jnp.broadcast_to(idx, (B, Cin, Ho * Wo)), axis=2)
                    acc = acc + v.reshape(B, Cin, Ho, Wo) * wgt[:, None]
            cols.append(acc * mask[:, k][:, None])
    col = jnp.stack(cols, axis=1)                       # (B, K, Cin, Ho, Wo)
    w = weight.reshape(Cout, Cin, K).astype(jnp.float32)
    out = jnp.einsum("bkcpq,ock->bopq", col, w)
    if bias is not None:
        out = out + bias.astype(jnp.float32)[None, :, None, None]
    return out


def _forward_ref(x, w_off, b_off, w_mod, b_mod, w_reg, b_reg,
                 stride, padding, dilation):
    offset = _conv2d_nchw(x, w_off, b_off, stride, padding, dilation)
    modulator = 2.0 * jax.nn.sigmoid(
        _conv2d_nchw(x, w_mod, b_mod, stride, padding, dilation))
    return _deform_conv2d_ref(x, offset, modulator, w_reg, b_reg,
                              stride, padding, dilation)


# -------------------------------- main -------------------------------------- #

if __name__ == "__main__":
    key = jax.random.PRNGKey(0)
    ks = jax.random.split(key, 6)

    B, Cin, Cout, H, W = 2, 4, 8, 16, 16
    kh = kw = 3
    K = kh * kw
    stride, padding, dilation = 1, 1, 1

    x = jax.random.normal(ks[0], (B, Cin, H, W), jnp.float32)
    # The module initializes offset/modulator convs to zero (degenerates to a
    # plain conv); use small random weights so the deformable path is exercised.
    w_off = 0.2 * jax.random.normal(ks[1], (2 * K, Cin, kh, kw), jnp.float32)
    b_off = 0.1 * jax.random.normal(ks[2], (2 * K,), jnp.float32)
    w_mod = 0.2 * jax.random.normal(ks[3], (K, Cin, kh, kw), jnp.float32)
    b_mod = 0.1 * jax.random.normal(ks[4], (K,), jnp.float32)
    w_reg = 0.3 * jax.random.normal(ks[5], (Cout, Cin, kh, kw), jnp.float32)
    b_reg = None  # module default: bias=False

    ref = _forward_ref(x, w_off, b_off, w_mod, b_mod, w_reg, b_reg,
                       (stride, stride), (padding, padding), (dilation, dilation))

    # Fast path: bf16 operands at the MXU boundary (f32 accumulation).
    out = jax.block_until_ready(deformable_conv2d(
        x, w_off, b_off, w_mod, b_mod, w_reg, b_reg,
        stride=stride, padding=padding, dilation=dilation))
    assert out.shape == ref.shape and out.dtype == x.dtype
    err_bf16 = float(jnp.max(jnp.abs(out - ref)))
    # tolerance reflects bf16 gather-matrix / x operands (accumulation in f32)
    assert jnp.allclose(out, ref.astype(out.dtype), atol=1e-1, rtol=2e-2), err_bf16

    # Exact path: f32 MXU operands, tight tolerance (proves the gather math).
    out_f32 = jax.block_until_ready(deformable_conv2d(
        x, w_off, b_off, w_mod, b_mod, w_reg, b_reg,
        stride=stride, padding=padding, dilation=dilation,
        mxu_dtype=jnp.float32))
    err_f32 = float(jnp.max(jnp.abs(out_f32 - ref)))
    assert jnp.allclose(out_f32, ref.astype(out_f32.dtype),
                        atol=2e-4, rtol=2e-4), err_f32

    print("KERNEL_OK")
</pallas_src>

<mosaic_0001>
module attributes {stable_mosaic.version = 11 : i64} {
  func.func @_dcn_kernel(%arg0: i32, %arg1: i32, %arg2: memref<1x8x256xf32, #tpu.memory_space<vmem>>, %arg3: memref<1x9x256xf32, #tpu.memory_space<vmem>>, %arg4: memref<1x9x256xf32, #tpu.memory_space<vmem>>, %arg5: memref<1x9x256xf32, #tpu.memory_space<vmem>>, %arg6: memref<8x72xf32, #tpu.memory_space<vmem>>, %arg7: memref<8x1xf32, #tpu.memory_space<vmem>>, %arg8: memref<1x8x256xf32, #tpu.memory_space<vmem>>, %arg9: memref<72x256xf32, #tpu.memory_space<vmem>>) attributes {dimension_semantics = [#tpu.dimension_semantics<parallel>, #tpu.dimension_semantics<parallel>], iteration_bounds = array<i64: 2, 1>, scalar_prefetch = 0 : i64, scratch_operands = 1 : i64, tpu.core_type = #tpu.core_type<tc>, window_params = [{transform_indices = @transform_0, window_bounds = array<i64: 1, 8, 256>}, {transform_indices = @transform_1, window_bounds = array<i64: 1, 9, 256>}, {transform_indices = @transform_2, window_bounds = array<i64: 1, 9, 256>}, {transform_indices = @transform_3, window_bounds = array<i64: 1, 9, 256>}, {pipeline_mode = #tpu.pipeline_mode<synchronous>, transform_indices = @transform_4, window_bounds = array<i64: 8, 72>}, {pipeline_mode = #tpu.pipeline_mode<synchronous>, transform_indices = @transform_5, window_bounds = array<i64: 8, 1>}, {transform_indices = @transform_6, window_bounds = array<i64: 1, 8, 256>}]} {
    %c0 = arith.constant 0 : index
    %c0_0 = arith.constant 0 : index
    %c0_1 = arith.constant 0 : index
    %0 = vector.load %arg2[%c0, %c0_0, %c0_1] : memref<1x8x256xf32, #tpu.memory_space<vmem>>, vector<1x8x256xf32>
    %1 = vector.shape_cast %0 : vector<1x8x256xf32> to vector<8x256xf32>
    %2 = arith.truncf %1 : vector<8x256xf32> to vector<8x256xbf16>
    %c0_2 = arith.constant 0 : index
    %c0_3 = arith.constant 0 : index
    %c0_4 = arith.constant 0 : index
    %3 = vector.load %arg3[%c0_2, %c0_3, %c0_4] : memref<1x9x256xf32, #tpu.memory_space<vmem>>, vector<1x9x256xf32>
    %4 = vector.shape_cast %3 : vector<1x9x256xf32> to vector<9x256xf32>
    %c0_5 = arith.constant 0 : index
    %c0_6 = arith.constant 0 : index
    %c0_7 = arith.constant 0 : index
    %5 = vector.load %arg4[%c0_5, %c0_6, %c0_7] : memref<1x9x256xf32, #tpu.memory_space<vmem>>, vector<1x9x256xf32>
    %6 = vector.shape_cast %5 : vector<1x9x256xf32> to vector<9x256xf32>
    %c0_8 = arith.constant 0 : index
    %c0_9 = arith.constant 0 : index
    %c0_10 = arith.constant 0 : index
    %7 = vector.load %arg5[%c0_8, %c0_9, %c0_10] : memref<1x9x256xf32, #tpu.memory_space<vmem>>, vector<1x9x256xf32>
    %8 = vector.shape_cast %7 : vector<1x9x256xf32> to vector<9x256xf32>
    %9 = tpu.iota {dimensions = array<i32: 0>} : vector<16x256xi32>
    %10 = arith.sitofp %9 : vector<16x256xi32> to vector<16x256xf32>
    %11 = tpu.iota {dimensions = array<i32: 0>} : vector<16x256xi32>
    %12 = arith.sitofp %11 : vector<16x256xi32> to vector<16x256xf32>
    %13 = vector.extract_strided_slice %4 {offsets = [0, 0], sizes = [1, 256], strides = [1, 1]} : vector<9x256xf32> to vector<1x256xf32>
    %14 = vector.broadcast %13 : vector<1x256xf32> to vector<16x256xf32>
    %15 = arith.subf %10, %14 : vector<16x256xf32>
    %16 = math.absf %15 : vector<16x256xf32>
    %cst = arith.constant 1.000000e+00 : f32
    %17 = vector.broadcast %cst : f32 to vector<16x256xf32>
    %18 = arith.subf %17, %16 : vector<16x256xf32>
    %cst_11 = arith.constant 0.000000e+00 : f32
    %19 = vector.broadcast %cst_11 : f32 to vector<16x256xf32>
    %20 = arith.maximumf %18, %19 : vector<16x256xf32>
    %21 = vector.extract_strided_slice %6 {offsets = [0, 0], sizes = [1, 256], strides = [1, 1]} : vector<9x256xf32> to vector<1x256xf32>
    %22 = vector.broadcast %21 : vector<1x256xf32> to vector<16x256xf32>
    %23 = arith.subf %12, %22 : vector<16x256xf32>
    %24 = math.absf %23 : vector<16x256xf32>
    %cst_12 = arith.constant 1.000000e+00 : f32
    %25 = vector.broadcast %cst_12 : f32 to vector<16x256xf32>
    %26 = arith.subf %25, %24 : vector<16x256xf32>
    %cst_13 = arith.constant 0.000000e+00 : f32
    %27 = vector.broadcast %cst_13 : f32 to vector<16x256xf32>
    %28 = arith.maximumf %26, %27 : vector<16x256xf32>
    %29 = vector.extract_strided_slice %8 {offsets = [0, 0], sizes = [1, 256], strides = [1, 1]} : vector<9x256xf32> to vector<1x256xf32>
    %30 = vector.broadcast %29 : vector<1x256xf32> to vector<16x256xf32>
    %31 = arith.mulf %28, %30 : vector<16x256xf32>
    %32 = vector.shape_cast %20 : vector<16x256xf32> to vector<16x1x256xf32>
    %33 = vector.shape_cast %31 : vector<16x256xf32> to vector<1x16x256xf32>
    %34 = vector.broadcast %32 : vector<16x1x256xf32> to vector<16x16x256xf32>
    %35 = vector.broadcast %33 : vector<1x16x256xf32> to vector<16x16x256xf32>
    %36 = arith.mulf %34, %35 : vector<16x16x256xf32>
    %37 = vector.shape_cast %36 : vector<16x16x256xf32> to vector<256x256xf32>
    %38 = arith.truncf %37 : vector<256x256xf32> to vector<256x256xbf16>
    %cst_14 = arith.constant dense<0.000000e+00> : vector<8x256xf32>
    %39 = tpu.matmul %2, %38, %cst_14 {dimension_numbers = #tpu.dot_dimension_numbers<[1], [0], [0], [1], [0, 0, 1, 1], [], []>} : vector<8x256xbf16>, vector<256x256xbf16>, vector<8x256xf32> -> vector<8x256xf32>
    %c0_15 = arith.constant 0 : index
    %c0_16 = arith.constant 0 : index
    %40 = vector.load %arg9[%c0_15, %c0_16] : memref<72x256xf32, #tpu.memory_space<vmem>>, vector<8x256xf32>
    tpu.vector_store %arg9[%c0_15, %c0_16], %39 {strides = array<i32>} : memref<72x256xf32, #tpu.memory_space<vmem>>, vector<8x256xf32>,
    %41 = vector.extract_strided_slice %4 {offsets = [1, 0], sizes = [1, 256], strides = [1, 1]} : vector<9x256xf32> to vector<1x256xf32>
    %42 = vector.broadcast %41 : vector<1x256xf32> to vector<16x256xf32>
    %43 = arith.subf %10, %42 : vector<16x256xf32>
    %44 = math.absf %43 : vector<16x256xf32>
    %cst_17 = arith.constant 1.000000e+00 : f32
    %45 = vector.broadcast %cst_17 : f32 to vector<16x256xf32>
    %46 = arith.subf %45, %44 : vector<16x256xf32>
    %cst_18 = arith.constant 0.000000e+00 : f32
    %47 = vector.broadcast %cst_18 : f32 to vector<16x256xf32>
    %48 = arith.maximumf %46, %47 : vector<16x256xf32>
    %49 = vector.extract_strided_slice %6 {offsets = [1, 0], sizes = [1, 256], strides = [1, 1]} : vector<9x256xf32> to vector<1x256xf32>
    %50 = vector.broadcast %49 : vector<1x256xf32> to vector<16x256xf32>
    %51 = arith.subf %12, %50 : vector<16x256xf32>
    %52 = math.absf %51 : vector<16x256xf32>
    %cst_19 = arith.constant 1.000000e+00 : f32
    %53 = vector.broadcast %cst_19 : f32 to vector<16x256xf32>
    %54 = arith.subf %53, %52 : vector<16x256xf32>
    %cst_20 = arith.constant 0.000000e+00 : f32
    %55 = vector.broadcast %cst_20 : f32 to vector<16x256xf32>
    %56 = arith.maximumf %54, %55 : vector<16x256xf32>
    %57 = vector.extract_strided_slice %8 {offsets = [1, 0], sizes = [1, 256], strides = [1, 1]} : vector<9x256xf32> to vector<1x256xf32>
    %58 = vector.broadcast %57 : vector<1x256xf32> to vector<16x256xf32>
    %59 = arith.mulf %56, %58 : vector<16x256xf32>
    %60 = vector.shape_cast %48 : vector<16x256xf32> to vector<16x1x256xf32>
    %61 = vector.shape_cast %59 : vector<16x256xf32> to vector<1x16x256xf32>
    %62 = vector.broadcast %60 : vector<16x1x256xf32> to vector<16x16x256xf32>
    %63 = vector.broadcast %61 : vector<1x16x256xf32> to vector<16x16x256xf32>
    %64 = arith.mulf %62, %63 : vector<16x16x256xf32>
    %65 = vector.shape_cast %64 : vector<16x16x256xf32> to vector<256x256xf32>
    %66 = arith.truncf %65 : vector<256x256xf32> to vector<256x256xbf16>
    %cst_21 = arith.constant dense<0.000000e+00> : vector<8x256xf32>
    %67 = tpu.matmul %2, %66, %cst_21 {dimension_numbers = #tpu.dot_dimension_numbers<[1], [0], [0], [1], [0, 0, 1, 1], [], []>} : vector<8x256xbf16>, vector<256x256xbf16>, vector<8x256xf32> -> vector<8x256xf32>
    %c8 = arith.constant 8 : index
    %c0_22 = arith.constant 0 : index
    %68 = vector.load %arg9[%c8, %c0_22] : memref<72x256xf32, #tpu.memory_space<vmem>>, vector<8x256xf32>
    tpu.vector_store %arg9[%c8, %c0_22], %67 {strides = array<i32>} : memref<72x256xf32, #tpu.memory_space<vmem>>, vector<8x256xf32>,
    %69 = vector.extract_strided_slice %4 {offsets = [2, 0], sizes = [1, 256], strides = [1, 1]} : vector<9x256xf32> to vector<1x256xf32>
    %70 = vector.broadcast %69 : vector<1x256xf32> to vector<16x256xf32>
    %71 = arith.subf %10, %70 : vector<16x256xf32>
    %72 = math.absf %71 : vector<16x256xf32>
    %cst_23 = arith.constant 1.000000e+00 : f32
    %73 = vector.broadcast %cst_23 : f32 to vector<16x256xf32>
    %74 = arith.subf %73, %72 : vector<16x256xf32>
    %cst_24 = arith.constant 0.000000e+00 : f32
    %75 = vector.broadcast %cst_24 : f32 to vector<16x256xf32>
    %76 = arith.maximumf %74, %75 : vector<16x256xf32>
    %77 = vector.extract_strided_slice %6 {offsets = [2, 0], sizes = [1, 256], strides = [1, 1]} : vector<9x256xf32> to vector<1x256xf32>
    %78 = vector.broadcast %77 : vector<1x256xf32> to vector<16x256xf32>
    %79 = arith.subf %12, %78 : vector<16x256xf32>
    %80 = math.absf %79 : vector<16x256xf32>
    %cst_25 = arith.constant 1.000000e+00 : f32
    %81 = vector.broadcast %cst_25 : f32 to vector<16x256xf32>
    %82 = arith.subf %81, %80 : vector<16x256xf32>
    %cst_26 = arith.constant 0.000000e+00 : f32
    %83 = vector.broadcast %cst_26 : f32 to vector<16x256xf32>
    %84 = arith.maximumf %82, %83 : vector<16x256xf32>
    %85 = vector.extract_strided_slice %8 {offsets = [2, 0], sizes = [1, 256], strides = [1, 1]} : vector<9x256xf32> to vector<1x256xf32>
    %86 = vector.broadcast %85 : vector<1x256xf32> to vector<16x256xf32>
    %87 = arith.mulf %84, %86 : vector<16x256xf32>
    %88 = vector.shape_cast %76 : vector<16x256xf32> to vector<16x1x256xf32>
    %89 = vector.shape_cast %87 : vector<16x256xf32> to vector<1x16x256xf32>
    %90 = vector.broadcast %88 : vector<16x1x256xf32> to vector<16x16x256xf32>
    %91 = vector.broadcast %89 : vector<1x16x256xf32> to vector<16x16x256xf32>
    %92 = arith.mulf %90, %91 : vector<16x16x256xf32>
    %93 = vector.shape_cast %92 : vector<16x16x256xf32> to vector<256x256xf32>
    %94 = arith.truncf %93 : vector<256x256xf32> to vector<256x256xbf16>
    %cst_27 = arith.constant dense<0.000000e+00> : vector<8x256xf32>
    %95 = tpu.matmul %2, %94, %cst_27 {dimension_numbers = #tpu.dot_dimension_numbers<[1], [0], [0], [1], [0, 0, 1, 1], [], []>} : vector<8x256xbf16>, vector<256x256xbf16>, vector<8x256xf32> -> vector<8x256xf32>
    %c16 = arith.constant 16 : index
    %c0_28 = arith.constant 0 : index
    %96 = vector.load %arg9[%c16, %c0_28] : memref<72x256xf32, #tpu.memory_space<vmem>>, vector<8x256xf32>
    tpu.vector_store %arg9[%c16, %c0_28], %95 {strides = array<i32>} : memref<72x256xf32, #tpu.memory_space<vmem>>, vector<8x256xf32>,
    %97 = vector.extract_strided_slice %4 {offsets = [3, 0], sizes = [1, 256], strides = [1, 1]} : vector<9x256xf32> to vector<1x256xf32>
    %98 = vector.broadcast %97 : vector<1x256xf32> to vector<16x256xf32>
    %99 = arith.subf %10, %98 : vector<16x256xf32>
    %100 = math.absf %99 : vector<16x256xf32>
    %cst_29 = arith.constant 1.000000e+00 : f32
    %101 = vector.broadcast %cst_29 : f32 to vector<16x256xf32>
    %102 = arith.subf %101, %100 : vector<16x256xf32>
    %cst_30 = arith.constant 0.000000e+00 : f32
    %103 = vector.broadcast %cst_30 : f32 to vector<16x256xf32>
    %104 = arith.maximumf %102, %103 : vector<16x256xf32>
    %105 = vector.extract_strided_slice %6 {offsets = [3, 0], sizes = [1, 256], strides = [1, 1]} : vector<9x256xf32> to vector<1x256xf32>
    %106 = vector.broadcast %105 : vector<1x256xf32> to vector<16x256xf32>
    %107 = arith.subf %12, %106 : vector<16x256xf32>
    %108 = math.absf %107 : vector<16x256xf32>
    %cst_31 = arith.constant 1.000000e+00 : f32
    %109 = vector.broadcast %cst_31 : f32 to vector<16x256xf32>
    %110 = arith.subf %109, %108 : vector<16x256xf32>
    %cst_32 = arith.constant 0.000000e+00 : f32
    %111 = vector.broadcast %cst_32 : f32 to vector<16x256xf32>
    %112 = arith.maximumf %110, %111 : vector<16x256xf32>
    %113 = vector.extract_strided_slice %8 {offsets = [3, 0], sizes = [1, 256], strides = [1, 1]} : vector<9x256xf32> to vector<1x256xf32>
    %114 = vector.broadcast %113 : vector<1x256xf32> to vector<16x256xf32>
    %115 = arith.mulf %112, %114 : vector<16x256xf32>
    %116 = vector.shape_cast %104 : vector<16x256xf32> to vector<16x1x256xf32>
    %117 = vector.shape_cast %115 : vector<16x256xf32> to vector<1x16x256xf32>
    %118 = vector.broadcast %116 : vector<16x1x256xf32> to vector<16x16x256xf32>
    %119 = vector.broadcast %117 : vector<1x16x256xf32> to vector<16x16x256xf32>
    %120 = arith.mulf %118, %119 : vector<16x16x256xf32>
    %121 = vector.shape_cast %120 : vector<16x16x256xf32> to vector<256x256xf32>
    %122 = arith.truncf %121 : vector<256x256xf32> to vector<256x256xbf16>
    %cst_33 = arith.constant dense<0.000000e+00> : vector<8x256xf32>
    %123 = tpu.matmul %2, %122, %cst_33 {dimension_numbers = #tpu.dot_dimension_numbers<[1], [0], [0], [1], [0, 0, 1, 1], [], []>} : vector<8x256xbf16>, vector<256x256xbf16>, vector<8x256xf32> -> vector<8x256xf32>
    %c24 = arith.constant 24 : index
    %c0_34 = arith.constant 0 : index
    %124 = vector.load %arg9[%c24, %c0_34] : memref<72x256xf32, #tpu.memory_space<vmem>>, vector<8x256xf32>
    tpu.vector_store %arg9[%c24, %c0_34], %123 {strides = array<i32>} : memref<72x256xf32, #tpu.memory_space<vmem>>, vector<8x256xf32>,
    %125 = vector.extract_strided_slice %4 {offsets = [4, 0], sizes = [1, 256], strides = [1, 1]} : vector<9x256xf32> to vector<1x256xf32>
    %126 = vector.broadcast %125 : vector<1x256xf32> to vector<16x256xf32>
    %127 = arith.subf %10, %126 : vector<16x256xf32>
    %128 = math.absf %127 : vector<16x256xf32>
    %cst_35 = arith.constant 1.000000e+00 : f32
    %129 = vector.broadcast %cst_35 : f32 to vector<16x256xf32>
    %130 = arith.subf %129, %128 : vector<16x256xf32>
    %cst_36 = arith.constant 0.000000e+00 : f32
    %131 = vector.broadcast %cst_36 : f32 to vector<16x256xf32>
    %132 = arith.maximumf %130, %131 : vector<16x256xf32>
    %133 = vector.extract_strided_slice %6 {offsets = [4, 0], sizes = [1, 256], strides = [1, 1]} : vector<9x256xf32> to vector<1x256xf32>
    %134 = vector.broadcast %133 : vector<1x256xf32> to vector<16x256xf32>
    %135 = arith.subf %12, %134 : vector<16x256xf32>
    %136 = math.absf %135 : vector<16x256xf32>
    %cst_37 = arith.constant 1.000000e+00 : f32
    %137 = vector.broadcast %cst_37 : f32 to vector<16x256xf32>
    %138 = arith.subf %137, %136 : vector<16x256xf32>
    %cst_38 = arith.constant 0.000000e+00 : f32
    %139 = vector.broadcast %cst_38 : f32 to vector<16x256xf32>
    %140 = arith.maximumf %138, %139 : vector<16x256xf32>
    %141 = vector.extract_strided_slice %8 {offsets = [4, 0], sizes = [1, 256], strides = [1, 1]} : vector<9x256xf32> to vector<1x256xf32>
    %142 = vector.broadcast %141 : vector<1x256xf32> to vector<16x256xf32>
    %143 = arith.mulf %140, %142 : vector<16x256xf32>
    %144 = vector.shape_cast %132 : vector<16x256xf32> to vector<16x1x256xf32>
    %145 = vector.shape_cast %143 : vector<16x256xf32> to vector<1x16x256xf32>
    %146 = vector.broadcast %144 : vector<16x1x256xf32> to vector<16x16x256xf32>
    %147 = vector.broadcast %145 : vector<1x16x256xf32> to vector<16x16x256xf32>
    %148 = arith.mulf %146, %147 : vector<16x16x256xf32>
    %149 = vector.shape_cast %148 : vector<16x16x256xf32> to vector<256x256xf32>
    %150 = arith.truncf %149 : vector<256x256xf32> to vector<256x256xbf16>
    %cst_39 = arith.constant dense<0.000000e+00> : vector<8x256xf32>
    %151 = tpu.matmul %2, %150, %cst_39 {dimension_numbers = #tpu.dot_dimension_numbers<[1], [0], [0], [1], [0, 0, 1, 1], [], []>} : vector<8x256xbf16>, vector<256x256xbf16>, vector<8x256xf32> -> vector<8x256xf32>
    %c32 = arith.constant 32 : index
    %c0_40 = arith.constant 0 : index
    %152 = vector.load %arg9[%c32, %c0_40] : memref<72x256xf32, #tpu.memory_space<vmem>>, vector<8x256xf32>
    tpu.vector_store %arg9[%c32, %c0_40], %151 {strides = array<i32>} : memref<72x256xf32, #tpu.memory_space<vmem>>, vector<8x256xf32>,
    %153 = vector.extract_strided_slice %4 {offsets = [5, 0], sizes = [1, 256], strides = [1, 1]} : vector<9x256xf32> to vector<1x256xf32>
    %154 = vector.broadcast %153 : vector<1x256xf32> to vector<16x256xf32>
    %155 = arith.subf %10, %154 : vector<16x256xf32>
    %156 = math.absf %155 : vector<16x256xf32>
    %cst_41 = arith.constant 1.000000e+00 : f32
    %157 = vector.broadcast %cst_41 : f32 to vector<16x256xf32>
    %158 = arith.subf %157, %156 : vector<16x256xf32>
    %cst_42 = arith.constant 0.000000e+00 : f32
    %159 = vector.broadcast %cst_42 : f32 to vector<16x256xf32>
    %160 = arith.maximumf %158, %159 : vector<16x256xf32>
    %161 = vector.extract_strided_slice %6 {offsets = [5, 0], sizes = [1, 256], strides = [1, 1]} : vector<9x256xf32> to vector<1x256xf32>
    %162 = vector.broadcast %161 : vector<1x256xf32> to vector<16x256xf32>
    %163 = arith.subf %12, %162 : vector<16x256xf32>
    %164 = math.absf %163 : vector<16x256xf32>
    %cst_43 = arith.constant 1.000000e+00 : f32
    %165 = vector.broadcast %cst_43 : f32 to vector<16x256xf32>
    %166 = arith.subf %165, %164 : vector<16x256xf32>
    %cst_44 = arith.constant 0.000000e+00 : f32
    %167 = vector.broadcast %cst_44 : f32 to vector<16x256xf32>
    %168 = arith.maximumf %166, %167 : vector<16x256xf32>
    %169 = vector.extract_strided_slice %8 {offsets = [5, 0], sizes = [1, 256], strides = [1, 1]} : vector<9x256xf32> to vector<1x256xf32>
    %170 = vector.broadcast %169 : vector<1x256xf32> to vector<16x256xf32>
    %171 = arith.mulf %168, %170 : vector<16x256xf32>
    %172 = vector.shape_cast %160 : vector<16x256xf32> to vector<16x1x256xf32>
    %173 = vector.shape_cast %171 : vector<16x256xf32> to vector<1x16x256xf32>
    %174 = vector.broadcast %172 : vector<16x1x256xf32> to vector<16x16x256xf32>
    %175 = vector.broadcast %173 : vector<1x16x256xf32> to vector<16x16x256xf32>
    %176 = arith.mulf %174, %175 : vector<16x16x256xf32>
    %177 = vector.shape_cast %176 : vector<16x16x256xf32> to vector<256x256xf32>
    %178 = arith.truncf %177 : vector<256x256xf32> to vector<256x256xbf16>
    %cst_45 = arith.constant dense<0.000000e+00> : vector<8x256xf32>
    %179 = tpu.matmul %2, %178, %cst_45 {dimension_numbers = #tpu.dot_dimension_numbers<[1], [0], [0], [1], [0, 0, 1, 1], [], []>} : vector<8x256xbf16>, vector<256x256xbf16>, vector<8x256xf32> -> vector<8x256xf32>
    %c40 = arith.constant 40 : index
    %c0_46 = arith.constant 0 : index
    %180 = vector.load %arg9[%c40, %c0_46] : memref<72x256xf32, #tpu.memory_space<vmem>>, vector<8x256xf32>
    tpu.vector_store %arg9[%c40, %c0_46], %179 {strides = array<i32>} : memref<72x256xf32, #tpu.memory_space<vmem>>, vector<8x256xf32>,
    %181 = vector.extract_strided_slice %4 {offsets = [6, 0], sizes = [1, 256], strides = [1, 1]} : vector<9x256xf32> to vector<1x256xf32>
    %182 = vector.broadcast %181 : vector<1x256xf32> to vector<16x256xf32>
    %183 = arith.subf %10, %182 : vector<16x256xf32>
    %184 = math.absf %183 : vector<16x256xf32>
    %cst_47 = arith.constant 1.000000e+00 : f32
    %185 = vector.broadcast %cst_47 : f32 to vector<16x256xf32>
    %186 = arith.subf %185, %184 : vector<16x256xf32>
    %cst_48 = arith.constant 0.000000e+00 : f32
    %187 = vector.broadcast %cst_48 : f32 to vector<16x256xf32>
    %188 = arith.maximumf %186, %187 : vector<16x256xf32>
    %189 = vector.extract_strided_slice %6 {offsets = [6, 0], sizes = [1, 256], strides = [1, 1]} : vector<9x256xf32> to vector<1x256xf32>
    %190 = vector.broadcast %189 : vector<1x256xf32> to vector<16x256xf32>
    %191 = arith.subf %12, %190 : vector<16x256xf32>
    %192 = math.absf %191 : vector<16x256xf32>
    %cst_49 = arith.constant 1.000000e+00 : f32
    %193 = vector.broadcast %cst_49 : f32 to vector<16x256xf32>
    %194 = arith.subf %193, %192 : vector<16x256xf32>
    %cst_50 = arith.constant 0.000000e+00 : f32
    %195 = vector.broadcast %cst_50 : f32 to vector<16x256xf32>
    %196 = arith.maximumf %194, %195 : vector<16x256xf32>
    %197 = vector.extract_strided_slice %8 {offsets = [6, 0], sizes = [1, 256], strides = [1, 1]} : vector<9x256xf32> to vector<1x256xf32>
    %198 = vector.broadcast %197 : vector<1x256xf32> to vector<16x256xf32>
    %199 = arith.mulf %196, %198 : vector<16x256xf32>
    %200 = vector.shape_cast %188 : vector<16x256xf32> to vector<16x1x256xf32>
    %201 = vector.shape_cast %199 : vector<16x256xf32> to vector<1x16x256xf32>
    %202 = vector.broadcast %200 : vector<16x1x256xf32> to vector<16x16x256xf32>
    %203 = vector.broadcast %201 : vector<1x16x256xf32> to vector<16x16x256xf32>
    %204 = arith.mulf %202, %203 : vector<16x16x256xf32>
    %205 = vector.shape_cast %204 : vector<16x16x256xf32> to vector<256x256xf32>
    %206 = arith.truncf %205 : vector<256x256xf32> to vector<256x256xbf16>
    %cst_51 = arith.constant dense<0.000000e+00> : vector<8x256xf32>
    %207 = tpu.matmul %2, %206, %cst_51 {dimension_numbers = #tpu.dot_dimension_numbers<[1], [0], [0], [1], [0, 0, 1, 1], [], []>} : vector<8x256xbf16>, vector<256x256xbf16>, vector<8x256xf32> -> vector<8x256xf32>
    %c48 = arith.constant 48 : index
    %c0_52 = arith.constant 0 : index
    %208 = vector.load %arg9[%c48, %c0_52] : memref<72x256xf32, #tpu.memory_space<vmem>>, vector<8x256xf32>
    tpu.vector_store %arg9[%c48, %c0_52], %207 {strides = array<i32>} : memref<72x256xf32, #tpu.memory_space<vmem>>, vector<8x256xf32>,
    %209 = vector.extract_strided_slice %4 {offsets = [7, 0], sizes = [1, 256], strides = [1, 1]} : vector<9x256xf32> to vector<1x256xf32>
    %210 = vector.broadcast %209 : vector<1x256xf32> to vector<16x256xf32>
    %211 = arith.subf %10, %210 : vector<16x256xf32>
    %212 = math.absf %211 : vector<16x256xf32>
    %cst_53 = arith.constant 1.000000e+00 : f32
    %213 = vector.broadcast %cst_53 : f32 to vector<16x256xf32>
    %214 = arith.subf %213, %212 : vector<16x256xf32>
    %cst_54 = arith.constant 0.000000e+00 : f32
    %215 = vector.broadcast %cst_54 : f32 to vector<16x256xf32>
    %216 = arith.maximumf %214, %215 : vector<16x256xf32>
    %217 = vector.extract_strided_slice %6 {offsets = [7, 0], sizes = [1, 256], strides = [1, 1]} : vector<9x256xf32> to vector<1x256xf32>
    %218 = vector.broadcast %217 : vector<1x256xf32> to vector<16x256xf32>
    %219 = arith.subf %12, %218 : vector<16x256xf32>
    %220 = math.absf %219 : vector<16x256xf32>
    %cst_55 = arith.constant 1.000000e+00 : f32
    %221 = vector.broadcast %cst_55 : f32 to vector<16x256xf32>
    %222 = arith.subf %221, %220 : vector<16x256xf32>
    %cst_56 = arith.constant 0.000000e+00 : f32
    %223 = vector.broadcast %cst_56 : f32 to vector<16x256xf32>
    %224 = arith.maximumf %222, %223 : vector<16x256xf32>
    %225 = vector.extract_strided_slice %8 {offsets = [7, 0], sizes = [1, 256], strides = [1, 1]} : vector<9x256xf32> to vector<1x256xf32>
    %226 = vector.broadcast %225 : vector<1x256xf32> to vector<16x256xf32>
    %227 = arith.mulf %224, %226 : vector<16x256xf32>
    %228 = vector.shape_cast %216 : vector<16x256xf32> to vector<16x1x256xf32>
    %229 = vector.shape_cast %227 : vector<16x256xf32> to vector<1x16x256xf32>
    %230 = vector.broadcast %228 : vector<16x1x256xf32> to vector<16x16x256xf32>
    %231 = vector.broadcast %229 : vector<1x16x256xf32> to vector<16x16x256xf32>
    %232 = arith.mulf %230, %231 : vector<16x16x256xf32>
    %233 = vector.shape_cast %232 : vector<16x16x256xf32> to vector<256x256xf32>
    %234 = arith.truncf %233 : vector<256x256xf32> to vector<256x256xbf16>
    %cst_57 = arith.constant dense<0.000000e+00> : vector<8x256xf32>
    %235 = tpu.matmul %2, %234, %cst_57 {dimension_numbers = #tpu.dot_dimension_numbers<[1], [0], [0], [1], [0, 0, 1, 1], [], []>} : vector<8x256xbf16>, vector<256x256xbf16>, vector<8x256xf32> -> vector<8x256xf32>
    %c56 = arith.constant 56 : index
    %c0_58 = arith.constant 0 : index
    %236 = vector.load %arg9[%c56, %c0_58] : memref<72x256xf32, #tpu.memory_space<vmem>>, vector<8x256xf32>
    tpu.vector_store %arg9[%c56, %c0_58], %235 {strides = array<i32>} : memref<72x256xf32, #tpu.memory_space<vmem>>, vector<8x256xf32>,
    %237 = vector.extract_strided_slice %4 {offsets = [8, 0], sizes = [1, 256], strides = [1, 1]} : vector<9x256xf32> to vector<1x256xf32>
    %238 = vector.broadcast %237 : vector<1x256xf32> to vector<16x256xf32>
    %239 = arith.subf %10, %238 : vector<16x256xf32>
    %240 = math.absf %239 : vector<16x256xf32>
    %cst_59 = arith.constant 1.000000e+00 : f32
    %241 = vector.broadcast %cst_59 : f32 to vector<16x256xf32>
    %242 = arith.subf %241, %240 : vector<16x256xf32>
    %cst_60 = arith.constant 0.000000e+00 : f32
    %243 = vector.broadcast %cst_60 : f32 to vector<16x256xf32>
    %244 = arith.maximumf %242, %243 : vector<16x256xf32>
    %245 = vector.extract_strided_slice %6 {offsets = [8, 0], sizes = [1, 256], strides = [1, 1]} : vector<9x256xf32> to vector<1x256xf32>
    %246 = vector.broadcast %245 : vector<1x256xf32> to vector<16x256xf32>
    %247 = arith.subf %12, %246 : vector<16x256xf32>
    %248 = math.absf %247 : vector<16x256xf32>
    %cst_61 = arith.constant 1.000000e+00 : f32
    %249 = vector.broadcast %cst_61 : f32 to vector<16x256xf32>
    %250 = arith.subf %249, %248 : vector<16x256xf32>
    %cst_62 = arith.constant 0.000000e+00 : f32
    %251 = vector.broadcast %cst_62 : f32 to vector<16x256xf32>
    %252 = arith.maximumf %250, %251 : vector<16x256xf32>
    %253 = vector.extract_strided_slice %8 {offsets = [8, 0], sizes = [1, 256], strides = [1, 1]} : vector<9x256xf32> to vector<1x256xf32>
    %254 = vector.broadcast %253 : vector<1x256xf32> to vector<16x256xf32>
    %255 = arith.mulf %252, %254 : vector<16x256xf32>
    %256 = vector.shape_cast %244 : vector<16x256xf32> to vector<16x1x256xf32>
    %257 = vector.shape_cast %255 : vector<16x256xf32> to vector<1x16x256xf32>
    %258 = vector.broadcast %256 : vector<16x1x256xf32> to vector<16x16x256xf32>
    %259 = vector.broadcast %257 : vector<1x16x256xf32> to vector<16x16x256xf32>
    %260 = arith.mulf %258, %259 : vector<16x16x256xf32>
    %261 = vector.shape_cast %260 : vector<16x16x256xf32> to vector<256x256xf32>
    %262 = arith.truncf %261 : vector<256x256xf32> to vector<256x256xbf16>
    %cst_63 = arith.constant dense<0.000000e+00> : vector<8x256xf32>
    %263 = tpu.matmul %2, %262, %cst_63 {dimension_numbers = #tpu.dot_dimension_numbers<[1], [0], [0], [1], [0, 0, 1, 1], [], []>} : vector<8x256xbf16>, vector<256x256xbf16>, vector<8x256xf32> -> vector<8x256xf32>
    %c64 = arith.constant 64 : index
    %c0_64 = arith.constant 0 : index
    %264 = vector.load %arg9[%c64, %c0_64] : memref<72x256xf32, #tpu.memory_space<vmem>>, vector<8x256xf32>
    tpu.vector_store %arg9[%c64, %c0_64], %263 {strides = array<i32>} : memref<72x256xf32, #tpu.memory_space<vmem>>, vector<8x256xf32>,
    %c0_65 = arith.constant 0 : index
    %c0_66 = arith.constant 0 : index
    %265 = vector.load %arg6[%c0_65, %c0_66] : memref<8x72xf32, #tpu.memory_space<vmem>>, vector<8x72xf32>
    %c0_67 = arith.constant 0 : index
    %c0_68 = arith.constant 0 : index
    %266 = vector.load %arg9[%c0_67, %c0_68] : memref<72x256xf32, #tpu.memory_space<vmem>>, vector<72x256xf32>
    %cst_69 = arith.constant dense<0.000000e+00> : vector<8x256xf32>
    %267 = tpu.matmul %265, %266, %cst_69 {dimension_numbers = #tpu.dot_dimension_numbers<[1], [0], [0], [1], [0, 0, 1, 1], [], []>} : vector<8x72xf32>, vector<72x256xf32>, vector<8x256xf32> -> vector<8x256xf32>
    %c0_70 = arith.constant 0 : index
    %c0_71 = arith.constant 0 : index
    %268 = vector.load %arg7[%c0_70, %c0_71] : memref<8x1xf32, #tpu.memory_space<vmem>>, vector<8x1xf32>
    %269 = vector.broadcast %268 : vector<8x1xf32> to vector<8x256xf32>
    %270 = arith.addf %267, %269 : vector<8x256xf32>
    %c0_72 = arith.constant 0 : index
    %c0_73 = arith.constant 0 : index
    %c0_74 = arith.constant 0 : index
    %271 = vector.load %arg8[%c0_72, %c0_73, %c0_74] : memref<1x8x256xf32, #tpu.memory_space<vmem>>, vector<1x8x256xf32>
    %272 = vector.shape_cast %271 : vector<1x8x256xf32> to vector<8x256xf32>
    %273 = vector.shape_cast %270 : vector<8x256xf32> to vector<1x8x256xf32>
    tpu.vector_store %arg8[%c0_72, %c0_73, %c0_74], %273 {strides = array<i32>} : memref<1x8x256xf32, #tpu.memory_space<vmem>>, vector<1x8x256xf32>,
    return
  }
  func.func @transform_0(%arg0: i32, %arg1: i32) -> (i32, i32, i32) {
    %c0_i32 = arith.constant 0 : i32
    %c0_i32_0 = arith.constant 0 : i32
    %c0_i32_1 = arith.constant 0 : i32
    return %arg0, %c0_i32, %c0_i32_0 : i32, i32, i32
  }
  func.func @transform_1(%arg0: i32, %arg1: i32) -> (i32, i32, i32) {
    %c0_i32 = arith.constant 0 : i32
    %c0_i32_0 = arith.constant 0 : i32
    return %arg0, %c0_i32, %arg1 : i32, i32, i32
  }
  func.func @transform_2(%arg0: i32, %arg1: i32) -> (i32, i32, i32) {
    %c0_i32 = arith.constant 0 : i32
    %c0_i32_0 = arith.constant 0 : i32
    return %arg0, %c0_i32, %arg1 : i32, i32, i32
  }
  func.func @transform_3(%arg0: i32, %arg1: i32) -> (i32, i32, i32) {
    %c0_i32 = arith.constant 0 : i32
    %c0_i32_0 = arith.constant 0 : i32
    return %arg0, %c0_i32, %arg1 : i32, i32, i32
  }
  func.func @transform_4(%arg0: i32, %arg1: i32) -> (i32, i32) {
    %c0_i32 = arith.constant 0 : i32
    %c0_i32_0 = arith.constant 0 : i32
    %c0_i32_1 = arith.constant 0 : i32
    return %c0_i32, %c0_i32_0 : i32, i32
  }
  func.func @transform_5(%arg0: i32, %arg1: i32) -> (i32, i32) {
    %c0_i32 = arith.constant 0 : i32
    %c0_i32_0 = arith.constant 0 : i32
    %c0_i32_1 = arith.constant 0 : i32
    return %c0_i32, %c0_i32_0 : i32, i32
  }
  func.func @transform_6(%arg0: i32, %arg1: i32) -> (i32, i32, i32) {
    %c0_i32 = arith.constant 0 : i32
    %c0_i32_0 = arith.constant 0 : i32
    return %arg0, %c0_i32, %arg1 : i32, i32, i32
  }
}

</mosaic_0001>

<bundles_post_ra>
// kernel: tpu_custom_call.1
= control target key start
LH: loop header
LB: loop body
LE: loop exit
PB: predicated region body
PF: predicated region fallthrough
CT: control target
= control target key end

     0   :  { %11 = vsyncpa [#allocation4], 0  ;;  %s7028_s0 = inlined_call_operand.vmem [shape: f32[2,8,256], index: 0, kind: input, shape index: {}]   ;;  %s7029_s1 = inlined_call_operand.vmem [shape: f32[2,9,256], index: 1, kind: input, shape index: {}]   ;;  %s7030_s2 = inlined_call_operand.vmem [shape: f32[2,9,256], index: 2, kind: input, shape index: {}]   ;;  %s7031_s3 = inlined_call_operand.vmem [shape: f32[2,9,256], index: 3, kind: input, shape index: {}]   ;;  %s7032_s4 = inlined_call_operand.vmem [shape: f32[8,72], index: 4, kind: input, shape index: {}]   ;;  %s7033_s5 = inlined_call_operand.vmem [shape: f32[8,1], index: 5, kind: input, shape index: {}]   ;;  %s7034_s6 = inlined_call_operand.hbm [shape: f32[2,8,256], index: 6, kind: output, shape index: {}]  }
   0x1   :  { %13 = vsyncpa [#allocation4 + $0x1], 0  ;;  %s5041_s21 = smov 0   ;;  %s5043_s22 = smov 0  }
   0x2   :  { %s5045_s23 = smov 0   ;;  %s5047_s24 = smov 0  }
   0x3   :  { %s5049_s25 = smov 0   ;;  %s5051_s26 = smov 0  }
   0x4 LB: > { %s4804_s27 = sadd.s32 4294967295, %s5000_s26   ;;  %s4805_s28 = sadd.s32 4294967294, %s5000_s26   ;;  %s5000_s26 = sphi %s5051_s26, %s19_s26   ;;  %s4996_s25 = sphi %s5049_s25, %s7049_s25   ;;  %s4992_s24 = sphi %s5047_s24, %s7048_s24   ;;  %s4988_s23 = sphi %s5045_s23, %s7047_s23   ;;  %s4984_s22 = sphi %s5043_s22, %s7046_s22   ;;  %s4980_s21 = sphi %s5041_s21, %s7045_s21  }
   0x5   : > { %s31_s29 = sadd.s32 1, %s4996_s25  ;;  %s192_s30 = sadd.s32 1, %s4988_s23 }
   0x6   : > { %p33_p0 = scmp.ge.s32.totalorder %s31_s29, 2  ;;  %p202_p1 = scmp.ne.s32.totalorder %s4988_s23, %s4984_s22 }
   0x7   : > { %p203_p2 = scmp.eq.s32.totalorder %s4804_s27, 1  ;;  %p208_p3 = scmp.ne.s32.totalorder %s4984_s22, %s4980_s21 }
   0x8   : > { %s7051_s29 = smov (%p33_p0, %s31_s29), 0  ;;  %p209_p5 = scmp.eq.s32.totalorder %s4805_s28, 1 }
   0x9   : > { %p5081_p4 = por %p203_p2, %p202_p1  ;;  %s187_s8 = ssub.s32 %s4996_s25, %s7051_s29 }
   0xa   : > { %p4808_p6 = scmp.ge.s32.totalorder %s5000_s26, 1  ;;  %p190_p7 = scmp.eq.s32.totalorder %s187_s8, 0 }
   0xb   : > { %p5088_p8 = por %p209_p5, %p208_p3  ;;  %p280_p9 = scmp.lt.s32.totalorder %s5000_s26, 3 }
   0xc   : > { %s5094_s10 = scalar_select %p190_p7, %s4988_s23, %s192_s30  }
   0xd   : > { %p281_p10 = pnand %p4808_p6, %p280_p9 }
   0xf   : > { %284 = sbr.rel (%p281_p10) target bundleno = 959 (0x3bf), region = 44 }
  0x16   : > { %p337_p11 = scmp.lt.s32.totalorder %s4992_s24, 1  ;;  %v389_v0 = vlaneseq  ;;  %v5002_v1 = vmov 1966171168   ;;  %vm4586_vm0 = vcmask 588800   ;;  %s334_s16 = sand.u32 1, %s4984_s22  }
  0x17   : > { %v461_v2 = vunpack.c.l.s4 %v5002_v1  ;;  %s4809_s17 = sshll.u32 %s334_s16, 4  ;;  %s4664_s8 = scalar_lea.sflag [#allocation4], %s334_s16 }
  0x18   : > { %s5098_s11 = scalar_select %p337_p11, %s4992_s24, 1  ;;  %v5100_v3 = vshrl.u32 %v389_v0, 7 }
  0x19   : > { %v462_v4 = vunpack.c.0.s8 %v461_v2  ;;  %s336_s19 = scalar_lea.vmem [#allocation3], %s4809_s17 }
  0x1a   : > { %s4831_s12 = sshll.u32 %s5098_s11, 5  ;;  %v391_v5 = vadd.s32 8, %v5100_v3  ;;  %v5105_v6 = vsub.s32 0, %v5100_v3  ;;  %v5118_v7 = vcvt.s32.f32 %v5100_v3  ;;  %v5121_v8 = vsub.s32 1, %v5100_v3  ;;  %s4830_s28 = sshll.u32 %s5098_s11, 4 }
  0x1b   : > { %s5110_s15 = scalar_lea.vmem %s7029_s1, %s4831_s12  ;;  %s5115_s18 = scalar_lea.vmem %s7030_s2, %s4831_s12  ;;  %v5140_v13 = vsub.s32 %v462_v4, %v5100_v3 }
  0x1c   : > { %s5126_s27 = scalar_lea.vmem %s7031_s3, %s4831_s12  ;;  %v5129_v9 = vld [vmem:[%s5110_s15] sm:$0xff]  ;;  %v5132_v10 = vld [vmem:[%s5110_s15 + $0x8] sm:$0xff]  ;;  %v5137_v12 = vcvt.s32.f32 %v391_v5  ;;  %v5146_v15 = vld [vmem:[%s5115_s18 + $0x10] ss:$0 sm:$0xff]  ;;  %s341_s11 = scalar_lea.vmem %s7028_s0, %s4830_s28 }
  0x1d   : > { %v5135_v11 = vld [vmem:[%s5115_s18] sm:$0xff]  ;;  %v5143_v14 = vld [vmem:[%s5115_s18 + $0x8] sm:$0xff]  ;;  %v5149_v16 = vld [vmem:[%s5115_s18 + $0x18] ss:$0 sm:$0xff]  ;;  %v5153_v17 = vrot.slane %v5129_v9, %v5105_v6  ;;  %v5157_v18 = vrot.slane %v5132_v10, %v5105_v6  ;;  %v4130_v25 = vsub.f32 %v5118_v7, %v5146_v15  ;;  %s4680_s20 = sshll.u32 %s336_s19, 4  ;;  %s6983_s20 = int_to_ptr.vmem [resolvable:$true] %s4680_s20 }
  0x1e   : > { %v421_v19 = vrot.slane %v5135_v11, %v5105_v6  ;;  %v884_v20 = vrot.slane %v5135_v11, %v5121_v8  ;;  %v5164_v21 = vld [vmem:[%s5126_s27] sm:$0xff]  ;;  %v386_v22 = vld [vmem:[%s5126_s27 + $0x8] sm:$0xff]  ;;  %v425_v23 = vrot.slane %v5143_v14, %v5105_v6  ;;  %v888_v24 = vrot.slane %v5143_v14, %v5121_v8 }
  0x1f   : > { %v4131_v26 = vsub.f32 %v5118_v7, %v5149_v16  ;;  %v402_v27 = vsub.f32 %v5118_v7, %v5153_v17  ;;  %v403_v28 = vsub.f32 %v5118_v7, %v5157_v18  ;;  %v445_v33 = vrot.slane %v5164_v21, %v5105_v6 }
  0x20   : > { %v426_v29 = vsub.f32 %v5118_v7, %v421_v19  ;;  %v428_v30 = vsub.f32 %v5137_v12, %v421_v19  ;;  %v427_v31 = vsub.f32 %v5118_v7, %v425_v23  ;;  %v429_v32 = vsub.f32 %v5137_v12, %v425_v23 }
  0x21   : > { %v449_v34 = vrot.slane %v386_v22, %v5105_v6  ;;  %v406_v35 = vand.u32 2147483647, %v402_v27  ;;  %v407_v36 = vand.u32 2147483647, %v403_v28  ;;  %v889_v38 = vsub.f32 %v5118_v7, %v884_v20 }
  0x22   : > { %v430_v37 = vand.u32 2147483647, %v426_v29  ;;  %v431_v39 = vand.u32 2147483647, %v427_v31  ;;  %v432_v40 = vand.u32 2147483647, %v428_v30  ;;  %v890_v42 = vsub.f32 %v5118_v7, %v888_v24 }
  0x23   : > { %v433_v41 = vand.u32 2147483647, %v429_v32  ;;  %v410_v43 = vsub.f32 1.0, %v406_v35  ;;  %v411_v44 = vsub.f32 1.0, %v407_v36  ;;  %v891_v46 = vsub.f32 %v5137_v12, %v884_v20 }
  0x24   : > { %v434_v45 = vsub.f32 1.0, %v430_v37  ;;  %v435_v47 = vsub.f32 1.0, %v431_v39  ;;  %v436_v48 = vsub.f32 1.0, %v432_v40  ;;  %v892_v50 = vsub.f32 %v5137_v12, %v888_v24 }
  0x25   : > { %v437_v49 = vsub.f32 1.0, %v433_v41  ;;  %v5190_v51 = vmax.f32 %v410_v43, 0.0  ;;  %v5192_v52 = vmax.f32 %v411_v44, 0.0  ;;  %v893_v54 = vand.u32 2147483647, %v889_v38 }
  0x26   : > { %v438_v53 = vmax.f32 %v434_v45, 0.0  ;;  %v439_v55 = vmax.f32 %v435_v47, 0.0  ;;  %v440_v56 = vmax.f32 %v436_v48, 0.0  ;;  %v894_v58 = vand.u32 2147483647, %v890_v42 }
  0x27   : > { %v441_v57 = vmax.f32 %v437_v49, 0.0  ;;  %v458_v60 = vcombine.low %v5190_v51, %v5192_v52  ;;  %v895_v61 = vand.u32 2147483647, %v891_v46  ;;  %v896_v62 = vand.u32 2147483647, %v892_v50 }
  0x28   : > { %v5194_v59 = vmul.f32 %v445_v33, %v438_v53  ;;  %v5198_v63 = vmul.f32 %v449_v34, %v439_v55  ;;  %v5200_v0 = vmul.f32 %v445_v33, %v440_v56  ;;  %v897_v2 = vsub.f32 1.0, %v893_v54  ;;  %v4822_v43 = vld [vmem:[%s5126_s27 + $0x10] ss:$0 sm:$0xff] }
  0x29   : > { %v5202_v1 = vmul.f32 %v449_v34, %v441_v57  ;;  %v466_v4 = vrot.slane %v458_v60, %v5140_v13  ;;  %v898_v5 = vsub.f32 1.0, %v894_v58  ;;  %v899_v19 = vsub.f32 1.0, %v895_v61 }
  0x2a   : > { %v900_v20 = vsub.f32 1.0, %v896_v62  ;;  %v901_v23 = vmax.f32 %v897_v2, 0.0  ;;  %v908_v24 = vrot.slane %v5164_v21, %v5121_v8  ;;  %v912_v27 = vrot.slane %v386_v22, %v5121_v8 }
  0x2b   : > { %v4132_v28 = vsub.f32 %v5137_v12, %v5146_v15  ;;  %v474_v29 = vcombine.high %v466_v4, %v466_v4  ;;  %v482_v30 = vrot.slane %v466_v4, %v5140_v13  ;;  %v902_v31 = vmax.f32 %v898_v5, 0.0 }
  0x2c   : > { %v903_v32 = vmax.f32 %v899_v19, 0.0  ;;  %v904_v33 = vmax.f32 %v900_v20, 0.0  ;;  %v5211_v34 = vmul.f32 %v908_v24, %v901_v23  ;;  %v4133_v35 = vsub.f32 %v5137_v12, %v5149_v16 }
  0x2d   : > { %v4134_v36 = vand.u32 2147483647, %v4130_v25  ;;  %v565_v37 = vrot.slane %v482_v30, %v5121_v8  ;;  %v5216_v22 = vmul.f32 %v912_v27, %v902_v31  ;;  %v4135_v15 = vand.u32 2147483647, %v4131_v26  ;;  %v4823_v25 = vld [vmem:[%s5126_s27 + $0x18] ss:$0 sm:$0xff] }
  0x2e   : > { %v5218_v38 = vmul.f32 %v908_v24, %v903_v32  ;;  %v5220_v39 = vmul.f32 %v912_v27, %v904_v33  ;;  %v4136_v40 = vand.u32 2147483647, %v4132_v28  ;;  %v4137_v41 = vand.u32 2147483647, %v4133_v35 }
  0x2f   : > { %v4138_v42 = vsub.f32 1.0, %v4134_v36  ;;  %v719_v44 = vmul.f32 %v565_v37, %v5198_v63  ;;  %v721_v45 = vmul.f32 %v565_v37, %v5202_v1  ;;  %v4139_v46 = vsub.f32 1.0, %v4135_v15 }
  0x30   : > { %v5227_v16 = vrot.slane %v5129_v9, %v5121_v8  ;;  %v4140_v47 = vsub.f32 1.0, %v4136_v40  ;;  %v4141_v48 = vsub.f32 1.0, %v4137_v41  ;;  %v5232_v26 = vrot.slane %v5132_v10, %v5121_v8 }
  0x31   : > { %v4142_v49 = vmax.f32 %v4138_v42, 0.0  ;;  %v783_v50 = vpack.c.bf16 %v721_v45, %v719_v44  ;;  %v4143_v53 = vmax.f32 %v4139_v46, 0.0  ;;  %v561_v55 = vrot.slane %v482_v30, %v5105_v6 }
  0x32   : > { %v865_v54 = vsub.f32 %v5118_v7, %v5227_v16  ;;  %v4144_v56 = vmax.f32 %v4140_v47, 0.0  ;;  %v4145_v57 = vmax.f32 %v4141_v48, 0.0  ;;  %v866_v60 = vsub.f32 %v5118_v7, %v5232_v26 }
  0x33   : > { %v5237_v58 = vmul.f32 %v4822_v43, %v4142_v49  ;;  %814 = vmatprep.subr.bf16.mxu0 %v783_v50  ;;  %v5241_v61 = vmul.f32 %v4823_v25, %v4143_v53  ;;  %v718_v2 = vmul.f32 %v561_v55, %v5194_v59  ;;  %v720_v4 = vmul.f32 %v561_v55, %v5200_v0 }
  0x34   : > { %v869_v62 = vand.u32 2147483647, %v865_v54  ;;  %v5245_v5 = vmul.f32 %v4822_v43, %v4144_v56  ;;  %v5247_v19 = vmul.f32 %v4823_v25, %v4145_v57  ;;  %v870_v20 = vand.u32 2147483647, %v866_v60 }
  0x35   : > { %v496_v23 = vrot.slane %v474_v29, %v5140_v13  ;;  %v782_v27 = vpack.c.bf16 %v720_v4, %v718_v2  ;;  %v504_v28 = vcombine.high %v482_v30, %v482_v30  ;;  %v459_v31 = vcombine.high %v5190_v51, %v5192_v52 }
  0x36   : > { %7038 = vst [vmem:[#allocation6_spill] sm:$0xff] %v5245_v5  ;;  %v873_v24 = vsub.f32 1.0, %v869_v62  ;;  %v874_v32 = vsub.f32 1.0, %v870_v20 }
  0x37   : > { %v573_v33 = vrot.slane %v496_v23, %v5121_v8  ;;  %v569_v35 = vrot.slane %v496_v23, %v5105_v6  ;;  %v506_v36 = vcombine.high %v496_v23, %v496_v23  ;;  %815 = vmatpush1.bf16.msra.mxu0 %v782_v27  ;;  %v581_v15 = vrot.slane %v504_v28, %v5121_v8 }
  0x38   : > { %v877_v37 = vmax.f32 %v873_v24, 0.0  ;;  %v577_v40 = vrot.slane %v504_v28, %v5105_v6  ;;  %v5257_v29 = vrot.slane %v459_v31, %v5140_v13  ;;  %v878_v41 = vmax.f32 %v874_v32, 0.0 }
  0x39   : > { %v723_v30 = vmul.f32 %v573_v33, %v5198_v63  ;;  %v725_v51 = vmul.f32 %v573_v33, %v5202_v1  ;;  %v722_v52 = vmul.f32 %v569_v35, %v5194_v59  ;;  %v724_v42 = vmul.f32 %v569_v35, %v5200_v0 }
  0x3a   : > { %v727_v43 = vmul.f32 %v581_v15, %v5198_v63  ;;  %v729_v44 = vmul.f32 %v581_v15, %v5202_v1  ;;  %v726_v45 = vmul.f32 %v577_v40, %v5194_v59  ;;  %v921_v46 = vcombine.low %v877_v37, %v878_v41 }
  0x3b   : > { %v785_v25 = vpack.c.bf16 %v725_v51, %v723_v30  ;;  %v728_v47 = vmul.f32 %v577_v40, %v5200_v0  ;;  %v589_v48 = vrot.slane %v506_v36, %v5121_v8  ;;  %v784_v49 = vpack.c.bf16 %v724_v42, %v722_v52 }
  0x3c   : > { %v787_v50 = vpack.c.bf16 %v729_v44, %v727_v43  ;;  %v585_v53 = vrot.slane %v506_v36, %v5105_v6  ;;  %v5271_v54 = vrot.slane %v5257_v29, %v5140_v13  ;;  %v929_v55 = vrot.slane %v921_v46, %v5140_v13 }
  0x3d   : > { %816 = vmatprep.subr.bf16.mxu0 %v785_v25  ;;  %v786_v56 = vpack.c.bf16 %v728_v47, %v726_v45  ;;  %v731_v57 = vmul.f32 %v589_v48, %v5198_v63  ;;  %v733_v60 = vmul.f32 %v589_v48, %v5202_v1  ;;  %v922_v20 = vcombine.high %v877_v37, %v878_v41 }
  0x3e   : > { %817 = vmatpush1.bf16.msra.mxu0 %v784_v49  ;;  %v730_v62 = vmul.f32 %v585_v53, %v5194_v59  ;;  %v732_v2 = vmul.f32 %v585_v53, %v5200_v0  ;;  %v597_v4 = vrot.slane %v5271_v54, %v5121_v8  ;;  %v937_v23 = vcombine.high %v929_v55, %v929_v55 }
  0x3f   : > { %v945_v24 = vrot.slane %v929_v55, %v5140_v13  ;;  %818 = vmatprep.subr.bf16.mxu0 %v787_v50  ;;  %v789_v27 = vpack.c.bf16 %v733_v60, %v731_v57  ;;  %v593_v28 = vrot.slane %v5271_v54, %v5105_v6  ;;  %v5286_v35 = vrot.slane %v922_v20, %v5140_v13 }
  0x40   : > { %v788_v31 = vpack.c.bf16 %v732_v2, %v730_v62  ;;  %v735_v32 = vmul.f32 %v597_v4, %v5198_v63  ;;  %v737_v33 = vmul.f32 %v597_v4, %v5202_v1  ;;  %v959_v15 = vrot.slane %v937_v23, %v5140_v13 }
  0x41   : > { %v1028_v36 = vrot.slane %v945_v24, %v5121_v8  ;;  %v1024_v37 = vrot.slane %v945_v24, %v5105_v6  ;;  %v967_v40 = vcombine.high %v945_v24, %v945_v24  ;;  %v952_v30 = vrot.slane %v5286_v35, %v5140_v13 }
  0x42   : > { %819 = vmatpush1.bf16.msra.mxu0 %v786_v56  ;;  %v791_v41 = vpack.c.bf16 %v737_v33, %v735_v32  ;;  %v734_v51 = vmul.f32 %v593_v28, %v5194_v59  ;;  %v736_v52 = vmul.f32 %v593_v28, %v5200_v0  ;;  %v1036_v46 = vrot.slane %v959_v15, %v5121_v8 }
  0x43   : > { %v1182_v42 = vmul.f32 %v1028_v36, %v5216_v22  ;;  %v1184_v43 = vmul.f32 %v1028_v36, %v5220_v39  ;;  %v1181_v44 = vmul.f32 %v1024_v37, %v5211_v34  ;;  %v1183_v45 = vmul.f32 %v1024_v37, %v5218_v38  ;;  %820 = vmatprep.subr.bf16.mxu0 %v789_v27 }
  0x44   : > { %v1032_v25 = vrot.slane %v959_v15, %v5105_v6  ;;  %v1044_v47 = vrot.slane %v967_v40, %v5121_v8  ;;  %v1040_v48 = vrot.slane %v967_v40, %v5105_v6  ;;  %v969_v53 = vcombine.high %v959_v15, %v959_v15 }
  0x45   : > { %v1246_v49 = vpack.c.bf16 %v1184_v43, %v1182_v42  ;;  %v1245_v50 = vpack.c.bf16 %v1183_v45, %v1181_v44  ;;  %v1060_v55 = vrot.slane %v952_v30, %v5121_v8  ;;  %v1186_v56 = vmul.f32 %v1036_v46, %v5216_v22 }
  0x46   : > { %v1188_v57 = vmul.f32 %v1036_v46, %v5220_v39  ;;  %v1185_v60 = vmul.f32 %v1032_v25, %v5211_v34  ;;  %v1187_v62 = vmul.f32 %v1032_v25, %v5218_v38  ;;  %821 = vmatpush1.bf16.msra.mxu0 %v788_v31  ;;  %v1190_v2 = vmul.f32 %v1044_v47, %v5216_v22 }
  0x47   : > { %1277 = vmatprep.subr.bf16.mxu1 %v1246_v49  ;;  %v1192_v4 = vmul.f32 %v1044_v47, %v5220_v39  ;;  %v1189_v20 = vmul.f32 %v1040_v48, %v5211_v34  ;;  %v1191_v23 = vmul.f32 %v1040_v48, %v5218_v38  ;;  %v1052_v28 = vrot.slane %v969_v53, %v5121_v8 }
  0x48   : > { %1278 = vmatpush1.bf16.msra.mxu1 %v1245_v50  ;;  %v1248_v24 = vpack.c.bf16 %v1188_v57, %v1186_v56  ;;  %v1247_v27 = vpack.c.bf16 %v1187_v62, %v1185_v60  ;;  %v1048_v32 = vrot.slane %v969_v53, %v5105_v6  ;;  %822 = vmatprep.subr.bf16.mxu0 %v791_v41  ;;  %v5331_v53 = vsub.s32 2, %v5100_v3 }
  0x49   : > { %v1250_v33 = vpack.c.bf16 %v1192_v4, %v1190_v2  ;;  %v1249_v36 = vpack.c.bf16 %v1191_v23, %v1189_v20  ;;  %v1198_v31 = vmul.f32 %v1060_v55, %v5216_v22  ;;  %v1200_v37 = vmul.f32 %v1060_v55, %v5220_v39 }
  0x4a   : > { %1279 = vmatprep.subr.bf16.mxu1 %v1248_v24  ;;  %v1194_v15 = vmul.f32 %v1052_v28, %v5216_v22  ;;  %v1196_v40 = vmul.f32 %v1052_v28, %v5220_v39  ;;  %v1193_v42 = vmul.f32 %v1048_v32, %v5211_v34  ;;  %v1195_v43 = vmul.f32 %v1048_v32, %v5218_v38 }
  0x4b   : > { %v1254_v44 = vpack.c.bf16 %v1200_v37, %v1198_v31  ;;  %v790_v45 = vpack.c.bf16 %v736_v52, %v734_v51  ;;  %v1056_v46 = vrot.slane %v952_v30, %v5105_v6  ;;  %v475_v41 = vcombine.high %v5257_v29, %v5257_v29 }
  0x4c   : > { %1280 = vmatpush1.bf16.msra.mxu1 %v1247_v27  ;;  %v1252_v25 = vpack.c.bf16 %v1196_v40, %v1194_v15  ;;  %v1251_v47 = vpack.c.bf16 %v1195_v43, %v1193_v42  ;;  %v938_v48 = vcombine.high %v5286_v35, %v5286_v35  ;;  %v505_v49 = vcombine.high %v5271_v54, %v5271_v54 }
  0x4d   : > { %1281 = vmatprep.subr.bf16.mxu1 %v1250_v33  ;;  %823 = vmatpush1.bf16.msra.mxu0 %v790_v45  ;;  %v1197_v50 = vmul.f32 %v1056_v46, %v5211_v34  ;;  %v1199_v51 = vmul.f32 %v1056_v46, %v5218_v38  ;;  %v503_v52 = vrot.slane %v475_v41, %v5140_v13 }
  0x4e   : > { %v966_v29 = vrot.slane %v938_v48, %v5140_v13  ;;  %v613_v55 = vrot.slane %v505_v49, %v5121_v8  ;;  %v968_v56 = vcombine.high %v952_v30, %v952_v30  ;;  %v609_v35 = vrot.slane %v505_v49, %v5105_v6 }
  0x4f   : > { %v1253_v57 = vpack.c.bf16 %v1199_v51, %v1197_v50  ;;  %v605_v54 = vrot.slane %v503_v52, %v5121_v8  ;;  %v601_v60 = vrot.slane %v503_v52, %v5105_v6  ;;  %v507_v62 = vcombine.high %v503_v52, %v503_v52 }
  0x50   : > { %1282 = vmatpush1.bf16.msra.mxu1 %v1249_v36  ;;  %v1068_v2 = vrot.slane %v966_v29, %v5121_v8  ;;  %v1064_v4 = vrot.slane %v966_v29, %v5105_v6  ;;  %v743_v20 = vmul.f32 %v613_v55, %v5198_v63  ;;  %v745_v23 = vmul.f32 %v613_v55, %v5202_v1 }
  0x51   : > { %1283 = vmatprep.subr.bf16.mxu1 %v1252_v25  ;;  %v739_v30 = vmul.f32 %v605_v54, %v5198_v63  ;;  %v741_v24 = vmul.f32 %v605_v54, %v5202_v1  ;;  %v738_v27 = vmul.f32 %v601_v60, %v5194_v59  ;;  %v740_v28 = vmul.f32 %v601_v60, %v5200_v0 }
  0x52   : > { %v1202_v32 = vmul.f32 %v1068_v2, %v5216_v22  ;;  %v1204_v33 = vmul.f32 %v1068_v2, %v5220_v39  ;;  %v1201_v36 = vmul.f32 %v1064_v4, %v5211_v34  ;;  %v1203_v31 = vmul.f32 %v1064_v4, %v5218_v38 }
  0x53   : > { %v793_v37 = vpack.c.bf16 %v741_v24, %v739_v30  ;;  %v792_v15 = vpack.c.bf16 %v740_v28, %v738_v27  ;;  %v795_v40 = vpack.c.bf16 %v745_v23, %v743_v20  ;;  %v1076_v42 = vrot.slane %v968_v56, %v5121_v8  ;;  %v374_v28 = vld [vmem:[%s341_s11 + $0x8] sm:$0xff] }
  0x54   : > { %1284 = vmatpush1.bf16.msra.mxu1 %v1251_v47  ;;  %v1256_v43 = vpack.c.bf16 %v1204_v33, %v1202_v32  ;;  %v1255_v45 = vpack.c.bf16 %v1203_v31, %v1201_v36  ;;  %v742_v46 = vmul.f32 %v609_v35, %v5194_v59  ;;  %v744_v41 = vmul.f32 %v609_v35, %v5200_v0  ;;  %v373_v32 = vld [vmem:[%s341_s11] sm:$0xff]  ;;  %s5005_s11 = smov [#allocation3]  }
  0x55   : > { %1285 = vmatprep.subr.bf16.mxu1 %v1254_v44  ;;  %824 = vmatprep.subr.bf16.mxu0 %v793_v37  ;;  %v1206_v25 = vmul.f32 %v1076_v42, %v5216_v22  ;;  %v1208_v48 = vmul.f32 %v1076_v42, %v5220_v39  ;;  %v1072_v49 = vrot.slane %v968_v56, %v5105_v6  ;;  %v5358_v50 = vsub.s32 3, %v5100_v3  ;;  %s4926_s12 = sshll.u32 %s5005_s11, 4  ;;  %s4927_s12 = int_to_ptr.vmem [resolvable:$false] %s4926_s12 }
  0x56   : > { %825 = vmatpush1.bf16.msra.mxu0 %v792_v15  ;;  %v794_v47 = vpack.c.bf16 %v744_v41, %v742_v46  ;;  %v621_v51 = vrot.slane %v507_v62, %v5121_v8  ;;  %v970_v52 = vcombine.high %v966_v29, %v966_v29  ;;  %v617_v55 = vrot.slane %v507_v62, %v5105_v6  ;;  %s4928_s13 = scalar_lea.vmem %s4927_s12, 512  ;;  %p4929_p1 = scmp.lt.s32.totalorder %s6983_s20, %s4927_s12 }
  0x57   : > { %826 = vmatprep.subr.bf16.mxu0 %v795_v40  ;;  %v1258_v35 = vpack.c.bf16 %v1208_v48, %v1206_v25  ;;  %v1205_v44 = vmul.f32 %v1072_v49, %v5211_v34  ;;  %v1207_v54 = vmul.f32 %v1072_v49, %v5218_v38  ;;  %v404_v60 = vsub.f32 %v5137_v12, %v5153_v17 }
  0x58   : > { %1286 = vmatpush1.bf16.msra.mxu1 %v1253_v57  ;;  %v747_v56 = vmul.f32 %v621_v51, %v5198_v63  ;;  %v749_v29 = vmul.f32 %v621_v51, %v5202_v1  ;;  %v1084_v62 = vrot.slane %v970_v52, %v5121_v8  ;;  %v746_v2 = vmul.f32 %v617_v55, %v5194_v59 }
  0x59   : > { %1287 = vmatprep.subr.bf16.mxu1 %v1256_v43  ;;  %v1257_v4 = vpack.c.bf16 %v1207_v54, %v1205_v44  ;;  %v748_v20 = vmul.f32 %v617_v55, %v5200_v0  ;;  %v1080_v23 = vrot.slane %v970_v52, %v5105_v6  ;;  %v405_v17 = vsub.f32 %v5137_v12, %v5157_v18 }
  0x5a   : > { %827 = vmatpush1.bf16.msra.mxu0 %v794_v47  ;;  %v797_v30 = vpack.c.bf16 %v749_v29, %v747_v56  ;;  %v1210_v57 = vmul.f32 %v1084_v62, %v5216_v22  ;;  %v1212_v24 = vmul.f32 %v1084_v62, %v5220_v39  ;;  %v408_v27 = vand.u32 2147483647, %v404_v60 }
  0x5b   : > { %v796_v33 = vpack.c.bf16 %v748_v20, %v746_v2  ;;  %v1209_v36 = vmul.f32 %v1080_v23, %v5211_v34  ;;  %v1211_v31 = vmul.f32 %v1080_v23, %v5218_v38  ;;  %v409_v37 = vand.u32 2147483647, %v405_v17 }
  0x5c   : > { %1288 = vmatpush1.bf16.msra.mxu1 %v1255_v45  ;;  %828 = vmatprep.subr.bf16.mxu0 %v797_v30  ;;  %v1260_v15 = vpack.c.bf16 %v1212_v24, %v1210_v57  ;;  %v412_v40 = vsub.f32 1.0, %v408_v27  ;;  %v867_v18 = vsub.f32 %v5137_v12, %v5227_v16  ;;  %v868_v42 = vsub.f32 %v5137_v12, %v5232_v26 }
  0x5d   : > { %1289 = vmatprep.subr.bf16.mxu1 %v1258_v35  ;;  %v1259_v43 = vpack.c.bf16 %v1211_v31, %v1209_v36  ;;  %v413_v46 = vsub.f32 1.0, %v409_v37  ;;  %v5385_v41 = vpack.c.bf16 %v374_v28, %v374_v28  ;;  %v5387_v25 = vpack.c.bf16 %v373_v32, %v373_v32 }
  0x5e   : > { %829 = vmatpush1.bf16.msra.mxu0 %v796_v33  ;;  %v416_v48 = vmax.f32 %v412_v40, 0.0  ;;  %v871_v49 = vand.u32 2147483647, %v867_v18  ;;  %v872_v45 = vand.u32 2147483647, %v868_v42  ;;  %v5391_v47 = vrot.slane %v5129_v9, %v5331_v53 }
  0x5f   : > { %v417_v51 = vmax.f32 %v413_v46, 0.0  ;;  %846 = vmatprep.mubr.bf16.mxu0 %v5385_v41  ;;  %1309 = vmatprep.mubr.bf16.mxu1 %v5385_v41  ;;  %v5397_v16 = vrot.slane %v5132_v10, %v5331_v53  ;;  %v5401_v26 = vrot.slane %v5135_v11, %v5331_v53  ;;  %v5405_v52 = vrot.slane %v5143_v14, %v5331_v53 }
  0x60   : > { %1290 = vmatpush1.bf16.msra.mxu1 %v1257_v4  ;;  %v875_v9 = vsub.f32 1.0, %v871_v49  ;;  %v876_v55 = vsub.f32 1.0, %v872_v45  ;;  %v1328_v35 = vsub.f32 %v5118_v7, %v5391_v47  ;;  %v5411_v44 = vrot.slane %v5164_v21, %v5331_v53 }
  0x61   : > { %1291 = vmatprep.subr.bf16.mxu1 %v1260_v15  ;;  %v508_v10 = vcombine.low %v416_v48, %v417_v51  ;;  %v509_v54 = vcombine.high %v416_v48, %v417_v51  ;;  %v1329_v11 = vsub.f32 %v5118_v7, %v5397_v16  ;;  %v1352_v14 = vsub.f32 %v5118_v7, %v5401_v26 }
  0x62   : > { %v879_v60 = vmax.f32 %v875_v9, 0.0  ;;  %v880_v56 = vmax.f32 %v876_v55, 0.0  ;;  %v1332_v29 = vand.u32 2147483647, %v1328_v35  ;;  %v1353_v62 = vsub.f32 %v5118_v7, %v5405_v52 }
  0x63   : > { %v516_v2 = vrot.slane %v508_v10, %v5140_v13  ;;  %v5421_v21 = vrot.slane %v509_v54, %v5140_v13  ;;  %v5423_v4 = vand.u32 2147483647, %v1329_v11  ;;  %v1354_v20 = vsub.f32 %v5137_v12, %v5401_v26 }
  0x64   : > { %1292 = vmatpush1.bf16.msra.mxu1 %v1259_v43  ;;  %v971_v23 = vcombine.low %v879_v60, %v880_v56  ;;  %v972_v17 = vcombine.high %v879_v60, %v880_v56  ;;  %v1336_v30 = vsub.f32 1.0, %v1332_v29 }
  0x65   : > { %v532_v24 = vrot.slane %v516_v2, %v5140_v13  ;;  %v524_v27 = vcombine.high %v516_v2, %v516_v2  ;;  %v5432_v28 = vrot.slane %v5421_v21, %v5140_v13  ;;  %v525_v32 = vcombine.high %v5421_v21, %v5421_v21 }
  0x66   : > { %v979_v33 = vrot.slane %v971_v23, %v5140_v13  ;;  %v5438_v36 = vrot.slane %v972_v17, %v5140_v13  ;;  %v1337_v31 = vsub.f32 1.0, %v5423_v4  ;;  %v5441_v37 = vmax.f32 %v1336_v30, 0.0 }
  0x67   : > { %v629_v15 = vrot.slane %v532_v24, %v5121_v8  ;;  %v625_v40 = vrot.slane %v532_v24, %v5105_v6  ;;  %v546_v18 = vrot.slane %v524_v27, %v5140_v13  ;;  %v554_v42 = vcombine.high %v532_v24, %v532_v24 }
  0x68   : > { %v995_v43 = vrot.slane %v979_v33, %v5140_v13  ;;  %v987_v46 = vcombine.high %v979_v33, %v979_v33  ;;  %v5449_v48 = vrot.slane %v5432_v28, %v5121_v8  ;;  %v5453_v49 = vrot.slane %v5438_v36, %v5140_v13 }
  0x69   : > { %v751_v45 = vmul.f32 %v629_v15, %v5198_v63  ;;  %v753_v51 = vmul.f32 %v629_v15, %v5202_v1  ;;  %v750_v9 = vmul.f32 %v625_v40, %v5194_v59  ;;  %v752_v55 = vmul.f32 %v625_v40, %v5200_v0 }
  0x6a   : > { %v1092_v35 = vrot.slane %v995_v43, %v5121_v8  ;;  %v1088_v10 = vrot.slane %v995_v43, %v5105_v6  ;;  %v637_v54 = vrot.slane %v546_v18, %v5121_v8  ;;  %v1009_v11 = vrot.slane %v987_v46, %v5140_v13 }
  0x6b   : > { %v799_v60 = vpack.c.bf16 %v753_v51, %v751_v45  ;;  %v798_v56 = vpack.c.bf16 %v752_v55, %v750_v9  ;;  %v633_v29 = vrot.slane %v546_v18, %v5105_v6  ;;  %v645_v2 = vrot.slane %v554_v42, %v5121_v8 }
  0x6c   : > { %v1214_v4 = vmul.f32 %v1092_v35, %v5216_v22  ;;  %v1216_v23 = vmul.f32 %v1092_v35, %v5220_v39  ;;  %v1213_v17 = vmul.f32 %v1088_v10, %v5211_v34  ;;  %v1215_v30 = vmul.f32 %v1088_v10, %v5218_v38 }
  0x6d   : > { %830 = vmatprep.subr.bf16.mxu0 %v799_v60  ;;  %v755_v24 = vmul.f32 %v637_v54, %v5198_v63  ;;  %v757_v27 = vmul.f32 %v637_v54, %v5202_v1  ;;  %v1100_v33 = vrot.slane %v1009_v11, %v5121_v8  ;;  %v754_v15 = vmul.f32 %v633_v29, %v5194_v59 }
  0x6e   : > { %v1262_v40 = vpack.c.bf16 %v1216_v23, %v1214_v4  ;;  %831 = vmatpush1.bf16.msra.mxu0 %v798_v56  ;;  %v1261_v46 = vpack.c.bf16 %v1215_v30, %v1213_v17  ;;  %v756_v45 = vmul.f32 %v633_v29, %v5200_v0  ;;  %v1096_v51 = vrot.slane %v1009_v11, %v5105_v6 }
  0x6f   : > { %v801_v9 = vpack.c.bf16 %v757_v27, %v755_v24  ;;  %v1218_v55 = vmul.f32 %v1100_v33, %v5216_v22  ;;  %v1220_v35 = vmul.f32 %v1100_v33, %v5220_v39  ;;  %v759_v10 = vmul.f32 %v645_v2, %v5198_v63 }
  0x70   : > { %1293 = vmatprep.subr.bf16.mxu1 %v1262_v40  ;;  %v800_v54 = vpack.c.bf16 %v756_v45, %v754_v15  ;;  %v1217_v60 = vmul.f32 %v1096_v51, %v5211_v34  ;;  %v1219_v57 = vmul.f32 %v1096_v51, %v5218_v38  ;;  %v761_v56 = vmul.f32 %v645_v2, %v5202_v1 }
  0x71   : > { %1294 = vmatpush1.bf16.msra.mxu1 %v1261_v46  ;;  %832 = vmatprep.subr.bf16.mxu0 %v801_v9  ;;  %v1264_v29 = vpack.c.bf16 %v1220_v35, %v1218_v55  ;;  %v1017_v4 = vcombine.high %v995_v43, %v995_v43  ;;  %v641_v23 = vrot.slane %v554_v42, %v5105_v6  ;;  %v5482_v17 = vmax.f32 %v1337_v31, 0.0 }
  0x72   : > { %833 = vmatpush1.bf16.msra.mxu0 %v800_v54  ;;  %v1263_v30 = vpack.c.bf16 %v1219_v57, %v1217_v60  ;;  %v803_v24 = vpack.c.bf16 %v761_v56, %v759_v10  ;;  %v556_v27 = vcombine.high %v546_v18, %v546_v18  ;;  %v1019_v33 = vcombine.high %v1009_v11, %v1009_v11 }
  0x73   : > { %1295 = vmatprep.subr.bf16.mxu1 %v1264_v29  ;;  %v1108_v15 = vrot.slane %v1017_v4, %v5121_v8  ;;  %v758_v40 = vmul.f32 %v641_v23, %v5194_v59  ;;  %v760_v2 = vmul.f32 %v641_v23, %v5200_v0  ;;  %v1104_v46 = vrot.slane %v1017_v4, %v5105_v6 }
  0x74   : > { %834 = vmatprep.subr.bf16.mxu0 %v803_v24  ;;  %v653_v43 = vrot.slane %v556_v27, %v5121_v8  ;;  %v1116_v31 = vrot.slane %v1019_v33, %v5121_v8  ;;  %v649_v42 = vrot.slane %v556_v27, %v5105_v6  ;;  %v1112_v57 = vrot.slane %v1019_v33, %v5105_v6 }
  0x75   : > { %1296 = vmatpush1.bf16.msra.mxu1 %v1263_v30  ;;  %v1222_v18 = vmul.f32 %v1108_v15, %v5216_v22  ;;  %v1224_v11 = vmul.f32 %v1108_v15, %v5220_v39  ;;  %v802_v45 = vpack.c.bf16 %v760_v2, %v758_v40  ;;  %v1221_v51 = vmul.f32 %v1104_v46, %v5211_v34 }
  0x76   : > { %v1223_v9 = vmul.f32 %v1104_v46, %v5218_v38  ;;  %v763_v55 = vmul.f32 %v653_v43, %v5198_v63  ;;  %v765_v35 = vmul.f32 %v653_v43, %v5202_v1  ;;  %v1226_v10 = vmul.f32 %v1116_v31, %v5216_v22 }
  0x77   : > { %v1266_v54 = vpack.c.bf16 %v1224_v11, %v1222_v18  ;;  %835 = vmatpush1.bf16.msra.mxu0 %v802_v45  ;;  %v1228_v60 = vmul.f32 %v1116_v31, %v5220_v39  ;;  %v762_v56 = vmul.f32 %v649_v42, %v5194_v59  ;;  %v764_v29 = vmul.f32 %v649_v42, %v5200_v0 }
  0x78   : > { %v1265_v4 = vpack.c.bf16 %v1223_v9, %v1221_v51  ;;  %v805_v23 = vpack.c.bf16 %v765_v35, %v763_v55  ;;  %v1225_v30 = vmul.f32 %v1112_v57, %v5211_v34  ;;  %v1227_v24 = vmul.f32 %v1112_v57, %v5218_v38 }
  0x79   : > { %1297 = vmatprep.subr.bf16.mxu1 %v1266_v54  ;;  %v1268_v27 = vpack.c.bf16 %v1228_v60, %v1226_v10  ;;  %v804_v33 = vpack.c.bf16 %v764_v29, %v762_v56  ;;  %v767_v15 = vmul.f32 %v5449_v48, %v5198_v63  ;;  %v769_v40 = vmul.f32 %v5449_v48, %v5202_v1 }
  0x7a   : > { %1298 = vmatpush1.bf16.msra.mxu1 %v1265_v4  ;;  %836 = vmatprep.subr.bf16.mxu0 %v805_v23  ;;  %v1267_v2 = vpack.c.bf16 %v1227_v24, %v1225_v30  ;;  %v1124_v46 = vrot.slane %v5453_v49, %v5121_v8  ;;  %v657_v43 = vrot.slane %v5432_v28, %v5105_v6  ;;  %v5515_v31 = vand.u32 2147483647, %v1352_v14 }
  0x7b   : > { %1299 = vmatprep.subr.bf16.mxu1 %v1268_v27  ;;  %837 = vmatpush1.bf16.msra.mxu0 %v804_v33  ;;  %v807_v42 = vpack.c.bf16 %v769_v40, %v767_v15  ;;  %v1120_v48 = vrot.slane %v5453_v49, %v5105_v6  ;;  %v553_v57 = vrot.slane %v525_v32, %v5140_v13  ;;  %v5526_v18 = vand.u32 2147483647, %v1353_v62 }
  0x7c   : > { %v1230_v11 = vmul.f32 %v1124_v46, %v5216_v22  ;;  %v1232_v14 = vmul.f32 %v1124_v46, %v5220_v39  ;;  %v766_v45 = vmul.f32 %v657_v43, %v5194_v59  ;;  %v768_v51 = vmul.f32 %v657_v43, %v5200_v0 }
  0x7d   : > { %838 = vmatprep.subr.bf16.mxu0 %v807_v42  ;;  %v1229_v9 = vmul.f32 %v1120_v48, %v5211_v34  ;;  %v1231_v55 = vmul.f32 %v1120_v48, %v5218_v38  ;;  %v669_v21 = vrot.slane %v553_v57, %v5121_v8  ;;  %v988_v32 = vcombine.high %v5438_v36, %v5438_v36 }
  0x7e   : > { %1300 = vmatpush1.bf16.msra.mxu1 %v1267_v2  ;;  %v1270_v62 = vpack.c.bf16 %v1232_v14, %v1230_v11  ;;  %v806_v35 = vpack.c.bf16 %v768_v51, %v766_v45  ;;  %v665_v10 = vrot.slane %v553_v57, %v5105_v6  ;;  %v555_v54 = vcombine.high %v5432_v28, %v5432_v28 }
  0x7f   : > { %v1269_v60 = vpack.c.bf16 %v1231_v55, %v1229_v9  ;;  %v771_v56 = vmul.f32 %v669_v21, %v5198_v63  ;;  %v773_v29 = vmul.f32 %v669_v21, %v5202_v1  ;;  %v1016_v4 = vrot.slane %v988_v32, %v5140_v13 }
  0x80   : > { %1301 = vmatprep.subr.bf16.mxu1 %v1270_v62  ;;  %839 = vmatpush1.bf16.msra.mxu0 %v806_v35  ;;  %v770_v23 = vmul.f32 %v665_v10, %v5194_v59  ;;  %v772_v36 = vmul.f32 %v665_v10, %v5200_v0  ;;  %v677_v30 = vrot.slane %v555_v54, %v5121_v8  ;;  %v5549_v24 = vand.u32 2147483647, %v1354_v20 }
  0x81   : > { %v809_v28 = vpack.c.bf16 %v773_v29, %v771_v56  ;;  %v1132_v27 = vrot.slane %v1016_v4, %v5121_v8  ;;  %v1128_v33 = vrot.slane %v1016_v4, %v5105_v6  ;;  %v1018_v15 = vcombine.high %v5453_v49, %v5453_v49 }
  0x82   : > { %1302 = vmatpush1.bf16.msra.mxu1 %v1269_v60  ;;  %v808_v40 = vpack.c.bf16 %v772_v36, %v770_v23  ;;  %v775_v2 = vmul.f32 %v677_v30, %v5198_v63  ;;  %v777_v46 = vmul.f32 %v677_v30, %v5202_v1  ;;  %v673_v43 = vrot.slane %v555_v54, %v5105_v6 }
  0x83   : > { %840 = vmatprep.subr.bf16.mxu0 %v809_v28  ;;  %v1234_v26 = vmul.f32 %v1132_v27, %v5216_v22  ;;  %v1236_v20 = vmul.f32 %v1132_v27, %v5220_v39  ;;  %v1233_v42 = vmul.f32 %v1128_v33, %v5211_v34  ;;  %v1235_v48 = vmul.f32 %v1128_v33, %v5218_v38 }
  0x84   : > { %841 = vmatpush1.bf16.msra.mxu0 %v808_v40  ;;  %v811_v11 = vpack.c.bf16 %v777_v46, %v775_v2  ;;  %v1140_v49 = vrot.slane %v1018_v15, %v5121_v8  ;;  %v774_v14 = vmul.f32 %v673_v43, %v5194_v59  ;;  %v776_v45 = vmul.f32 %v673_v43, %v5200_v0 }
  0x85   : > { %v1272_v51 = vpack.c.bf16 %v1236_v20, %v1234_v26  ;;  %v1271_v9 = vpack.c.bf16 %v1235_v48, %v1233_v42  ;;  %v1136_v55 = vrot.slane %v1018_v15, %v5105_v6  ;;  %v557_v21 = vcombine.high %v553_v57, %v553_v57  ;;  %v5589_v48 = vld [vmem:[%s5126_s27 + $0x8] sm:$0xff] }
  0x86   : > { %842 = vmatprep.subr.bf16.mxu0 %v811_v11  ;;  %v1238_v32 = vmul.f32 %v1140_v49, %v5216_v22  ;;  %v1240_v62 = vmul.f32 %v1140_v49, %v5220_v39  ;;  %v810_v35 = vpack.c.bf16 %v776_v45, %v774_v14  ;;  %v1020_v10 = vcombine.high %v1016_v4, %v1016_v4 }
  0x87   : > { %1303 = vmatprep.subr.bf16.mxu1 %v1272_v51  ;;  %v1237_v54 = vmul.f32 %v1136_v55, %v5211_v34  ;;  %v1239_v60 = vmul.f32 %v1136_v55, %v5218_v38  ;;  %v685_v56 = vrot.slane %v557_v21, %v5121_v8  ;;  %v681_v29 = vrot.slane %v557_v21, %v5105_v6 }
  0x88   : > { %1304 = vmatpush1.bf16.msra.mxu1 %v1271_v9  ;;  %v1274_v23 = vpack.c.bf16 %v1240_v62, %v1238_v32  ;;  %843 = vmatpush1.bf16.msra.mxu0 %v810_v35  ;;  %v1148_v57 = vrot.slane %v1020_v10, %v5121_v8  ;;  %v1144_v36 = vrot.slane %v1020_v10, %v5105_v6  ;;  %v1360_v20 = vsub.f32 1.0, %v5515_v31  ;;  %v5615_v9 = vld [vmem:[%s5115_s18] sm:$0xff] }
  0x89   : > { %v7039_v30 = vsub.f32 %v5137_v12, %v5405_v52  ;;  %v1273_v28 = vpack.c.bf16 %v1239_v60, %v1237_v54  ;;  %v779_v27 = vmul.f32 %v685_v56, %v5198_v63  ;;  %v781_v33 = vmul.f32 %v685_v56, %v5202_v1  ;;  %v5631_v54 = vld [vmem:[%s5115_s18 + $0x8] sm:$0xff] }
  0x8a   : > { %v778_v15 = vmul.f32 %v681_v29, %v5194_v59  ;;  %1305 = vmatprep.subr.bf16.mxu1 %v1274_v23  ;;  %v1242_v40 = vmul.f32 %v1148_v57, %v5216_v22  ;;  %v1244_v2 = vmul.f32 %v1148_v57, %v5220_v39  ;;  %v780_v46 = vmul.f32 %v681_v29, %v5200_v0  ;;  %v5639_v57 = vld [vmem:[%s5126_s27] sm:$0xff] }
  0x8b   : > { %v1359_v4 = vand.u32 2147483647, %v7039_v30  ;;  %v1241_v43 = vmul.f32 %v1144_v36, %v5211_v34  ;;  %v813_v26 = vpack.c.bf16 %v781_v33, %v779_v27  ;;  %v1243_v52 = vmul.f32 %v1144_v36, %v5218_v38 }
  0x8c   : > { %v1361_v63 = vsub.f32 1.0, %v5526_v18  ;;  %1306 = vmatpush1.bf16.msra.mxu1 %v1273_v28  ;;  %v1276_v59 = vpack.c.bf16 %v1244_v2, %v1242_v40  ;;  %v812_v1 = vpack.c.bf16 %v780_v46, %v778_v15  ;;  %v1362_v22 = vsub.f32 1.0, %v5549_v24  ;;  %v5596_v24 = vld [vmem:[%s5110_s15] sm:$0xff] }
  0x8d   : > { %v1363_v42 = vsub.f32 1.0, %v1359_v4  ;;  %844 = vmatprep.subr.bf16.mxu0 %v813_v26  ;;  %v1275_v39 = vpack.c.bf16 %v1243_v52, %v1241_v43  ;;  %v1364_v0 = vmax.f32 %v1360_v20, 0.0  ;;  %v1375_v38 = vrot.slane %v5589_v48, %v5331_v53  ;;  %v5608_v53 = vld [vmem:[%s5110_s15 + $0x8] sm:$0xff] }
  0x8e   : > { %v1365_v34 = vmax.f32 %v1361_v63, 0.0  ;;  %1307 = vmatprep.subr.bf16.mxu1 %v1276_v59  ;;  %845 = vmatpush1.bf16.msra.mxu0 %v812_v1  ;;  %v1366_v31 = vmax.f32 %v1362_v22, 0.0  ;;  %v1384_v11 = vcombine.low %v5441_v37, %v5482_v17  ;;  %v5600_v49 = vrot.slane %v5596_v24, %v5358_v50 }
  0x8f   : > { %v1367_v18 = vmax.f32 %v1363_v42, 0.0  ;;  %v5603_v14 = vmul.f32 %v5411_v44, %v1364_v0  ;;  %v5612_v51 = vrot.slane %v5608_v53, %v5358_v50  ;;  %v1810_v55 = vrot.slane %v5615_v9, %v5358_v50 }
  0x90   : > { %v5605_v45 = vmul.f32 %v1375_v38, %v1365_v34  ;;  %1308 = vmatpush1.bf16.msra.mxu1 %v1275_v39  ;;  %v5620_v21 = vmul.f32 %v5411_v44, %v1366_v31  ;;  %v1392_v62 = vrot.slane %v1384_v11, %v5140_v13  ;;  %v1791_v35 = vsub.f32 %v5118_v7, %v5600_v49 }
  0x91   : > { %v5622_v32 = vmul.f32 %v1375_v38, %v1367_v18  ;;  %847 = vmatmul.mubr.bf16.vlgmr.msra.gmra.mrb[0].mxu0 %v5387_v25  ;;  %v1792_v10 = vsub.f32 %v5118_v7, %v5612_v51  ;;  %v1814_v60 = vrot.slane %v5631_v54, %v5358_v50  ;;  %v1815_v44 = vsub.f32 %v5118_v7, %v1810_v55 }
  0x92   : > { %v1817_v56 = vsub.f32 %v5137_v12, %v1810_v55  ;;  %v1408_v29 = vrot.slane %v1392_v62, %v5140_v13  ;;  %v1795_v23 = vand.u32 2147483647, %v1791_v35  ;;  %v1834_v36 = vrot.slane %v5639_v57, %v5358_v50  ;;  %1772 = vmatprep.mubr.bf16.mxu0 %v5385_v41 }
  0x93   : > { %v1838_v30 = vrot.slane %v5589_v48, %v5358_v50  ;;  %1310 = vmatmul.mubr.bf16.vlgmr.msra.gmra.mrb[0].mxu1 %v5387_v25  ;;  %v1796_v4 = vand.u32 2147483647, %v1792_v10  ;;  %v1816_v28 = vsub.f32 %v5118_v7, %v1814_v60  ;;  %v1818_v27 = vsub.f32 %v5137_v12, %v1814_v60 }
  0x94   : > { %v1819_v33 = vand.u32 2147483647, %v1815_v44  ;;  %v1491_v15 = vrot.slane %v1408_v29, %v5121_v8  ;;  %v1799_v40 = vsub.f32 1.0, %v1795_v23  ;;  %v1821_v2 = vand.u32 2147483647, %v1817_v56  ;;  %2235 = vmatprep.mubr.bf16.mxu1 %v5385_v41 }
  0x95   : > { %v1487_v46 = vrot.slane %v1408_v29, %v5105_v6  ;;  %v1800_v43 = vsub.f32 1.0, %v1796_v4  ;;  %v1820_v50 = vand.u32 2147483647, %v1816_v28  ;;  %v1822_v26 = vand.u32 2147483647, %v1818_v27 }
  0x96   : > { %v1823_v52 = vsub.f32 1.0, %v1819_v33  ;;  %v1645_v20 = vmul.f32 %v1491_v15, %v5605_v45  ;;  %v1647_v63 = vmul.f32 %v1491_v15, %v5622_v32  ;;  %v5654_v59 = vmax.f32 %v1799_v40, 0.0 }
  0x97   : > { %v1825_v1 = vsub.f32 1.0, %v1821_v2  ;;  %v5656_v22 = vmax.f32 %v1800_v43, 0.0  ;;  %v1824_v42 = vsub.f32 1.0, %v1820_v50  ;;  %v1826_v39 = vsub.f32 1.0, %v1822_v26 }
  0x98   : > { %v1827_v0 = vmax.f32 %v1823_v52, 0.0  ;;  %v1709_v34 = vpack.c.bf16 %v1647_v63, %v1645_v20  ;;  %v1644_v31 = vmul.f32 %v1487_v46, %v5603_v14  ;;  %v1646_v18 = vmul.f32 %v1487_v46, %v5620_v21 }
  0x99   : > { %v1829_v38 = vmax.f32 %v1825_v1, 0.0  ;;  %v1828_v11 = vmax.f32 %v1824_v42, 0.0  ;;  %v1830_v55 = vmax.f32 %v1826_v39, 0.0  ;;  %v1847_v10 = vcombine.low %v5654_v59, %v5656_v22 }
  0x9a   : > { %v5660_v35 = vmul.f32 %v1834_v36, %v1827_v0  ;;  %1740 = vmatprep.subr.bf16.mxu0 %v1709_v34  ;;  %v1708_v44 = vpack.c.bf16 %v1646_v18, %v1644_v31  ;;  %v1400_v56 = vcombine.high %v1392_v62, %v1392_v62  ;;  %v1430_v23 = vcombine.high %v1408_v29, %v1408_v29 }
  0x9b   : > { %v5664_v60 = vmul.f32 %v1834_v36, %v1829_v38  ;;  %v5666_v4 = vmul.f32 %v1838_v30, %v1828_v11  ;;  %v5668_v28 = vmul.f32 %v1838_v30, %v1830_v55  ;;  %v1855_v27 = vrot.slane %v1847_v10, %v5140_v13 }
  0x9c   : > { %v1385_v33 = vcombine.high %v5441_v37, %v5482_v17  ;;  %1741 = vmatpush1.bf16.msra.mxu0 %v1708_v44  ;;  %v1422_v15 = vrot.slane %v1400_v56, %v5140_v13  ;;  %v1507_v40 = vrot.slane %v1430_v23, %v5121_v8  ;;  %v1503_v36 = vrot.slane %v1430_v23, %v5105_v6 }
  0x9d   : > { %v1848_v62 = vcombine.high %v5654_v59, %v5656_v22  ;;  %v1871_v29 = vrot.slane %v1855_v27, %v5140_v13  ;;  %v1863_v2 = vcombine.high %v1855_v27, %v1855_v27  ;;  %v1330_v46 = vsub.f32 %v5137_v12, %v5391_v47 }
  0x9e   : > { %v5680_v30 = vrot.slane %v1385_v33, %v5140_v13  ;;  %v1499_v37 = vrot.slane %v1422_v15, %v5121_v8  ;;  %v1495_v17 = vrot.slane %v1422_v15, %v5105_v6  ;;  %v1653_v43 = vmul.f32 %v1507_v40, %v5605_v45 }
  0x9f   : > { %v1655_v50 = vmul.f32 %v1507_v40, %v5622_v32  ;;  %v1954_v26 = vrot.slane %v1871_v29, %v5121_v8  ;;  %v1950_v52 = vrot.slane %v1871_v29, %v5105_v6  ;;  %v1885_v20 = vrot.slane %v1863_v2, %v5140_v13 }
  0xa0   : > { %v1893_v63 = vcombine.high %v1871_v29, %v1871_v29  ;;  %v1649_v59 = vmul.f32 %v1499_v37, %v5605_v45  ;;  %v1651_v1 = vmul.f32 %v1499_v37, %v5622_v32  ;;  %v1648_v22 = vmul.f32 %v1495_v17, %v5603_v14 }
  0xa1   : > { %v1650_v42 = vmul.f32 %v1495_v17, %v5620_v21  ;;  %v2108_v39 = vmul.f32 %v1954_v26, %v5666_v4  ;;  %v2110_v0 = vmul.f32 %v1954_v26, %v5668_v28  ;;  %v2107_v34 = vmul.f32 %v1950_v52, %v5660_v35 }
  0xa2   : > { %v2109_v38 = vmul.f32 %v1950_v52, %v5664_v60  ;;  %v1711_v31 = vpack.c.bf16 %v1651_v1, %v1649_v59  ;;  %v1962_v18 = vrot.slane %v1885_v20, %v5121_v8  ;;  %v1958_v55 = vrot.slane %v1885_v20, %v5105_v6 }
  0xa3   : > { %v1710_v11 = vpack.c.bf16 %v1650_v42, %v1648_v22  ;;  %v2172_v10 = vpack.c.bf16 %v2110_v0, %v2108_v39  ;;  %v1713_v56 = vpack.c.bf16 %v1655_v50, %v1653_v43  ;;  %v1970_v23 = vrot.slane %v1893_v63, %v5121_v8 }
  0xa4   : > { %v2171_v44 = vpack.c.bf16 %v2109_v38, %v2107_v34  ;;  %1742 = vmatprep.subr.bf16.mxu0 %v1711_v31  ;;  %v2112_v27 = vmul.f32 %v1962_v18, %v5666_v4  ;;  %v2114_v33 = vmul.f32 %v1962_v18, %v5668_v28  ;;  %v2111_v40 = vmul.f32 %v1958_v55, %v5660_v35 }
  0xa5   : > { %v2113_v29 = vmul.f32 %v1958_v55, %v5664_v60  ;;  %2203 = vmatprep.subr.bf16.mxu1 %v2172_v10  ;;  %1743 = vmatpush1.bf16.msra.mxu0 %v1710_v11  ;;  %v2116_v2 = vmul.f32 %v1970_v23, %v5666_v4  ;;  %v2118_v37 = vmul.f32 %v1970_v23, %v5668_v28 }
  0xa6   : > { %v1652_v17 = vmul.f32 %v1503_v36, %v5603_v14  ;;  %2204 = vmatpush1.bf16.msra.mxu1 %v2171_v44  ;;  %v2174_v43 = vpack.c.bf16 %v2114_v33, %v2112_v27  ;;  %1744 = vmatprep.subr.bf16.mxu0 %v1713_v56  ;;  %v1654_v26 = vmul.f32 %v1503_v36, %v5620_v21 }
  0xa7   : > { %v2173_v50 = vpack.c.bf16 %v2113_v29, %v2111_v40  ;;  %v2176_v52 = vpack.c.bf16 %v2118_v37, %v2116_v2  ;;  %v1966_v59 = vrot.slane %v1893_v63, %v5105_v6  ;;  %v1432_v1 = vcombine.high %v1422_v15, %v1422_v15 }
  0xa8   : > { %v1895_v22 = vcombine.high %v1885_v20, %v1885_v20  ;;  %2205 = vmatprep.subr.bf16.mxu1 %v2174_v43  ;;  %v1712_v42 = vpack.c.bf16 %v1654_v26, %v1652_v17  ;;  %v1415_v39 = vrot.slane %v5680_v30, %v5140_v13  ;;  %v1862_v0 = vrot.slane %v1848_v62, %v5140_v13 }
  0xa9   : > { %v1401_v34 = vcombine.high %v5680_v30, %v5680_v30  ;;  %v2115_v38 = vmul.f32 %v1966_v59, %v5660_v35  ;;  %v2117_v31 = vmul.f32 %v1966_v59, %v5664_v60  ;;  %v1515_v36 = vrot.slane %v1432_v1, %v5121_v8 }
  0xaa   : > { %v1978_v63 = vrot.slane %v1895_v22, %v5121_v8  ;;  %2206 = vmatpush1.bf16.msra.mxu1 %v2173_v50  ;;  %1745 = vmatpush1.bf16.msra.mxu0 %v1712_v42  ;;  %v1511_v15 = vrot.slane %v1432_v1, %v5105_v6  ;;  %v1974_v20 = vrot.slane %v1895_v22, %v5105_v6 }
  0xab   : > { %v1523_v18 = vrot.slane %v1415_v39, %v5121_v8  ;;  %2207 = vmatprep.subr.bf16.mxu1 %v2176_v52  ;;  %v2175_v62 = vpack.c.bf16 %v2117_v31, %v2115_v38  ;;  %v1657_v30 = vmul.f32 %v1515_v36, %v5605_v45  ;;  %v1659_v11 = vmul.f32 %v1515_v36, %v5622_v32 }
  0xac   : > { %v2120_v55 = vmul.f32 %v1978_v63, %v5666_v4  ;;  %v2122_v10 = vmul.f32 %v1978_v63, %v5668_v28  ;;  %v1656_v44 = vmul.f32 %v1511_v15, %v5603_v14  ;;  %v1658_v56 = vmul.f32 %v1511_v15, %v5620_v21 }
  0xad   : > { %v2119_v23 = vmul.f32 %v1974_v20, %v5660_v35  ;;  %v1715_v27 = vpack.c.bf16 %v1659_v11, %v1657_v30  ;;  %v2121_v33 = vmul.f32 %v1974_v20, %v5664_v60  ;;  %v1661_v40 = vmul.f32 %v1523_v18, %v5605_v45 }
  0xae   : > { %v1663_v29 = vmul.f32 %v1523_v18, %v5622_v32  ;;  %2208 = vmatpush1.bf16.msra.mxu1 %v2175_v62  ;;  %v2178_v2 = vpack.c.bf16 %v2122_v10, %v2120_v55  ;;  %v1714_v37 = vpack.c.bf16 %v1658_v56, %v1656_v44  ;;  %v1878_v17 = vrot.slane %v1862_v0, %v5140_v13 }
  0xaf   : > { %v1519_v43 = vrot.slane %v1415_v39, %v5105_v6  ;;  %1746 = vmatprep.subr.bf16.mxu0 %v1715_v27  ;;  %v2177_v50 = vpack.c.bf16 %v2121_v33, %v2119_v23  ;;  %v1429_v52 = vrot.slane %v1401_v34, %v5140_v13  ;;  %v1864_v59 = vcombine.high %v1862_v0, %v1862_v0 }
  0xb0   : > { %v1717_v26 = vpack.c.bf16 %v1663_v29, %v1661_v40  ;;  %2209 = vmatprep.subr.bf16.mxu1 %v2178_v2  ;;  %1747 = vmatpush1.bf16.msra.mxu0 %v1714_v37  ;;  %v1986_v1 = vrot.slane %v1878_v17, %v5121_v8  ;;  %v5742_v38 = vand.u32 2147483647, %v1330_v46  ;;  %v1982_v31 = vrot.slane %v1878_v17, %v5105_v6 }
  0xb1   : > { %v1660_v22 = vmul.f32 %v1519_v43, %v5603_v14  ;;  %v1662_v42 = vmul.f32 %v1519_v43, %v5620_v21  ;;  %v1531_v36 = vrot.slane %v1429_v52, %v5121_v8  ;;  %v1892_v0 = vrot.slane %v1864_v59, %v5140_v13 }
  0xb2   : > { %1748 = vmatprep.subr.bf16.mxu0 %v1717_v26  ;;  %v1527_v34 = vrot.slane %v1429_v52, %v5105_v6  ;;  %2210 = vmatpush1.bf16.msra.mxu1 %v2177_v50  ;;  %v2124_v63 = vmul.f32 %v1986_v1, %v5666_v4  ;;  %v2126_v15 = vmul.f32 %v1986_v1, %v5668_v28  ;;  %v5765_v26 = vsub.s32 4, %v5100_v3 }
  0xb3   : > { %v1716_v20 = vpack.c.bf16 %v1662_v42, %v1660_v22  ;;  %v1431_v18 = vcombine.high %v1415_v39, %v1415_v39  ;;  %v2123_v47 = vmul.f32 %v1982_v31, %v5660_v35  ;;  %v2125_v46 = vmul.f32 %v1982_v31, %v5664_v60 }
  0xb4   : > { %v1665_v62 = vmul.f32 %v1531_v36, %v5605_v45  ;;  %v1667_v30 = vmul.f32 %v1531_v36, %v5622_v32  ;;  %v2180_v11 = vpack.c.bf16 %v2126_v15, %v2124_v63  ;;  %v1994_v55 = vrot.slane %v1892_v0, %v5121_v8 }
  0xb5   : > { %1749 = vmatpush1.bf16.msra.mxu0 %v1716_v20  ;;  %v1664_v10 = vmul.f32 %v1527_v34, %v5603_v14  ;;  %v1666_v44 = vmul.f32 %v1527_v34, %v5620_v21  ;;  %v2179_v56 = vpack.c.bf16 %v2125_v46, %v2123_v47  ;;  %v1990_v39 = vrot.slane %v1892_v0, %v5105_v6 }
  0xb6   : > { %v1719_v23 = vpack.c.bf16 %v1667_v30, %v1665_v62  ;;  %v1539_v27 = vrot.slane %v1431_v18, %v5121_v8  ;;  %2211 = vmatprep.subr.bf16.mxu1 %v2180_v11  ;;  %v2128_v33 = vmul.f32 %v1994_v55, %v5666_v4  ;;  %v2130_v40 = vmul.f32 %v1994_v55, %v5668_v28 }
  0xb7   : > { %v1718_v29 = vpack.c.bf16 %v1666_v44, %v1664_v10  ;;  %v1894_v2 = vcombine.high %v1878_v17, %v1878_v17  ;;  %2212 = vmatpush1.bf16.msra.mxu1 %v2179_v56  ;;  %v2127_v37 = vmul.f32 %v1990_v39, %v5660_v35  ;;  %v2129_v43 = vmul.f32 %v1990_v39, %v5664_v60 }
  0xb8   : > { %1750 = vmatprep.subr.bf16.mxu0 %v1719_v23  ;;  %v1669_v50 = vmul.f32 %v1539_v27, %v5605_v45  ;;  %v2182_v59 = vpack.c.bf16 %v2130_v40, %v2128_v33  ;;  %v1671_v1 = vmul.f32 %v1539_v27, %v5622_v32  ;;  %v1535_v42 = vrot.slane %v1431_v18, %v5105_v6 }
  0xb9   : > { %1751 = vmatpush1.bf16.msra.mxu0 %v1718_v29  ;;  %v2002_v22 = vrot.slane %v1894_v2, %v5121_v8  ;;  %v2181_v17 = vpack.c.bf16 %v2129_v43, %v2127_v37  ;;  %v1998_v31 = vrot.slane %v1894_v2, %v5105_v6  ;;  %v1433_v36 = vcombine.high %v1429_v52, %v1429_v52 }
  0xba   : > { %v1896_v34 = vcombine.high %v1892_v0, %v1892_v0  ;;  %2213 = vmatprep.subr.bf16.mxu1 %v2182_v59  ;;  %v1721_v63 = vpack.c.bf16 %v1671_v1, %v1669_v50  ;;  %v1668_v47 = vmul.f32 %v1535_v42, %v5603_v14  ;;  %v1670_v46 = vmul.f32 %v1535_v42, %v5620_v21 }
  0xbb   : > { %v2132_v15 = vmul.f32 %v2002_v22, %v5666_v4  ;;  %v2134_v20 = vmul.f32 %v2002_v22, %v5668_v28  ;;  %2214 = vmatpush1.bf16.msra.mxu1 %v2181_v17  ;;  %v2131_v62 = vmul.f32 %v1998_v31, %v5660_v35  ;;  %v2133_v18 = vmul.f32 %v1998_v31, %v5664_v60 }
  0xbc   : > { %v1547_v30 = vrot.slane %v1433_v36, %v5121_v8  ;;  %1752 = vmatprep.subr.bf16.mxu0 %v1721_v63  ;;  %v2010_v0 = vrot.slane %v1896_v34, %v5121_v8  ;;  %v1543_v11 = vrot.slane %v1433_v36, %v5105_v6  ;;  %v2006_v55 = vrot.slane %v1896_v34, %v5105_v6 }
  0xbd   : > { %v2184_v52 = vpack.c.bf16 %v2134_v20, %v2132_v15  ;;  %v1720_v10 = vpack.c.bf16 %v1670_v46, %v1668_v47  ;;  %v2183_v44 = vpack.c.bf16 %v2133_v18, %v2131_v62  ;;  %v1338_v43 = vsub.f32 1.0, %v5742_v38 }
  0xbe   : > { %v1673_v56 = vmul.f32 %v1547_v30, %v5605_v45  ;;  %v1675_v23 = vmul.f32 %v1547_v30, %v5622_v32  ;;  %v2136_v39 = vmul.f32 %v2010_v0, %v5666_v4  ;;  %v2138_v27 = vmul.f32 %v2010_v0, %v5668_v28 }
  0xbf   : > { %2215 = vmatprep.subr.bf16.mxu1 %v2184_v52  ;;  %v1672_v33 = vmul.f32 %v1543_v11, %v5603_v14  ;;  %v1674_v40 = vmul.f32 %v1543_v11, %v5620_v21  ;;  %1753 = vmatpush1.bf16.msra.mxu0 %v1720_v10  ;;  %v2135_v2 = vmul.f32 %v2006_v55, %v5660_v35 }
  0xc0   : > { %2216 = vmatpush1.bf16.msra.mxu1 %v2183_v44  ;;  %v1723_v29 = vpack.c.bf16 %v1675_v23, %v1673_v56  ;;  %v2137_v37 = vmul.f32 %v2006_v55, %v5664_v60  ;;  %v2186_v50 = vpack.c.bf16 %v2138_v27, %v2136_v39  ;;  %v1331_v1 = vsub.f32 %v5137_v12, %v5397_v16 }
  0xc1   : > { %v1722_v59 = vpack.c.bf16 %v1674_v40, %v1672_v33  ;;  %v1793_v22 = vsub.f32 %v5137_v12, %v5600_v49  ;;  %v1794_v17 = vsub.f32 %v5137_v12, %v5612_v51  ;;  %v5798_v31 = vrot.slane %v5596_v24, %v5765_v26 }
  0xc2   : > { %1754 = vmatprep.subr.bf16.mxu0 %v1723_v29  ;;  %v2185_v42 = vpack.c.bf16 %v2137_v37, %v2135_v2  ;;  %v5802_v38 = vrot.slane %v5608_v53, %v5765_v26  ;;  %2217 = vmatprep.subr.bf16.mxu1 %v2186_v50  ;;  %v1335_v36 = vand.u32 2147483647, %v1331_v1  ;;  %v2273_v16 = vrot.slane %v5615_v9, %v5765_v26 }
  0xc3   : > { %v1797_v34 = vand.u32 2147483647, %v1793_v22  ;;  %v2277_v49 = vrot.slane %v5631_v54, %v5765_v26  ;;  %1755 = vmatpush1.bf16.msra.mxu0 %v1722_v59  ;;  %v1342_v51 = vmax.f32 %v1338_v43, 0.0  ;;  %v1798_v63 = vand.u32 2147483647, %v1794_v17 }
  0xc4   : > { %2218 = vmatpush1.bf16.msra.mxu1 %v2185_v42  ;;  %v2254_v15 = vsub.f32 %v5118_v7, %v5798_v31  ;;  %v2255_v20 = vsub.f32 %v5118_v7, %v5802_v38  ;;  %v1339_v47 = vsub.f32 1.0, %v1335_v36  ;;  %v2278_v62 = vsub.f32 %v5118_v7, %v2273_v16 }
  0xc5   : > { %v1801_v46 = vsub.f32 1.0, %v1797_v34  ;;  %v2279_v18 = vsub.f32 %v5118_v7, %v2277_v49  ;;  %v1802_v30 = vsub.f32 1.0, %v1798_v63  ;;  %v2280_v11 = vsub.f32 %v5137_v12, %v2273_v16 }
  0xc6   : > { %v2258_v52 = vand.u32 2147483647, %v2254_v15  ;;  %v2259_v0 = vand.u32 2147483647, %v2255_v20  ;;  %v1343_v55 = vmax.f32 %v1339_v47, 0.0  ;;  %v2281_v44 = vsub.f32 %v5137_v12, %v2277_v49 }
  0xc7   : > { %v1805_v10 = vmax.f32 %v1801_v46, 0.0  ;;  %v5816_v56 = vand.u32 2147483647, %v2278_v62  ;;  %v1806_v23 = vmax.f32 %v1802_v30, 0.0  ;;  %v5818_v33 = vand.u32 2147483647, %v2279_v18 }
  0xc8   : > { %v2262_v39 = vsub.f32 1.0, %v2258_v52  ;;  %v2263_v27 = vsub.f32 1.0, %v2259_v0  ;;  %v1434_v40 = vcombine.low %v1342_v51, %v1343_v55  ;;  %v1435_v29 = vcombine.high %v1342_v51, %v1343_v55 }
  0xc9   : > { %v5822_v2 = vrot.slane %v5639_v57, %v5765_v26  ;;  %v5825_v37 = vsub.s32 5, %v5100_v3  ;;  %v1897_v43 = vcombine.low %v1805_v10, %v1806_v23  ;;  %v1898_v50 = vcombine.high %v1805_v10, %v1806_v23 }
  0xca   : > { %v5827_v59 = vand.u32 2147483647, %v2280_v11  ;;  %v5829_v1 = vand.u32 2147483647, %v2281_v44  ;;  %v1442_v22 = vrot.slane %v1434_v40, %v5140_v13  ;;  %v5833_v42 = vrot.slane %v1435_v29, %v5140_v13 }
  0xcb   : > { %v5835_v17 = vmax.f32 %v2262_v39, 0.0  ;;  %v5837_v36 = vmax.f32 %v2263_v27, 0.0  ;;  %v1905_v34 = vrot.slane %v1897_v43, %v5140_v13  ;;  %v5841_v16 = vrot.slane %v1898_v50, %v5140_v13 }
  0xcc   : > { %v1458_v63 = vrot.slane %v1442_v22, %v5140_v13  ;;  %v1450_v15 = vcombine.high %v1442_v22, %v1442_v22  ;;  %v5848_v20 = vrot.slane %v5833_v42, %v5140_v13 }
  0xcd   : > { %v1921_v46 = vrot.slane %v1905_v34, %v5140_v13  ;;  %v1913_v62 = vcombine.high %v1905_v34, %v1905_v34  ;;  %v5855_v18 = vrot.slane %v5841_v16, %v5140_v13 }
  0xce   : > { %v1555_v52 = vrot.slane %v1458_v63, %v5121_v8  ;;  %v1551_v0 = vrot.slane %v1458_v63, %v5105_v6  ;;  %v1472_v11 = vrot.slane %v1450_v15, %v5140_v13  ;;  %v1480_v55 = vcombine.high %v1458_v63, %v1458_v63 }
  0xcf   : > { %v2018_v10 = vrot.slane %v1921_v46, %v5121_v8  ;;  %v2014_v44 = vrot.slane %v1921_v46, %v5105_v6  ;;  %v1935_v23 = vrot.slane %v1913_v62, %v5140_v13  ;;  %v1943_v39 = vcombine.high %v1921_v46, %v1921_v46 }
  0xd0   : > { %v1677_v27 = vmul.f32 %v1555_v52, %v5605_v45  ;;  %v1679_v40 = vmul.f32 %v1555_v52, %v5622_v32  ;;  %v1676_v29 = vmul.f32 %v1551_v0, %v5603_v14  ;;  %v1678_v43 = vmul.f32 %v1551_v0, %v5620_v21 }
  0xd1   : > { %v2140_v50 = vmul.f32 %v2018_v10, %v5666_v4  ;;  %v2142_v22 = vmul.f32 %v2018_v10, %v5668_v28  ;;  %v2139_v34 = vmul.f32 %v2014_v44, %v5660_v35  ;;  %v2141_v63 = vmul.f32 %v2014_v44, %v5664_v60 }
  0xd2   : > { %v1725_v15 = vpack.c.bf16 %v1679_v40, %v1677_v27  ;;  %v1724_v51 = vpack.c.bf16 %v1678_v43, %v1676_v29  ;;  %v1563_v46 = vrot.slane %v1472_v11, %v5121_v8  ;;  %v2026_v62 = vrot.slane %v1935_v23, %v5121_v8 }
  0xd3   : > { %v2188_v30 = vpack.c.bf16 %v2142_v22, %v2140_v50  ;;  %v2187_v52 = vpack.c.bf16 %v2141_v63, %v2139_v34  ;;  %v1559_v47 = vrot.slane %v1472_v11, %v5105_v6  ;;  %v2022_v0 = vrot.slane %v1935_v23, %v5105_v6 }
  0xd4   : > { %1756 = vmatprep.subr.bf16.mxu0 %v1725_v15  ;;  %v1681_v49 = vmul.f32 %v1563_v46, %v5605_v45  ;;  %v1683_v10 = vmul.f32 %v1563_v46, %v5622_v32  ;;  %v2144_v5 = vmul.f32 %v2026_v62, %v5666_v4  ;;  %v2146_v44 = vmul.f32 %v2026_v62, %v5668_v28 }
  0xd5   : > { %2219 = vmatprep.subr.bf16.mxu1 %v2188_v30  ;;  %1757 = vmatpush1.bf16.msra.mxu0 %v1724_v51  ;;  %v1680_v27 = vmul.f32 %v1559_v47, %v5603_v14  ;;  %v1682_v40 = vmul.f32 %v1559_v47, %v5620_v21  ;;  %v2143_v29 = vmul.f32 %v2022_v0, %v5660_v35  ;;  %v2288_v43 = vsub.f32 1.0, %v5827_v59 }
  0xd6   : > { %2220 = vmatpush1.bf16.msra.mxu1 %v2187_v52  ;;  %v1727_v50 = vpack.c.bf16 %v1683_v10, %v1681_v49  ;;  %v2190_v22 = vpack.c.bf16 %v2146_v44, %v2144_v5  ;;  %v2145_v34 = vmul.f32 %v2022_v0, %v5664_v60  ;;  %v1571_v63 = vrot.slane %v1480_v55, %v5121_v8 }
  0xd7   : > { %v1726_v15 = vpack.c.bf16 %v1682_v40, %v1680_v27  ;;  %v2034_v46 = vrot.slane %v1943_v39, %v5121_v8  ;;  %v1567_v51 = vrot.slane %v1480_v55, %v5105_v6  ;;  %v2030_v30 = vrot.slane %v1943_v39, %v5105_v6 }
  0xd8   : > { %1758 = vmatprep.subr.bf16.mxu0 %v1727_v50  ;;  %2221 = vmatprep.subr.bf16.mxu1 %v2190_v22  ;;  %v2189_v47 = vpack.c.bf16 %v2145_v34, %v2143_v29  ;;  %v1685_v62 = vmul.f32 %v1571_v63, %v5605_v45  ;;  %v1687_v52 = vmul.f32 %v1571_v63, %v5622_v32  ;;  %v2289_v5 = vsub.f32 1.0, %v5829_v1 }
  0xd9   : > { %1759 = vmatpush1.bf16.msra.mxu0 %v1726_v15  ;;  %v2148_v49 = vmul.f32 %v2034_v46, %v5666_v4  ;;  %v2150_v0 = vmul.f32 %v2034_v46, %v5668_v28  ;;  %v1684_v10 = vmul.f32 %v1567_v51, %v5603_v14  ;;  %v1686_v55 = vmul.f32 %v1567_v51, %v5620_v21 }
  0xda   : > { %2222 = vmatpush1.bf16.msra.mxu1 %v2189_v47  ;;  %v1729_v39 = vpack.c.bf16 %v1687_v52, %v1685_v62  ;;  %v2147_v44 = vmul.f32 %v2030_v30, %v5660_v35  ;;  %v2149_v27 = vmul.f32 %v2030_v30, %v5664_v60  ;;  %v1482_v40 = vcombine.high %v1472_v11, %v1472_v11 }
  0xdb   : > { %v2192_v29 = vpack.c.bf16 %v2150_v0, %v2148_v49  ;;  %v1728_v50 = vpack.c.bf16 %v1686_v55, %v1684_v10  ;;  %v1945_v22 = vcombine.high %v1935_v23, %v1935_v23  ;;  %v1587_v34 = vrot.slane %v5848_v20, %v5121_v8 }
  0xdc   : > { %1760 = vmatprep.subr.bf16.mxu0 %v1729_v39  ;;  %v2191_v63 = vpack.c.bf16 %v2149_v27, %v2147_v44  ;;  %v1579_v15 = vrot.slane %v1482_v40, %v5121_v8  ;;  %v1575_v46 = vrot.slane %v1482_v40, %v5105_v6  ;;  %v2050_v51 = vrot.slane %v5855_v18, %v5121_v8 }
  0xdd   : > { %2223 = vmatprep.subr.bf16.mxu1 %v2192_v29  ;;  %1761 = vmatpush1.bf16.msra.mxu0 %v1728_v50  ;;  %v2042_v30 = vrot.slane %v1945_v22, %v5121_v8  ;;  %v2038_v11 = vrot.slane %v1945_v22, %v5105_v6  ;;  %v1693_v23 = vmul.f32 %v1587_v34, %v5605_v45  ;;  %v7040_v47 = vsub.f32 1.0, %v5816_v56 }
  0xde   : > { %2224 = vmatpush1.bf16.msra.mxu1 %v2191_v63  ;;  %v1689_v52 = vmul.f32 %v1579_v15, %v5605_v45  ;;  %v1691_v49 = vmul.f32 %v1579_v15, %v5622_v32  ;;  %v1688_v0 = vmul.f32 %v1575_v46, %v5603_v14  ;;  %v1690_v10 = vmul.f32 %v1575_v46, %v5620_v21 }
  0xdf   : > { %v5910_v62 = vmax.f32 %v7040_v47, 0.0  ;;  %v2152_v55 = vmul.f32 %v2042_v30, %v5666_v4  ;;  %v2154_v39 = vmul.f32 %v2042_v30, %v5668_v28  ;;  %v2151_v44 = vmul.f32 %v2038_v11, %v5660_v35 }
  0xe0   : > { %v2153_v27 = vmul.f32 %v2038_v11, %v5664_v60  ;;  %v1731_v56 = vpack.c.bf16 %v1691_v49, %v1689_v52  ;;  %v1730_v40 = vpack.c.bf16 %v1690_v10, %v1688_v0  ;;  %v1695_v29 = vmul.f32 %v1587_v34, %v5622_v32 }
  0xe1   : > { %v2156_v50 = vmul.f32 %v2050_v51, %v5666_v4  ;;  %v2194_v22 = vpack.c.bf16 %v2154_v39, %v2152_v55  ;;  %v2158_v15 = vmul.f32 %v2050_v51, %v5668_v28  ;;  %v1583_v46 = vrot.slane %v5848_v20, %v5105_v6 }
  0xe2   : > { %v2193_v63 = vpack.c.bf16 %v2153_v27, %v2151_v44  ;;  %1762 = vmatprep.subr.bf16.mxu0 %v1731_v56  ;;  %v1733_v47 = vpack.c.bf16 %v1695_v29, %v1693_v23  ;;  %v2046_v30 = vrot.slane %v5855_v18, %v5105_v6  ;;  %v7041_v11 = vcombine.high %v5833_v42, %v5833_v42 }
  0xe3   : > { %v7042_v34 = vcombine.high %v5841_v16, %v5841_v16  ;;  %2225 = vmatprep.subr.bf16.mxu1 %v2194_v22  ;;  %1763 = vmatpush1.bf16.msra.mxu0 %v1730_v40  ;;  %v2196_v51 = vpack.c.bf16 %v2158_v15, %v2156_v50  ;;  %v1692_v0 = vmul.f32 %v1583_v46, %v5603_v14  ;;  %v7043_v10 = vsub.f32 1.0, %v5818_v33 }
  0xe4   : > { %v1479_v52 = vrot.slane %v7041_v11, %v5140_v13  ;;  %v1694_v23 = vmul.f32 %v1583_v46, %v5620_v21  ;;  %2226 = vmatpush1.bf16.msra.mxu1 %v2193_v63  ;;  %1764 = vmatprep.subr.bf16.mxu0 %v1733_v47  ;;  %v2155_v42 = vmul.f32 %v2046_v30, %v5660_v35  ;;  %v5946_v44 = vmax.f32 %v2288_v43, 0.0 }
  0xe5   : > { %v1942_v49 = vrot.slane %v7042_v34, %v5140_v13  ;;  %v5939_v55 = vmax.f32 %v7043_v10, 0.0  ;;  %v2157_v39 = vmul.f32 %v2046_v30, %v5664_v60  ;;  %2227 = vmatprep.subr.bf16.mxu1 %v2196_v51  ;;  %v1481_v63 = vcombine.high %v5848_v20, %v5848_v20 }
  0xe6   : > { %v1595_v16 = vrot.slane %v1479_v52, %v5121_v8  ;;  %v1732_v27 = vpack.c.bf16 %v1694_v23, %v1692_v0  ;;  %v1591_v33 = vrot.slane %v1479_v52, %v5105_v6  ;;  %v1944_v20 = vcombine.high %v5855_v18, %v5855_v18 }
  0xe7   : > { %v2058_v56 = vrot.slane %v1942_v49, %v5121_v8  ;;  %v2054_v40 = vrot.slane %v1942_v49, %v5105_v6  ;;  %v2195_v29 = vpack.c.bf16 %v2157_v39, %v2155_v42  ;;  %v1603_v34 = vrot.slane %v1481_v63, %v5121_v8 }
  0xe8   : > { %v1697_v50 = vmul.f32 %v1595_v16, %v5605_v45  ;;  %v1699_v22 = vmul.f32 %v1595_v16, %v5622_v32  ;;  %1765 = vmatpush1.bf16.msra.mxu0 %v1732_v27  ;;  %v1696_v15 = vmul.f32 %v1591_v33, %v5603_v14  ;;  %v1698_v46 = vmul.f32 %v1591_v33, %v5620_v21 }
  0xe9   : > { %v2160_v59 = vmul.f32 %v2058_v56, %v5666_v4  ;;  %v2162_v43 = vmul.f32 %v2058_v56, %v5668_v28  ;;  %2228 = vmatpush1.bf16.msra.mxu1 %v2195_v29  ;;  %v2159_v30 = vmul.f32 %v2054_v40, %v5660_v35  ;;  %v2161_v11 = vmul.f32 %v2054_v40, %v5664_v60 }
  0xea   : > { %v1735_v47 = vpack.c.bf16 %v1699_v22, %v1697_v50  ;;  %v1734_v0 = vpack.c.bf16 %v1698_v46, %v1696_v15  ;;  %v1599_v23 = vrot.slane %v1481_v63, %v5105_v6  ;;  %v1701_v42 = vmul.f32 %v1603_v34, %v5605_v45 }
  0xeb   : > { %v2198_v51 = vpack.c.bf16 %v2162_v43, %v2160_v59  ;;  %v2197_v10 = vpack.c.bf16 %v2161_v11, %v2159_v30  ;;  %v1703_v39 = vmul.f32 %v1603_v34, %v5622_v32  ;;  %v1483_v16 = vcombine.high %v1479_v52, %v1479_v52 }
  0xec   : > { %1766 = vmatprep.subr.bf16.mxu0 %v1735_v47  ;;  %v2066_v27 = vrot.slane %v1944_v20, %v5121_v8  ;;  %v1700_v56 = vmul.f32 %v1599_v23, %v5603_v14  ;;  %v1702_v33 = vmul.f32 %v1599_v23, %v5620_v21  ;;  %v2293_v18 = vmax.f32 %v2289_v5, 0.0 }
  0xed   : > { %2229 = vmatprep.subr.bf16.mxu1 %v2198_v51  ;;  %1767 = vmatpush1.bf16.msra.mxu0 %v1734_v0  ;;  %v1737_v40 = vpack.c.bf16 %v1703_v39, %v1701_v42  ;;  %v2062_v29 = vrot.slane %v1944_v20, %v5105_v6  ;;  %v1611_v50 = vrot.slane %v1483_v16, %v5121_v8 }
  0xee   : > { %2230 = vmatpush1.bf16.msra.mxu1 %v2197_v10  ;;  %v1946_v22 = vcombine.high %v1942_v49, %v1942_v49  ;;  %v2164_v52 = vmul.f32 %v2066_v27, %v5666_v4  ;;  %v2166_v63 = vmul.f32 %v2066_v27, %v5668_v28  ;;  %v1736_v59 = vpack.c.bf16 %v1702_v33, %v1700_v56 }
  0xef   : > { %v1607_v43 = vrot.slane %v1483_v16, %v5105_v6  ;;  %1768 = vmatprep.subr.bf16.mxu0 %v1737_v40  ;;  %v2163_v15 = vmul.f32 %v2062_v29, %v5660_v35  ;;  %v2165_v1 = vmul.f32 %v2062_v29, %v5664_v60  ;;  %v1705_v5 = vmul.f32 %v1611_v50, %v5605_v45 }
  0xf0   : > { %v1707_v46 = vmul.f32 %v1611_v50, %v5622_v32  ;;  %v2200_v47 = vpack.c.bf16 %v2166_v63, %v2164_v52  ;;  %v2074_v49 = vrot.slane %v1946_v22, %v5121_v8  ;;  %v2070_v0 = vrot.slane %v1946_v22, %v5105_v6 }
  0xf1   : > { %1769 = vmatpush1.bf16.msra.mxu0 %v1736_v59  ;;  %v1704_v30 = vmul.f32 %v1607_v43, %v5603_v14  ;;  %v1706_v11 = vmul.f32 %v1607_v43, %v5620_v21  ;;  %v2199_v34 = vpack.c.bf16 %v2165_v1, %v2163_v15  ;;  %v2301_v20 = vrot.slane %v5589_v48, %v5765_v26 }
  0xf2   : > { %v1739_v51 = vpack.c.bf16 %v1707_v46, %v1705_v5  ;;  %2231 = vmatprep.subr.bf16.mxu1 %v2200_v47  ;;  %v2168_v45 = vmul.f32 %v2074_v49, %v5666_v4  ;;  %v2170_v32 = vmul.f32 %v2074_v49, %v5668_v28  ;;  %v5991_v10 = vmul.f32 %v5822_v2, %v5910_v62 }
  0xf3   : > { %v1738_v23 = vpack.c.bf16 %v1706_v11, %v1704_v30  ;;  %2232 = vmatpush1.bf16.msra.mxu1 %v2199_v34  ;;  %v2167_v14 = vmul.f32 %v2070_v0, %v5660_v35  ;;  %v2169_v21 = vmul.f32 %v2070_v0, %v5664_v60  ;;  %v5996_v42 = vmul.f32 %v2301_v20, %v5939_v55 }
  0xf4   : > { %1770 = vmatprep.subr.bf16.mxu0 %v1739_v51  ;;  %v2202_v26 = vpack.c.bf16 %v2170_v32, %v2168_v45  ;;  %v6000_v4 = vmul.f32 %v5822_v2, %v5946_v44  ;;  %v6002_v28 = vmul.f32 %v2301_v20, %v2293_v18  ;;  %v2310_v62 = vcombine.low %v5835_v17, %v5837_v36 }
  0xf5   : > { %1771 = vmatpush1.bf16.msra.mxu0 %v1738_v23  ;;  %v2201_v39 = vpack.c.bf16 %v2169_v21, %v2167_v14  ;;  %v6008_v35 = vrot.slane %v5596_v24, %v5825_v37  ;;  %v6012_v60 = vrot.slane %v5608_v53, %v5825_v37  ;;  %v2736_v55 = vrot.slane %v5615_v9, %v5825_v37 }
  0xf6   : > { %2233 = vmatprep.subr.bf16.mxu1 %v2202_v26  ;;  %v2318_v2 = vrot.slane %v2310_v62, %v5140_v13  ;;  %v2740_v44 = vrot.slane %v5631_v54, %v5825_v37  ;;  %v2760_v16 = vrot.slane %v5639_v57, %v5825_v37  ;;  %v2764_v24 = vrot.slane %v5589_v48, %v5825_v37 }
  0xf7   : > { %2234 = vmatpush1.bf16.msra.mxu1 %v2201_v39  ;;  %v2717_v53 = vsub.f32 %v5118_v7, %v6008_v35  ;;  %v2718_v9 = vsub.f32 %v5118_v7, %v6012_v60  ;;  %v2741_v27 = vsub.f32 %v5118_v7, %v2736_v55  ;;  %v2743_v57 = vsub.f32 %v5137_v12, %v2736_v55 }
  0xf8   : > { %1773 = vmatmul.mubr.bf16.vlgmr.msra.gmra.mrb[4].mxu0 %v5387_v25  ;;  %v2334_v56 = vrot.slane %v2318_v2, %v5140_v13  ;;  %v2742_v54 = vsub.f32 %v5118_v7, %v2740_v44  ;;  %v2744_v33 = vsub.f32 %v5137_v12, %v2740_v44  ;;  %v2326_v40 = vcombine.high %v2318_v2, %v2318_v2 }
  0xf9   : > { %2698 = vmatprep.mubr.bf16.mxu0 %v5385_v41  ;;  %v2721_v48 = vand.u32 2147483647, %v2717_v53  ;;  %v2722_v37 = vand.u32 2147483647, %v2718_v9  ;;  %v2745_v18 = vand.u32 2147483647, %v2741_v27  ;;  %v2311_v9 = vcombine.high %v5835_v17, %v5837_v36 }
  0xfa   : > { %2236 = vmatmul.mubr.bf16.vlgmr.msra.gmra.mrb[4].mxu1 %v5387_v25  ;;  %v2417_v29 = vrot.slane %v2334_v56, %v5121_v8  ;;  %v2746_v50 = vand.u32 2147483647, %v2742_v54  ;;  %v2747_v22 = vand.u32 2147483647, %v2743_v57  ;;  %v2748_v52 = vand.u32 2147483647, %v2744_v33 }
  0xfb   : > { %v2725_v63 = vsub.f32 1.0, %v2721_v48  ;;  %v2726_v59 = vsub.f32 1.0, %v2722_v37  ;;  %v2749_v43 = vsub.f32 1.0, %v2745_v18  ;;  %v2413_v15 = vrot.slane %v2334_v56, %v5105_v6  ;;  %3161 = vmatprep.mubr.bf16.mxu1 %v5385_v41 }
  0xfc   : > { %v2571_v1 = vmul.f32 %v2417_v29, %v5996_v42  ;;  %v2573_v5 = vmul.f32 %v2417_v29, %v6002_v28  ;;  %v2750_v46 = vsub.f32 1.0, %v2746_v50  ;;  %v2751_v47 = vsub.f32 1.0, %v2747_v22 }
  0xfd   : > { %v6040_v49 = vmax.f32 %v2725_v63, 0.0  ;;  %v6042_v30 = vmax.f32 %v2726_v59, 0.0  ;;  %v2752_v11 = vsub.f32 1.0, %v2748_v52  ;;  %v2753_v34 = vmax.f32 %v2749_v43, 0.0 }
  0xfe   : > { %v2635_v51 = vpack.c.bf16 %v2573_v5, %v2571_v1  ;;  %v2754_v0 = vmax.f32 %v2750_v46, 0.0  ;;  %v2755_v20 = vmax.f32 %v2751_v47, 0.0  ;;  %v2570_v45 = vmul.f32 %v2413_v15, %v5991_v10 }
  0xff   : > { %v2756_v32 = vmax.f32 %v2752_v11, 0.0  ;;  %v6045_v23 = vmul.f32 %v2760_v16, %v2753_v34  ;;  %v2773_v14 = vcombine.low %v6040_v49, %v6042_v30  ;;  %v2572_v21 = vmul.f32 %v2413_v15, %v6000_v4 }
 0x100   : > { %2666 = vmatprep.subr.bf16.mxu0 %v2635_v51  ;;  %v6050_v26 = vmul.f32 %v2764_v24, %v2754_v0  ;;  %v6052_v62 = vmul.f32 %v2760_v16, %v2755_v20  ;;  %v2348_v39 = vrot.slane %v2326_v40, %v5140_v13  ;;  %v2356_v55 = vcombine.high %v2334_v56, %v2334_v56 }
 0x101   : > { %v6055_v2 = vmul.f32 %v2764_v24, %v2756_v32  ;;  %v2781_v44 = vrot.slane %v2773_v14, %v5140_v13  ;;  %v2634_v53 = vpack.c.bf16 %v2572_v21, %v2570_v45  ;;  %v6066_v48 = vrot.slane %v2311_v9, %v5140_v13 }
 0x102   : > { %v2425_v27 = vrot.slane %v2348_v39, %v5121_v8  ;;  %v2421_v54 = vrot.slane %v2348_v39, %v5105_v6  ;;  %v2433_v57 = vrot.slane %v2356_v55, %v5121_v8  ;;  %v2429_v16 = vrot.slane %v2356_v55, %v5105_v6 }
 0x103   : > { %v2797_v33 = vrot.slane %v2781_v44, %v5140_v13  ;;  %2667 = vmatpush1.bf16.msra.mxu0 %v2634_v53  ;;  %v2789_v56 = vcombine.high %v2781_v44, %v2781_v44  ;;  %v2358_v24 = vcombine.high %v2348_v39, %v2348_v39 }
 0x104   : > { %v2575_v37 = vmul.f32 %v2425_v27, %v5996_v42  ;;  %v2577_v17 = vmul.f32 %v2425_v27, %v6002_v28  ;;  %v2574_v36 = vmul.f32 %v2421_v54, %v5991_v10  ;;  %v2576_v18 = vmul.f32 %v2421_v54, %v6000_v4 }
 0x105   : > { %v2880_v40 = vrot.slane %v2797_v33, %v5121_v8  ;;  %v2876_v29 = vrot.slane %v2797_v33, %v5105_v6  ;;  %v2811_v50 = vrot.slane %v2789_v56, %v5140_v13  ;;  %v2579_v22 = vmul.f32 %v2433_v57, %v5996_v42 }
 0x106   : > { %v2637_v52 = vpack.c.bf16 %v2577_v17, %v2575_v37  ;;  %v2636_v63 = vpack.c.bf16 %v2576_v18, %v2574_v36  ;;  %v2581_v59 = vmul.f32 %v2433_v57, %v6002_v28  ;;  %v2819_v43 = vcombine.high %v2797_v33, %v2797_v33 }
 0x107   : > { %v3034_v15 = vmul.f32 %v2880_v40, %v6050_v26  ;;  %v3036_v1 = vmul.f32 %v2880_v40, %v6055_v2  ;;  %v3033_v5 = vmul.f32 %v2876_v29, %v6045_v23  ;;  %v3035_v46 = vmul.f32 %v2876_v29, %v6052_v62 }
 0x108   : > { %2668 = vmatprep.subr.bf16.mxu0 %v2637_v52  ;;  %v2888_v47 = vrot.slane %v2811_v50, %v5121_v8  ;;  %v2884_v11 = vrot.slane %v2811_v50, %v5105_v6  ;;  %v2639_v34 = vpack.c.bf16 %v2581_v59, %v2579_v22  ;;  %v2896_v51 = vrot.slane %v2819_v43, %v5121_v8 }
 0x109   : > { %v3098_v0 = vpack.c.bf16 %v3036_v1, %v3034_v15  ;;  %v3097_v20 = vpack.c.bf16 %v3035_v46, %v3033_v5  ;;  %2669 = vmatpush1.bf16.msra.mxu0 %v2636_v63  ;;  %v2578_v45 = vmul.f32 %v2429_v16, %v5991_v10  ;;  %v2580_v32 = vmul.f32 %v2429_v16, %v6000_v4 }
 0x10a   : > { %v3038_v14 = vmul.f32 %v2888_v47, %v6050_v26  ;;  %v3040_v21 = vmul.f32 %v2888_v47, %v6055_v2  ;;  %v3037_v39 = vmul.f32 %v2884_v11, %v6045_v23  ;;  %v3039_v55 = vmul.f32 %v2884_v11, %v6052_v62  ;;  %2670 = vmatprep.subr.bf16.mxu0 %v2639_v34 }
 0x10b   : > { %3129 = vmatprep.subr.bf16.mxu1 %v3098_v0  ;;  %v3042_v44 = vmul.f32 %v2896_v51, %v6050_v26  ;;  %v3044_v53 = vmul.f32 %v2896_v51, %v6055_v2  ;;  %v2638_v9 = vpack.c.bf16 %v2580_v32, %v2578_v45  ;;  %v2892_v27 = vrot.slane %v2819_v43, %v5105_v6 }
 0x10c   : > { %3130 = vmatpush1.bf16.msra.mxu1 %v3097_v20  ;;  %v3100_v54 = vpack.c.bf16 %v3040_v21, %v3038_v14  ;;  %v3099_v57 = vpack.c.bf16 %v3039_v55, %v3037_v39  ;;  %v2441_v16 = vrot.slane %v2358_v24, %v5121_v8  ;;  %v2821_v33 = vcombine.high %v2811_v50, %v2811_v50 }
 0x10d   : > { %v3102_v56 = vpack.c.bf16 %v3044_v53, %v3042_v44  ;;  %2671 = vmatpush1.bf16.msra.mxu0 %v2638_v9  ;;  %v3041_v37 = vmul.f32 %v2892_v27, %v6045_v23  ;;  %v3043_v17 = vmul.f32 %v2892_v27, %v6052_v62  ;;  %v2437_v36 = vrot.slane %v2358_v24, %v5105_v6 }
 0x10e   : > { %3131 = vmatprep.subr.bf16.mxu1 %v3100_v54  ;;  %v2583_v18 = vmul.f32 %v2441_v16, %v5996_v42  ;;  %v2585_v40 = vmul.f32 %v2441_v16, %v6002_v28  ;;  %v2904_v29 = vrot.slane %v2821_v33, %v5121_v8  ;;  %v2900_v22 = vrot.slane %v2821_v33, %v5105_v6 }
 0x10f   : > { %v3101_v52 = vpack.c.bf16 %v3043_v17, %v3041_v37  ;;  %v2582_v50 = vmul.f32 %v2437_v36, %v5991_v10  ;;  %v2584_v63 = vmul.f32 %v2437_v36, %v6000_v4  ;;  %v2341_v59 = vrot.slane %v6066_v48, %v5140_v13 }
 0x110   : > { %3132 = vmatpush1.bf16.msra.mxu1 %v3099_v57  ;;  %v2641_v43 = vpack.c.bf16 %v2585_v40, %v2583_v18  ;;  %v3046_v24 = vmul.f32 %v2904_v29, %v6050_v26  ;;  %v3048_v15 = vmul.f32 %v2904_v29, %v6055_v2  ;;  %v3045_v1 = vmul.f32 %v2900_v22, %v6045_v23 }
 0x111   : > { %3133 = vmatprep.subr.bf16.mxu1 %v3102_v56  ;;  %v2640_v5 = vpack.c.bf16 %v2584_v63, %v2582_v50  ;;  %v3047_v46 = vmul.f32 %v2900_v22, %v6052_v62  ;;  %v2449_v47 = vrot.slane %v2341_v59, %v5121_v8  ;;  %v2774_v11 = vcombine.high %v6040_v49, %v6042_v30 }
 0x112   : > { %2672 = vmatprep.subr.bf16.mxu0 %v2641_v43  ;;  %v3104_v34 = vpack.c.bf16 %v3048_v15, %v3046_v24  ;;  %v2445_v51 = vrot.slane %v2341_v59, %v5105_v6  ;;  %v2327_v0 = vcombine.high %v6066_v48, %v6066_v48  ;;  %v2357_v20 = vcombine.high %v2341_v59, %v2341_v59 }
 0x113   : > { %2673 = vmatpush1.bf16.msra.mxu0 %v2640_v5  ;;  %v3103_v45 = vpack.c.bf16 %v3047_v46, %v3045_v1  ;;  %v2587_v32 = vmul.f32 %v2449_v47, %v5996_v42  ;;  %v2589_v14 = vmul.f32 %v2449_v47, %v6002_v28  ;;  %v2788_v21 = vrot.slane %v2774_v11, %v5140_v13 }
 0x114   : > { %3134 = vmatpush1.bf16.msra.mxu1 %v3101_v52  ;;  %v2586_v39 = vmul.f32 %v2445_v51, %v5991_v10  ;;  %v2588_v49 = vmul.f32 %v2445_v51, %v6000_v4  ;;  %v2355_v30 = vrot.slane %v2327_v0, %v5140_v13  ;;  %v2465_v55 = vrot.slane %v2357_v20, %v5121_v8 }
 0x115   : > { %3135 = vmatprep.subr.bf16.mxu1 %v3104_v34  ;;  %v2643_v48 = vpack.c.bf16 %v2589_v14, %v2587_v32  ;;  %v2804_v44 = vrot.slane %v2788_v21, %v5140_v13  ;;  %v2790_v53 = vcombine.high %v2788_v21, %v2788_v21  ;;  %v2461_v9 = vrot.slane %v2357_v20, %v5105_v6 }
 0x116   : > { %v2642_v27 = vpack.c.bf16 %v2588_v49, %v2586_v39  ;;  %v2457_v54 = vrot.slane %v2355_v30, %v5121_v8  ;;  %v2453_v57 = vrot.slane %v2355_v30, %v5105_v6  ;;  %v2595_v16 = vmul.f32 %v2465_v55, %v5996_v42 }
 0x117   : > { %2674 = vmatprep.subr.bf16.mxu0 %v2643_v48  ;;  %v2912_v33 = vrot.slane %v2804_v44, %v5121_v8  ;;  %v2908_v56 = vrot.slane %v2804_v44, %v5105_v6  ;;  %v2818_v37 = vrot.slane %v2790_v53, %v5140_v13  ;;  %v2597_v17 = vmul.f32 %v2465_v55, %v6002_v28 }
 0x118   : > { %3136 = vmatpush1.bf16.msra.mxu1 %v3103_v45  ;;  %2675 = vmatpush1.bf16.msra.mxu0 %v2642_v27  ;;  %v2591_v36 = vmul.f32 %v2457_v54, %v5996_v42  ;;  %v2593_v18 = vmul.f32 %v2457_v54, %v6002_v28  ;;  %v2590_v40 = vmul.f32 %v2453_v57, %v5991_v10  ;;  %v6150_v49 = vsub.s32 6, %v5100_v3 }
 0x119   : > { %v3050_v29 = vmul.f32 %v2912_v33, %v6050_v26  ;;  %v3052_v22 = vmul.f32 %v2912_v33, %v6055_v2  ;;  %v3049_v52 = vmul.f32 %v2908_v56, %v6045_v23  ;;  %v3051_v50 = vmul.f32 %v2908_v56, %v6052_v62 }
 0x11a   : > { %v2645_v63 = vpack.c.bf16 %v2593_v18, %v2591_v36  ;;  %v2920_v59 = vrot.slane %v2818_v37, %v5121_v8  ;;  %v2592_v43 = vmul.f32 %v2453_v57, %v6000_v4  ;;  %v2916_v24 = vrot.slane %v2818_v37, %v5105_v6 }
 0x11b   : > { %v3106_v15 = vpack.c.bf16 %v3052_v22, %v3050_v29  ;;  %v3105_v1 = vpack.c.bf16 %v3051_v50, %v3049_v52  ;;  %v2647_v5 = vpack.c.bf16 %v2597_v17, %v2595_v16  ;;  %v2820_v46 = vcombine.high %v2804_v44, %v2804_v44 }
 0x11c   : > { %2676 = vmatprep.subr.bf16.mxu0 %v2645_v63  ;;  %v3054_v47 = vmul.f32 %v2920_v59, %v6050_v26  ;;  %v3056_v11 = vmul.f32 %v2920_v59, %v6055_v2  ;;  %v2644_v34 = vpack.c.bf16 %v2592_v43, %v2590_v40  ;;  %v3053_v51 = vmul.f32 %v2916_v24, %v6045_v23 }
 0x11d   : > { %3137 = vmatprep.subr.bf16.mxu1 %v3106_v15  ;;  %v3055_v0 = vmul.f32 %v2916_v24, %v6052_v62  ;;  %v2928_v20 = vrot.slane %v2820_v46, %v5121_v8  ;;  %v2594_v45 = vmul.f32 %v2461_v9, %v5991_v10  ;;  %v2596_v32 = vmul.f32 %v2461_v9, %v6000_v4 }
 0x11e   : > { %3138 = vmatpush1.bf16.msra.mxu1 %v3105_v1  ;;  %v3108_v14 = vpack.c.bf16 %v3056_v11, %v3054_v47  ;;  %2677 = vmatpush1.bf16.msra.mxu0 %v2644_v34  ;;  %v2924_v21 = vrot.slane %v2820_v46, %v5105_v6  ;;  %v2359_v39 = vcombine.high %v2355_v30, %v2355_v30  ;;  %v6165_v40 = vsub.s32 7, %v5100_v3  ;;  %v6180_v11 = vld [vmem:[%s5110_s15] sm:$0xff] }
 0x11f   : > { %v3107_v55 = vpack.c.bf16 %v3055_v0, %v3053_v51  ;;  %2678 = vmatprep.subr.bf16.mxu0 %v2647_v5  ;;  %v3058_v48 = vmul.f32 %v2928_v20, %v6050_v26  ;;  %v3060_v44 = vmul.f32 %v2928_v20, %v6055_v2  ;;  %v2646_v53 = vpack.c.bf16 %v2596_v32, %v2594_v45  ;;  %v6187_v51 = vld [vmem:[%s5110_s15 + $0x8] sm:$0xff] }
 0x120   : > { %3139 = vmatprep.subr.bf16.mxu1 %v3108_v14  ;;  %v3057_v27 = vmul.f32 %v2924_v21, %v6045_v23  ;;  %v3059_v9 = vmul.f32 %v2924_v21, %v6052_v62  ;;  %v2473_v54 = vrot.slane %v2359_v39, %v5121_v8  ;;  %v2822_v57 = vcombine.high %v2818_v37, %v2818_v37 }
 0x121   : > { %v3110_v16 = vpack.c.bf16 %v3060_v44, %v3058_v48  ;;  %v2469_v30 = vrot.slane %v2359_v39, %v5105_v6  ;;  %v2256_v33 = vsub.f32 %v5137_v12, %v5798_v31  ;;  %v2257_v56 = vsub.f32 %v5137_v12, %v5802_v38 }
 0x122   : > { %3140 = vmatpush1.bf16.msra.mxu1 %v3107_v55  ;;  %2679 = vmatpush1.bf16.msra.mxu0 %v2646_v53  ;;  %v3109_v17 = vpack.c.bf16 %v3059_v9, %v3057_v27  ;;  %v2599_v36 = vmul.f32 %v2473_v54, %v5996_v42  ;;  %v2601_v18 = vmul.f32 %v2473_v54, %v6002_v28  ;;  %v6198_v55 = vld [vmem:[%s5115_s18] sm:$0xff]  ;;  %v6205_v9 = vld [vmem:[%s5115_s18 + $0x8] sm:$0xff]  ;;  %s4834_s18 = sshll.u32 %s4992_s24, 8  ;;  %s4922_s24 = scalar_lea.vmem %s6983_s20, 256 }
 0x123   : > { %3141 = vmatprep.subr.bf16.mxu1 %v3110_v16  ;;  %v2936_v37 = vrot.slane %v2822_v57, %v5121_v8  ;;  %v2598_v29 = vmul.f32 %v2469_v30, %v5991_v10  ;;  %v2600_v31 = vmul.f32 %v2469_v30, %v6000_v4  ;;  %v2932_v22 = vrot.slane %v2822_v57, %v5105_v6  ;;  %s6981_s30 = scalar_lea.hbm %s7034_s6, %s4834_s18  ;;  %p4923_p12 = scmp.ne.s32.totalorder %s6983_s20, %s4922_s24 }
 0x124   : > { %v2649_v38 = vpack.c.bf16 %v2601_v18, %v2599_v36  ;;  %v2260_v52 = vand.u32 2147483647, %v2256_v33  ;;  %v2261_v50 = vand.u32 2147483647, %v2257_v56  ;;  %v2719_v63 = vsub.f32 %v5137_v12, %v6008_v35  ;;  %p4930_p2 = scmp.lt.s32.totalorder %s4928_s13, %s4922_s24 }
 0x125   : > { %v3062_v3 = vmul.f32 %v2936_v37, %v6050_v26  ;;  %v3064_v59 = vmul.f32 %v2936_v37, %v6055_v2  ;;  %v2648_v43 = vpack.c.bf16 %v2600_v31, %v2598_v29  ;;  %v3061_v24 = vmul.f32 %v2932_v22, %v6045_v23  ;;  %p4924_p13 = pnand %p4923_p12, %p5081_p4 }
 0x126   : > { %3142 = vmatpush1.bf16.msra.mxu1 %v3109_v17  ;;  %2680 = vmatprep.subr.bf16.mxu0 %v2649_v38  ;;  %v3063_v15 = vmul.f32 %v2932_v22, %v6052_v62  ;;  %v2264_v1 = vsub.f32 1.0, %v2260_v52  ;;  %v2265_v5 = vsub.f32 1.0, %v2261_v50  ;;  %v2720_v46 = vsub.f32 %v5137_v12, %v6012_v60  ;;  %p4931_p3 = por %p4930_p2, %p4929_p1 }
 0x127   : > { %v3112_v47 = vpack.c.bf16 %v3064_v59, %v3062_v3  ;;  %2681 = vmatpush1.bf16.msra.mxu0 %v2648_v43  ;;  %v2723_v35 = vand.u32 2147483647, %v2719_v63  ;;  %v6184_v34 = vrot.slane %v6180_v11, %v6150_v49  ;;  %v6191_v0 = vrot.slane %v6187_v51, %v6150_v49  ;;  %p4925_p0 = pneg %p4924_p13 }
 0x128   : > { %v3111_v20 = vpack.c.bf16 %v3063_v15, %v3061_v24  ;;  %v2268_v45 = vmax.f32 %v2264_v1, 0.0  ;;  %v2269_v60 = vmax.f32 %v2265_v5, 0.0  ;;  %v2724_v32 = vand.u32 2147483647, %v2720_v46 }
 0x129   : > { %3143 = vmatprep.subr.bf16.mxu1 %v3112_v47  ;;  %v2727_v14 = vsub.f32 1.0, %v2723_v35  ;;  %v3180_v21 = vsub.f32 %v5118_v7, %v6184_v34  ;;  %v3181_v39 = vsub.f32 %v5118_v7, %v6191_v0  ;;  %v6202_v48 = vrot.slane %v6198_v55, %v6150_v49  ;;  %p4932_p5 = pnand %p4931_p3, %p4925_p0 }
 0x12a   : > { %3144 = vmatpush1.bf16.msra.mxu1 %v3111_v20  ;;  %v2360_v44 = vcombine.low %v2268_v45, %v2269_v60  ;;  %v2728_v53 = vsub.f32 1.0, %v2724_v32  ;;  %v2361_v27 = vcombine.high %v2268_v45, %v2269_v60  ;;  %v6209_v54 = vrot.slane %v6205_v9, %v6150_v49 }
 0x12b   : > { %v2731_v57 = vmax.f32 %v2727_v14, 0.0  ;;  %v3184_v16 = vand.u32 2147483647, %v3180_v21  ;;  %v3185_v30 = vand.u32 2147483647, %v3181_v39  ;;  %v3204_v33 = vsub.f32 %v5118_v7, %v6202_v48 }
 0x12c   : > { %v2368_v56 = vrot.slane %v2360_v44, %v5140_v13  ;;  %v2732_v17 = vmax.f32 %v2728_v53, 0.0  ;;  %v6215_v36 = vrot.slane %v2361_v27, %v5140_v13  ;;  %v3205_v18 = vsub.f32 %v5118_v7, %v6209_v54 }
 0x12d   : > { %v3188_v37 = vsub.f32 1.0, %v3184_v16  ;;  %v3189_v29 = vsub.f32 1.0, %v3185_v30  ;;  %v3206_v31 = vsub.f32 %v5137_v12, %v6202_v48  ;;  %v3207_v22 = vsub.f32 %v5137_v12, %v6209_v54 }
 0x12e   : > { %v2384_v38 = vrot.slane %v2368_v56, %v5140_v13  ;;  %v2823_v52 = vcombine.low %v2731_v57, %v2732_v17  ;;  %v2376_v50 = vcombine.high %v2368_v56, %v2368_v56  ;;  %v6226_v63 = vrot.slane %v6215_v36, %v5140_v13 }
 0x12f   : > { %v2824_v3 = vcombine.high %v2731_v57, %v2732_v17  ;;  %v2377_v59 = vcombine.high %v6215_v36, %v6215_v36  ;;  %v6230_v43 = vmax.f32 %v3188_v37, 0.0  ;;  %v6232_v24 = vmax.f32 %v3189_v29, 0.0 }
 0x130   : > { %v2481_v15 = vrot.slane %v2384_v38, %v5121_v8  ;;  %v2831_v1 = vrot.slane %v2823_v52, %v5140_v13  ;;  %v2477_v5 = vrot.slane %v2384_v38, %v5105_v6  ;;  %v2398_v46 = vrot.slane %v2376_v50, %v5140_v13 }
 0x131   : > { %v2406_v47 = vcombine.high %v2384_v38, %v2384_v38  ;;  %v6240_v35 = vrot.slane %v6226_v63, %v5121_v8  ;;  %v6243_v20 = vrot.slane %v2824_v3, %v5140_v13  ;;  %v6247_v45 = vrot.slane %v6226_v63, %v5105_v6 }
 0x132   : > { %v2603_v60 = vmul.f32 %v2481_v15, %v5996_v42  ;;  %v2605_v32 = vmul.f32 %v2481_v15, %v6002_v28  ;;  %v2847_v14 = vrot.slane %v2831_v1, %v5140_v13  ;;  %v2602_v21 = vmul.f32 %v2477_v5, %v5991_v10 }
 0x133   : > { %v2604_v39 = vmul.f32 %v2477_v5, %v6000_v4  ;;  %v2489_v44 = vrot.slane %v2398_v46, %v5121_v8  ;;  %v2839_v53 = vcombine.high %v2831_v1, %v2831_v1  ;;  %v2485_v27 = vrot.slane %v2398_v46, %v5105_v6 }
 0x134   : > { %v2651_v57 = vpack.c.bf16 %v2605_v32, %v2603_v60  ;;  %v2944_v16 = vrot.slane %v2847_v14, %v5121_v8  ;;  %v2940_v30 = vrot.slane %v2847_v14, %v5105_v6  ;;  %v2497_v56 = vrot.slane %v2406_v47, %v5121_v8 }
 0x135   : > { %v2650_v17 = vpack.c.bf16 %v2604_v39, %v2602_v21  ;;  %v2607_v37 = vmul.f32 %v2489_v44, %v5996_v42  ;;  %v2609_v29 = vmul.f32 %v2489_v44, %v6002_v28  ;;  %v2861_v38 = vrot.slane %v2839_v53, %v5140_v13 }
 0x136   : > { %2682 = vmatprep.subr.bf16.mxu0 %v2651_v57  ;;  %v3066_v52 = vmul.f32 %v2944_v16, %v6050_v26  ;;  %v3068_v50 = vmul.f32 %v2944_v16, %v6055_v2  ;;  %v3065_v3 = vmul.f32 %v2940_v30, %v6045_v23  ;;  %v3067_v15 = vmul.f32 %v2940_v30, %v6052_v62 }
 0x137   : > { %2683 = vmatpush1.bf16.msra.mxu0 %v2650_v17  ;;  %v2653_v1 = vpack.c.bf16 %v2609_v29, %v2607_v37  ;;  %v2952_v5 = vrot.slane %v2861_v38, %v5121_v8  ;;  %v2606_v60 = vmul.f32 %v2485_v27, %v5991_v10  ;;  %v2608_v32 = vmul.f32 %v2485_v27, %v6000_v4 }
 0x138   : > { %v3114_v21 = vpack.c.bf16 %v3068_v50, %v3066_v52  ;;  %v3113_v39 = vpack.c.bf16 %v3067_v15, %v3065_v3  ;;  %v2948_v44 = vrot.slane %v2861_v38, %v5105_v6  ;;  %v2611_v53 = vmul.f32 %v2497_v56, %v5996_v42 }
 0x139   : > { %2684 = vmatprep.subr.bf16.mxu0 %v2653_v1  ;;  %v3070_v57 = vmul.f32 %v2952_v5, %v6050_v26  ;;  %v3072_v16 = vmul.f32 %v2952_v5, %v6055_v2  ;;  %v2652_v30 = vpack.c.bf16 %v2608_v32, %v2606_v60  ;;  %v2613_v17 = vmul.f32 %v2497_v56, %v6002_v28 }
 0x13a   : > { %3145 = vmatprep.subr.bf16.mxu1 %v3114_v21  ;;  %v3069_v37 = vmul.f32 %v2948_v44, %v6045_v23  ;;  %v3071_v29 = vmul.f32 %v2948_v44, %v6052_v62  ;;  %v2869_v27 = vcombine.high %v2847_v14, %v2847_v14  ;;  %v2493_v52 = vrot.slane %v2406_v47, %v5105_v6 }
 0x13b   : > { %3146 = vmatpush1.bf16.msra.mxu1 %v3113_v39  ;;  %v3116_v50 = vpack.c.bf16 %v3072_v16, %v3070_v57  ;;  %2685 = vmatpush1.bf16.msra.mxu0 %v2652_v30  ;;  %v2655_v3 = vpack.c.bf16 %v2613_v17, %v2611_v53  ;;  %v2408_v15 = vcombine.high %v2398_v46, %v2398_v46  ;;  %v6280_v1 = vand.u32 2147483647, %v3204_v33 }
 0x13c   : > { %v3115_v5 = vpack.c.bf16 %v3071_v29, %v3069_v37  ;;  %v2960_v56 = vrot.slane %v2869_v27, %v5121_v8  ;;  %v2610_v60 = vmul.f32 %v2493_v52, %v5991_v10  ;;  %v2612_v32 = vmul.f32 %v2493_v52, %v6000_v4 }
 0x13d   : > { %3147 = vmatprep.subr.bf16.mxu1 %v3116_v50  ;;  %2686 = vmatprep.subr.bf16.mxu0 %v2655_v3  ;;  %v2956_v47 = vrot.slane %v2869_v27, %v5105_v6  ;;  %v2505_v14 = vrot.slane %v2408_v15, %v5121_v8  ;;  %v2871_v21 = vcombine.high %v2861_v38, %v2861_v38  ;;  %v6290_v46 = vand.u32 2147483647, %v3205_v18 }
 0x13e   : > { %v3074_v33 = vmul.f32 %v2960_v56, %v6050_v26  ;;  %v3076_v39 = vmul.f32 %v2960_v56, %v6055_v2  ;;  %v2654_v44 = vpack.c.bf16 %v2612_v32, %v2610_v60  ;;  %v2501_v53 = vrot.slane %v2408_v15, %v5105_v6 }
 0x13f   : > { %3148 = vmatpush1.bf16.msra.mxu1 %v3115_v5  ;;  %v3073_v57 = vmul.f32 %v2956_v47, %v6045_v23  ;;  %v3075_v16 = vmul.f32 %v2956_v47, %v6052_v62  ;;  %v2615_v30 = vmul.f32 %v2505_v14, %v5996_v42  ;;  %v2617_v38 = vmul.f32 %v2505_v14, %v6002_v28 }
 0x140   : > { %v3118_v17 = vpack.c.bf16 %v3076_v39, %v3074_v33  ;;  %2687 = vmatpush1.bf16.msra.mxu0 %v2654_v44  ;;  %v2968_v18 = vrot.slane %v2871_v21, %v5121_v8  ;;  %v2614_v37 = vmul.f32 %v2501_v53, %v5991_v10  ;;  %v2616_v29 = vmul.f32 %v2501_v53, %v6000_v4 }
 0x141   : > { %v3117_v27 = vpack.c.bf16 %v3075_v16, %v3073_v57  ;;  %v2657_v52 = vpack.c.bf16 %v2617_v38, %v2615_v30  ;;  %v2964_v50 = vrot.slane %v2871_v21, %v5105_v6  ;;  %v2619_v3 = vmul.f32 %v6240_v35, %v5996_v42 }
 0x142   : > { %3149 = vmatprep.subr.bf16.mxu1 %v3118_v17  ;;  %v3078_v15 = vmul.f32 %v2968_v18, %v6050_v26  ;;  %v3080_v5 = vmul.f32 %v2968_v18, %v6055_v2  ;;  %v2656_v56 = vpack.c.bf16 %v2616_v29, %v2614_v37  ;;  %v2621_v60 = vmul.f32 %v6240_v35, %v6002_v28 }
 0x143   : > { %3150 = vmatpush1.bf16.msra.mxu1 %v3117_v27  ;;  %2688 = vmatprep.subr.bf16.mxu0 %v2657_v52  ;;  %v3077_v32 = vmul.f32 %v2964_v50, %v6045_v23  ;;  %v3079_v47 = vmul.f32 %v2964_v50, %v6052_v62  ;;  %v2854_v14 = vrot.slane %v6243_v20, %v5140_v13  ;;  %v6316_v21 = vand.u32 2147483647, %v3206_v31 }
 0x144   : > { %v3120_v33 = vpack.c.bf16 %v3080_v5, %v3078_v15  ;;  %2689 = vmatpush1.bf16.msra.mxu0 %v2656_v56  ;;  %v2659_v39 = vpack.c.bf16 %v2621_v60, %v2619_v3  ;;  %v2618_v35 = vmul.f32 %v6247_v45, %v5991_v10  ;;  %v2620_v44 = vmul.f32 %v6247_v45, %v6000_v4 }
 0x145   : > { %v3119_v53 = vpack.c.bf16 %v3079_v47, %v3077_v32  ;;  %v2976_v57 = vrot.slane %v2854_v14, %v5121_v8  ;;  %v2972_v16 = vrot.slane %v2854_v14, %v5105_v6  ;;  %v2405_v48 = vrot.slane %v2377_v59, %v5140_v13 }
 0x146   : > { %3151 = vmatprep.subr.bf16.mxu1 %v3120_v33  ;;  %2690 = vmatprep.subr.bf16.mxu0 %v2659_v39  ;;  %v2658_v31 = vpack.c.bf16 %v2620_v44, %v2618_v35  ;;  %v2840_v30 = vcombine.high %v6243_v20, %v6243_v20  ;;  %v2407_v38 = vcombine.high %v6226_v63, %v6226_v63  ;;  %v6335_v45 = vand.u32 2147483647, %v3207_v22 }
 0x147   : > { %3152 = vmatpush1.bf16.msra.mxu1 %v3119_v53  ;;  %v3082_v17 = vmul.f32 %v2976_v57, %v6050_v26  ;;  %v3084_v36 = vmul.f32 %v2976_v57, %v6055_v2  ;;  %v3081_v59 = vmul.f32 %v2972_v16, %v6045_v23  ;;  %v3083_v18 = vmul.f32 %v2972_v16, %v6052_v62 }
 0x148   : > { %2691 = vmatpush1.bf16.msra.mxu0 %v2658_v31  ;;  %v2521_v20 = vrot.slane %v2405_v48, %v5121_v8  ;;  %v2868_v37 = vrot.slane %v2840_v30, %v5140_v13  ;;  %v2517_v63 = vrot.slane %v2405_v48, %v5105_v6  ;;  %v2529_v54 = vrot.slane %v2407_v38, %v5121_v8 }
 0x149   : > { %v3122_v22 = vpack.c.bf16 %v3084_v36, %v3082_v17  ;;  %v3121_v29 = vpack.c.bf16 %v3083_v18, %v3081_v59  ;;  %v2870_v27 = vcombine.high %v2854_v14, %v2854_v14  ;;  %v2525_v52 = vrot.slane %v2407_v38, %v5105_v6 }
 0x14a   : > { %v2623_v50 = vmul.f32 %v2521_v20, %v5996_v42  ;;  %v2625_v3 = vmul.f32 %v2521_v20, %v6002_v28  ;;  %v2984_v15 = vrot.slane %v2868_v37, %v5121_v8  ;;  %v2622_v5 = vmul.f32 %v2517_v63, %v5991_v10 }
 0x14b   : > { %3153 = vmatprep.subr.bf16.mxu1 %v3122_v22  ;;  %v2624_v56 = vmul.f32 %v2517_v63, %v6000_v4  ;;  %v2980_v60 = vrot.slane %v2868_v37, %v5105_v6  ;;  %v2627_v32 = vmul.f32 %v2529_v54, %v5996_v42  ;;  %v2629_v47 = vmul.f32 %v2529_v54, %v6002_v28 }
 0x14c   : > { %3154 = vmatpush1.bf16.msra.mxu1 %v3121_v29  ;;  %v2661_v14 = vpack.c.bf16 %v2625_v3, %v2623_v50  ;;  %v3086_v33 = vmul.f32 %v2984_v15, %v6050_v26  ;;  %v3088_v39 = vmul.f32 %v2984_v15, %v6055_v2  ;;  %v2992_v35 = vrot.slane %v2870_v27, %v5121_v8 }
 0x14d   : > { %v2660_v44 = vpack.c.bf16 %v2624_v56, %v2622_v5  ;;  %v3085_v53 = vmul.f32 %v2980_v60, %v6045_v23  ;;  %v3087_v57 = vmul.f32 %v2980_v60, %v6052_v62  ;;  %v2663_v16 = vpack.c.bf16 %v2629_v47, %v2627_v32 }
 0x14e   : > { %2692 = vmatprep.subr.bf16.mxu0 %v2661_v14  ;;  %v3124_v31 = vpack.c.bf16 %v3088_v39, %v3086_v33  ;;  %v3090_v30 = vmul.f32 %v2992_v35, %v6050_v26  ;;  %v3092_v38 = vmul.f32 %v2992_v35, %v6055_v2  ;;  %v2626_v17 = vmul.f32 %v2525_v52, %v5991_v10 }
 0x14f   : > { %2693 = vmatpush1.bf16.msra.mxu0 %v2660_v44  ;;  %v3123_v36 = vpack.c.bf16 %v3087_v57, %v3085_v53  ;;  %v2628_v59 = vmul.f32 %v2525_v52, %v6000_v4  ;;  %v2988_v18 = vrot.slane %v2870_v27, %v5105_v6  ;;  %v2409_v20 = vcombine.high %v2405_v48, %v2405_v48 }
 0x150   : > { %3155 = vmatprep.subr.bf16.mxu1 %v3124_v31  ;;  %2694 = vmatprep.subr.bf16.mxu0 %v2663_v16  ;;  %v3126_v63 = vpack.c.bf16 %v3092_v38, %v3090_v30  ;;  %v2872_v54 = vcombine.high %v2868_v37, %v2868_v37  ;;  %v3212_v22 = vsub.f32 1.0, %v6280_v1  ;;  %v3213_v29 = vsub.f32 1.0, %v6290_v46  ;;  %v4921_v16 = vld [vmem:[%s5126_s27 + $0x8] sm:$0xff] }
 0x151   : > { %3156 = vmatpush1.bf16.msra.mxu1 %v3123_v36  ;;  %v2662_v50 = vpack.c.bf16 %v2628_v59, %v2626_v17  ;;  %v3089_v3 = vmul.f32 %v2988_v18, %v6045_v23  ;;  %v3091_v15 = vmul.f32 %v2988_v18, %v6052_v62  ;;  %v2537_v5 = vrot.slane %v2409_v20, %v5121_v8 }
 0x152   : > { %3157 = vmatprep.subr.bf16.mxu1 %v3126_v63  ;;  %v3000_v27 = vrot.slane %v2872_v54, %v5121_v8  ;;  %v2533_v48 = vrot.slane %v2409_v20, %v5105_v6  ;;  %v2996_v52 = vrot.slane %v2872_v54, %v5105_v6  ;;  %v3214_v37 = vsub.f32 1.0, %v6316_v21 }
 0x153   : > { %2695 = vmatpush1.bf16.msra.mxu0 %v2662_v50  ;;  %v3125_v1 = vpack.c.bf16 %v3091_v15, %v3089_v3  ;;  %v2631_v46 = vmul.f32 %v2537_v5, %v5996_v42  ;;  %v2633_v56 = vmul.f32 %v2537_v5, %v6002_v28  ;;  %v3215_v60 = vsub.f32 1.0, %v6335_v45 }
 0x154   : > { %v3094_v32 = vmul.f32 %v3000_v27, %v6050_v26  ;;  %v3096_v47 = vmul.f32 %v3000_v27, %v6055_v2  ;;  %v2630_v14 = vmul.f32 %v2533_v48, %v5991_v10  ;;  %v2632_v33 = vmul.f32 %v2533_v48, %v6000_v4  ;;  %v4920_v2 = vld [vmem:[%s5126_s27] sm:$0xff] }
 0x155   : > { %3158 = vmatpush1.bf16.msra.mxu1 %v3125_v1  ;;  %v2665_v21 = vpack.c.bf16 %v2633_v56, %v2631_v46  ;;  %v3093_v39 = vmul.f32 %v2996_v52, %v6045_v23  ;;  %v3095_v42 = vmul.f32 %v2996_v52, %v6052_v62  ;;  %v3216_v35 = vmax.f32 %v3212_v22, 0.0 }
 0x156   : > { %v3128_v28 = vpack.c.bf16 %v3096_v47, %v3094_v32  ;;  %v2664_v44 = vpack.c.bf16 %v2632_v33, %v2630_v14  ;;  %v3217_v45 = vmax.f32 %v3213_v29, 0.0  ;;  %v3218_v53 = vmax.f32 %v3214_v37, 0.0 }
 0x157   : > { %2696 = vmatprep.subr.bf16.mxu0 %v2665_v21  ;;  %v3127_v26 = vpack.c.bf16 %v3095_v42, %v3093_v39  ;;  %v3219_v57 = vmax.f32 %v3215_v60, 0.0  ;;  %v3223_v10 = vrot.slane %v4920_v2, %v6150_v49  ;;  %v3227_v4 = vrot.slane %v4921_v16, %v6150_v49 }
 0x158   : > { %3159 = vmatprep.subr.bf16.mxu1 %v3128_v28  ;;  %2697 = vmatpush1.bf16.msra.mxu0 %v2664_v44  ;;  %v3236_v23 = vcombine.low %v6230_v43, %v6232_v24  ;;  %v6390_v62 = vrot.slane %v6180_v11, %v6165_v40  ;;  %v6394_v31 = vrot.slane %v6187_v51, %v6165_v40 }
 0x159   : > { %3160 = vmatpush1.bf16.msra.mxu1 %v3127_v26  ;;  %v6396_v30 = vmul.f32 %v3223_v10, %v3216_v35  ;;  %v6398_v38 = vmul.f32 %v3227_v4, %v3217_v45  ;;  %v6400_v17 = vmul.f32 %v3223_v10, %v3218_v53  ;;  %v6402_v49 = vmul.f32 %v3227_v4, %v3219_v57 }
 0x15a   : > { %v3244_v36 = vrot.slane %v3236_v23, %v5140_v13  ;;  %v3643_v59 = vsub.f32 %v5118_v7, %v6390_v62  ;;  %v3644_v11 = vsub.f32 %v5118_v7, %v6394_v31  ;;  %v3662_v51 = vrot.slane %v6198_v55, %v6165_v40 }
 0x15b   : > { %2699 = vmatmul.mubr.bf16.vlgmr.msra.gmra.mrb[8].mxu0 %v5387_v25  ;;  %v3666_v18 = vrot.slane %v6205_v9, %v6165_v40  ;;  %v3686_v20 = vrot.slane %v4920_v2, %v6165_v40  ;;  %v3690_v63 = vrot.slane %v4921_v16, %v6165_v40  ;;  %v3237_v54 = vcombine.high %v6230_v43, %v6232_v24 }
 0x15c   : > { %3162 = vmatmul.mubr.bf16.vlgmr.msra.gmra.mrb[8].mxu1 %v5387_v25  ;;  %v3260_v22 = vrot.slane %v3244_v36, %v5140_v13  ;;  %v3647_v29 = vand.u32 2147483647, %v3643_v59  ;;  %v3648_v50 = vand.u32 2147483647, %v3644_v11  ;;  %v3667_v55 = vsub.f32 %v5118_v7, %v3662_v51  ;;  %3624 = vmatprep.mubr.bf16.mxu0 %v5385_v41 }
 0x15d   : > { %v3668_v3 = vsub.f32 %v5118_v7, %v3666_v18  ;;  %v3669_v9 = vsub.f32 %v5137_v12, %v3662_v51  ;;  %v3670_v15 = vsub.f32 %v5137_v12, %v3666_v18  ;;  %v3252_v40 = vcombine.high %v3244_v36, %v3244_v36  ;;  %4087 = vmatprep.mubr.bf16.mxu1 %v5385_v41 }
 0x15e   : > { %v3343_v43 = vrot.slane %v3260_v22, %v5121_v8  ;;  %v3651_v24 = vsub.f32 1.0, %v3647_v29  ;;  %v3652_v5 = vsub.f32 1.0, %v3648_v50  ;;  %v3671_v27 = vand.u32 2147483647, %v3667_v55 }
 0x15f   : > { %v3672_v48 = vand.u32 2147483647, %v3668_v3  ;;  %v3673_v52 = vand.u32 2147483647, %v3669_v9  ;;  %v3674_v37 = vand.u32 2147483647, %v3670_v15  ;;  %v3339_v1 = vrot.slane %v3260_v22, %v5105_v6 }
 0x160   : > { %v3497_v46 = vmul.f32 %v3343_v43, %v6398_v38  ;;  %v3499_v56 = vmul.f32 %v3343_v43, %v6402_v49  ;;  %v6430_v60 = vmax.f32 %v3651_v24, 0.0  ;;  %v6432_v32 = vmax.f32 %v3652_v5, 0.0 }
 0x161   : > { %v3675_v47 = vsub.f32 1.0, %v3671_v27  ;;  %v3676_v14 = vsub.f32 1.0, %v3672_v48  ;;  %v3677_v33 = vsub.f32 1.0, %v3673_v52  ;;  %v3678_v21 = vsub.f32 1.0, %v3674_v37 }
 0x162   : > { %v3561_v39 = vpack.c.bf16 %v3499_v56, %v3497_v46  ;;  %v3699_v42 = vcombine.low %v6430_v60, %v6432_v32  ;;  %v3496_v35 = vmul.f32 %v3339_v1, %v6396_v30  ;;  %v3498_v28 = vmul.f32 %v3339_v1, %v6400_v17 }
 0x163   : > { %v3679_v44 = vmax.f32 %v3675_v47, 0.0  ;;  %v3680_v45 = vmax.f32 %v3676_v14, 0.0  ;;  %v3681_v53 = vmax.f32 %v3677_v33, 0.0  ;;  %v3682_v26 = vmax.f32 %v3678_v21, 0.0 }
 0x164   : > { %3592 = vmatprep.subr.bf16.mxu0 %v3561_v39  ;;  %v3707_v57 = vrot.slane %v3699_v42, %v5140_v13  ;;  %v3560_v2 = vpack.c.bf16 %v3498_v28, %v3496_v35  ;;  %v3274_v10 = vrot.slane %v3252_v40, %v5140_v13  ;;  %v3282_v16 = vcombine.high %v3260_v22, %v3260_v22  ;;  %v6448_v11 = vpop.f32.mrb[0].mxu0 }
 0x165   : > { %v6440_v4 = vmul.f32 %v3686_v20, %v3679_v44  ;;  %v6442_v23 = vmul.f32 %v3690_v63, %v3680_v45  ;;  %v6444_v36 = vmul.f32 %v3686_v20, %v3681_v53  ;;  %v6446_v59 = vmul.f32 %v3690_v63, %v3682_v26  ;;  %v6453_v55 = vpop.f32.mrb[1].mxu0 }
 0x166   : > { %v3723_v51 = vrot.slane %v3707_v57, %v5140_v13  ;;  %3593 = vmatpush1.bf16.msra.mxu0 %v3560_v2  ;;  %v3351_v18 = vrot.slane %v3274_v10, %v5121_v8  ;;  %v3715_v29 = vcombine.high %v3707_v57, %v3707_v57  ;;  %v3347_v50 = vrot.slane %v3274_v10, %v5105_v6  ;;  %v6460_v9 = vpop.f32.mrb[0].mxu1  ;;  %v852_v15 = vpop.f32.mrb[2].mxu0 }
 0x167   : > { %v3359_v22 = vrot.slane %v3282_v16, %v5121_v8  ;;  %v3355_v3 = vrot.slane %v3282_v16, %v5105_v6  ;;  %v3284_v20 = vcombine.high %v3274_v10, %v3274_v10  ;;  %v6458_v63 = vrot.slane %v3237_v54, %v5140_v13  ;;  %v6466_v27 = vpop.f32.mrb[1].mxu1  ;;  %v853_v48 = vpop.f32.mrb[3].mxu0 }
 0x168   : > { %v3806_v40 = vrot.slane %v3723_v51, %v5121_v8  ;;  %v3802_v43 = vrot.slane %v3723_v51, %v5105_v6  ;;  %v3501_v24 = vmul.f32 %v3351_v18, %v6398_v38  ;;  %v3503_v5 = vmul.f32 %v3351_v18, %v6402_v49  ;;  %v1315_v46 = vpop.f32.mrb[2].mxu1 }
 0x169   : > { %v3737_v52 = vrot.slane %v3715_v29, %v5140_v13  ;;  %v3500_v37 = vmul.f32 %v3347_v50, %v6396_v30  ;;  %v3502_v54 = vmul.f32 %v3347_v50, %v6400_v17  ;;  %v3505_v1 = vmul.f32 %v3359_v22, %v6398_v38  ;;  %v1316_v21 = vpop.f32.mrb[3].mxu1 }
 0x16a   : > { %v3960_v56 = vmul.f32 %v3806_v40, %v6442_v23  ;;  %v3962_v47 = vmul.f32 %v3806_v40, %v6446_v59  ;;  %v3959_v14 = vmul.f32 %v3802_v43, %v6440_v4  ;;  %v3961_v33 = vmul.f32 %v3802_v43, %v6444_v36 }
 0x16b   : > { %v3563_v39 = vpack.c.bf16 %v3503_v5, %v3501_v24  ;;  %v3814_v42 = vrot.slane %v3737_v52, %v5121_v8  ;;  %v3562_v35 = vpack.c.bf16 %v3502_v54, %v3500_v37  ;;  %v3810_v28 = vrot.slane %v3737_v52, %v5105_v6 }
 0x16c   : > { %v4024_v44 = vpack.c.bf16 %v3962_v47, %v3960_v56  ;;  %v4023_v45 = vpack.c.bf16 %v3961_v33, %v3959_v14  ;;  %v3507_v53 = vmul.f32 %v3359_v22, %v6402_v49  ;;  %v3745_v26 = vcombine.high %v3723_v51, %v3723_v51 }
 0x16d   : > { %3594 = vmatprep.subr.bf16.mxu0 %v3563_v39  ;;  %v3964_v57 = vmul.f32 %v3814_v42, %v6442_v23  ;;  %v3966_v2 = vmul.f32 %v3814_v42, %v6446_v59  ;;  %v3963_v10 = vmul.f32 %v3810_v28, %v6440_v4  ;;  %v3965_v16 = vmul.f32 %v3810_v28, %v6444_v36 }
 0x16e   : > { %4055 = vmatprep.subr.bf16.mxu1 %v4024_v44  ;;  %3595 = vmatpush1.bf16.msra.mxu0 %v3562_v35  ;;  %v3565_v18 = vpack.c.bf16 %v3507_v53, %v3505_v1  ;;  %v3822_v29 = vrot.slane %v3745_v26, %v5121_v8  ;;  %v3504_v50 = vmul.f32 %v3355_v3, %v6396_v30 }
 0x16f   : > { %4056 = vmatpush1.bf16.msra.mxu1 %v4023_v45  ;;  %v4026_v15 = vpack.c.bf16 %v3966_v2, %v3964_v57  ;;  %v4025_v22 = vpack.c.bf16 %v3965_v16, %v3963_v10  ;;  %v3506_v51 = vmul.f32 %v3355_v3, %v6400_v17  ;;  %v3818_v40 = vrot.slane %v3745_v26, %v5105_v6 }
 0x170   : > { %3596 = vmatprep.subr.bf16.mxu0 %v3565_v18  ;;  %v3968_v43 = vmul.f32 %v3822_v29, %v6442_v23  ;;  %v3970_v24 = vmul.f32 %v3822_v29, %v6446_v59  ;;  %v3367_v5 = vrot.slane %v3284_v20, %v5121_v8  ;;  %v3747_v48 = vcombine.high %v3737_v52, %v3737_v52 }
 0x171   : > { %4057 = vmatprep.subr.bf16.mxu1 %v4026_v15  ;;  %v3564_v37 = vpack.c.bf16 %v3506_v51, %v3504_v50  ;;  %v3967_v54 = vmul.f32 %v3818_v40, %v6440_v4  ;;  %v3969_v1 = vmul.f32 %v3818_v40, %v6444_v36  ;;  %v3363_v46 = vrot.slane %v3284_v20, %v5105_v6 }
 0x172   : > { %v4028_v56 = vpack.c.bf16 %v3970_v24, %v3968_v43  ;;  %v3509_v3 = vmul.f32 %v3367_v5, %v6398_v38  ;;  %v3511_v47 = vmul.f32 %v3367_v5, %v6402_v49  ;;  %v3830_v14 = vrot.slane %v3747_v48, %v5121_v8 }
 0x173   : > { %4058 = vmatpush1.bf16.msra.mxu1 %v4025_v22  ;;  %3597 = vmatpush1.bf16.msra.mxu0 %v3564_v37  ;;  %v4027_v33 = vpack.c.bf16 %v3969_v1, %v3967_v54  ;;  %v3508_v52 = vmul.f32 %v3363_v46, %v6396_v30  ;;  %v3510_v21 = vmul.f32 %v3363_v46, %v6400_v17 }
 0x174   : > { %4059 = vmatprep.subr.bf16.mxu1 %v4028_v56  ;;  %v3567_v39 = vpack.c.bf16 %v3511_v47, %v3509_v3  ;;  %v3972_v42 = vmul.f32 %v3830_v14, %v6442_v23  ;;  %v3974_v20 = vmul.f32 %v3830_v14, %v6446_v59  ;;  %v3826_v35 = vrot.slane %v3747_v48, %v5105_v6 }
 0x175   : > { %v3566_v28 = vpack.c.bf16 %v3510_v21, %v3508_v52  ;;  %v3267_v44 = vrot.slane %v6458_v63, %v5140_v13  ;;  %v3700_v45 = vcombine.high %v6430_v60, %v6432_v32  ;;  %v3253_v53 = vcombine.high %v6458_v63, %v6458_v63 }
 0x176   : > { %3598 = vmatprep.subr.bf16.mxu0 %v3567_v39  ;;  %v4030_v26 = vpack.c.bf16 %v3974_v20, %v3972_v42  ;;  %v3971_v57 = vmul.f32 %v3826_v35, %v6440_v4  ;;  %v3973_v2 = vmul.f32 %v3826_v35, %v6444_v36  ;;  %v3182_v10 = vsub.f32 %v5137_v12, %v6184_v34 }
 0x177   : > { %4060 = vmatpush1.bf16.msra.mxu1 %v4027_v33  ;;  %3599 = vmatpush1.bf16.msra.mxu0 %v3566_v28  ;;  %v3375_v16 = vrot.slane %v3267_v44, %v5121_v8  ;;  %v3714_v18 = vrot.slane %v3700_v45, %v5140_v13  ;;  %v3371_v60 = vrot.slane %v3267_v44, %v5105_v6 }
 0x178   : > { %4061 = vmatprep.subr.bf16.mxu1 %v4030_v26  ;;  %v4029_v32 = vpack.c.bf16 %v3973_v2, %v3971_v57  ;;  %v3281_v63 = vrot.slane %v3253_v53, %v5140_v13  ;;  %v3283_v29 = vcombine.high %v3267_v44, %v3267_v44  ;;  %v3183_v50 = vsub.f32 %v5137_v12, %v6191_v0 }
 0x179   : > { %v3513_v15 = vmul.f32 %v3375_v16, %v6398_v38  ;;  %v3515_v34 = vmul.f32 %v3375_v16, %v6402_v49  ;;  %v3730_v22 = vrot.slane %v3714_v18, %v5140_v13  ;;  %v3512_v51 = vmul.f32 %v3371_v60, %v6396_v30 }
 0x17a   : > { %v3514_v40 = vmul.f32 %v3371_v60, %v6400_v17  ;;  %v3383_v43 = vrot.slane %v3281_v63, %v5121_v8  ;;  %v3716_v24 = vcombine.high %v3714_v18, %v3714_v18  ;;  %v3379_v5 = vrot.slane %v3281_v63, %v5105_v6 }
 0x17b   : > { %4062 = vmatpush1.bf16.msra.mxu1 %v4029_v32  ;;  %v3569_v48 = vpack.c.bf16 %v3515_v34, %v3513_v15  ;;  %v3838_v37 = vrot.slane %v3730_v22, %v5121_v8  ;;  %v3834_v0 = vrot.slane %v3730_v22, %v5105_v6  ;;  %v3391_v54 = vrot.slane %v3283_v29, %v5121_v8 }
 0x17c   : > { %v3568_v1 = vpack.c.bf16 %v3514_v40, %v3512_v51  ;;  %v3517_v46 = vmul.f32 %v3383_v43, %v6398_v38  ;;  %v3519_v56 = vmul.f32 %v3383_v43, %v6402_v49  ;;  %v3744_v3 = vrot.slane %v3716_v24, %v5140_v13 }
 0x17d   : > { %3600 = vmatprep.subr.bf16.mxu0 %v3569_v48  ;;  %v3976_v47 = vmul.f32 %v3838_v37, %v6442_v23  ;;  %v3978_v14 = vmul.f32 %v3838_v37, %v6446_v59  ;;  %v3975_v33 = vmul.f32 %v3834_v0, %v6440_v4  ;;  %v3977_v52 = vmul.f32 %v3834_v0, %v6444_v36 }
 0x17e   : > { %3601 = vmatpush1.bf16.msra.mxu0 %v3568_v1  ;;  %v3571_v21 = vpack.c.bf16 %v3519_v56, %v3517_v46  ;;  %v3846_v39 = vrot.slane %v3744_v3, %v5121_v8  ;;  %v3516_v42 = vmul.f32 %v3379_v5, %v6396_v30  ;;  %v3518_v20 = vmul.f32 %v3379_v5, %v6400_v17 }
 0x17f   : > { %v4032_v35 = vpack.c.bf16 %v3978_v14, %v3976_v47  ;;  %v4031_v28 = vpack.c.bf16 %v3977_v52, %v3975_v33  ;;  %v3842_v44 = vrot.slane %v3744_v3, %v5105_v6  ;;  %v3521_v45 = vmul.f32 %v3391_v54, %v6398_v38 }
 0x180   : > { %3602 = vmatprep.subr.bf16.mxu0 %v3571_v21  ;;  %v3980_v53 = vmul.f32 %v3846_v39, %v6442_v23  ;;  %v3982_v26 = vmul.f32 %v3846_v39, %v6446_v59  ;;  %v3570_v57 = vpack.c.bf16 %v3518_v20, %v3516_v42  ;;  %v3523_v2 = vmul.f32 %v3391_v54, %v6402_v49 }
 0x181   : > { %4063 = vmatprep.subr.bf16.mxu1 %v4032_v35  ;;  %v3979_v16 = vmul.f32 %v3842_v44, %v6440_v4  ;;  %v3981_v18 = vmul.f32 %v3842_v44, %v6444_v36  ;;  %v3746_v60 = vcombine.high %v3730_v22, %v3730_v22  ;;  %v3387_v32 = vrot.slane %v3283_v29, %v5105_v6  ;;  %v4818_v35 = vld [vmem:[%s5110_s15 + $0x10] ss:$0 sm:$0xff] }
 0x182   : > { %4064 = vmatpush1.bf16.msra.mxu1 %v4031_v28  ;;  %v4034_v15 = vpack.c.bf16 %v3982_v26, %v3980_v53  ;;  %3603 = vmatpush1.bf16.msra.mxu0 %v3570_v57  ;;  %v3573_v34 = vpack.c.bf16 %v3523_v2, %v3521_v45  ;;  %v3285_v51 = vcombine.high %v3281_v63, %v3281_v63  ;;  %v3186_v40 = vand.u32 2147483647, %v3182_v10  ;;  %v4819_v26 = vld [vmem:[%s5110_s15 + $0x18] ss:$0 sm:$0xff] }
 0x183   : > { %v4033_v43 = vpack.c.bf16 %v3981_v18, %v3979_v16  ;;  %v3854_v24 = vrot.slane %v3746_v60, %v5121_v8  ;;  %v3520_v5 = vmul.f32 %v3387_v32, %v6396_v30  ;;  %v3522_v48 = vmul.f32 %v3387_v32, %v6400_v17 }
 0x184   : > { %4065 = vmatprep.subr.bf16.mxu1 %v4034_v15  ;;  %3604 = vmatprep.subr.bf16.mxu0 %v3573_v34  ;;  %v3850_v37 = vrot.slane %v3746_v60, %v5105_v6  ;;  %v3399_v22 = vrot.slane %v3285_v51, %v5121_v8  ;;  %v3748_v29 = vcombine.high %v3744_v3, %v3744_v3  ;;  %v3187_v0 = vand.u32 2147483647, %v3183_v50 }
 0x185   : > { %v3984_v54 = vmul.f32 %v3854_v24, %v6442_v23  ;;  %v3986_v63 = vmul.f32 %v3854_v24, %v6446_v59  ;;  %v3572_v10 = vpack.c.bf16 %v3522_v48, %v3520_v5  ;;  %v3395_v1 = vrot.slane %v3285_v51, %v5105_v6 }
 0x186   : > { %4066 = vmatpush1.bf16.msra.mxu1 %v4033_v43  ;;  %v3983_v46 = vmul.f32 %v3850_v37, %v6440_v4  ;;  %v3985_v56 = vmul.f32 %v3850_v37, %v6444_v36  ;;  %v3525_v47 = vmul.f32 %v3399_v22, %v6398_v38  ;;  %v3527_v14 = vmul.f32 %v3399_v22, %v6402_v49 }
 0x187   : > { %v4036_v3 = vpack.c.bf16 %v3986_v63, %v3984_v54  ;;  %3605 = vmatpush1.bf16.msra.mxu0 %v3572_v10  ;;  %v3862_v50 = vrot.slane %v3748_v29, %v5121_v8  ;;  %v3524_v33 = vmul.f32 %v3395_v1, %v6396_v30  ;;  %v3526_v52 = vmul.f32 %v3395_v1, %v6400_v17 }
 0x188   : > { %v4035_v21 = vpack.c.bf16 %v3985_v56, %v3983_v46  ;;  %v3575_v39 = vpack.c.bf16 %v3527_v14, %v3525_v47  ;;  %v3858_v42 = vrot.slane %v3748_v29, %v5105_v6  ;;  %v3190_v20 = vsub.f32 1.0, %v3186_v40 }
 0x189   : > { %4067 = vmatprep.subr.bf16.mxu1 %v4036_v3  ;;  %v3988_v28 = vmul.f32 %v3862_v50, %v6442_v23  ;;  %v3990_v44 = vmul.f32 %v3862_v50, %v6446_v59  ;;  %v3574_v45 = vpack.c.bf16 %v3526_v52, %v3524_v33  ;;  %v3191_v53 = vsub.f32 1.0, %v3187_v0 }
 0x18a   : > { %4068 = vmatpush1.bf16.msra.mxu1 %v4035_v21  ;;  %3606 = vmatprep.subr.bf16.mxu0 %v3575_v39  ;;  %v3987_v57 = vmul.f32 %v3858_v42, %v6440_v4  ;;  %v3989_v2 = vmul.f32 %v3858_v42, %v6444_v36  ;;  %v3194_v16 = vmax.f32 %v3190_v20, 0.0  ;;  %v3645_v18 = vsub.f32 %v5137_v12, %v6390_v62 }
 0x18b   : > { %v4038_v60 = vpack.c.bf16 %v3990_v44, %v3988_v28  ;;  %3607 = vmatpush1.bf16.msra.mxu0 %v3574_v45  ;;  %v3195_v32 = vmax.f32 %v3191_v53, 0.0  ;;  %v3646_v15 = vsub.f32 %v5137_v12, %v6394_v31  ;;  %v4106_v34 = vsub.f32 %v5118_v7, %v4818_v35 }
 0x18c   : > { %v4037_v51 = vpack.c.bf16 %v3989_v2, %v3987_v57  ;;  %v3649_v40 = vand.u32 2147483647, %v3645_v18  ;;  %v4107_v43 = vsub.f32 %v5118_v7, %v4819_v26  ;;  %v4837_v24 = vpack.c.bf16 %v6460_v9, %v6448_v11 }
 0x18d   : > { %4069 = vmatprep.subr.bf16.mxu1 %v4038_v60  ;;  %v3286_v5 = vcombine.low %v3194_v16, %v3195_v32  ;;  %v3650_v48 = vand.u32 2147483647, %v3646_v15  ;;  %v3287_v37 = vcombine.high %v3194_v16, %v3195_v32  ;;  %v4110_v62 = vand.u32 2147483647, %v4106_v34 }
 0x18e   : > { %4070 = vmatpush1.bf16.msra.mxu1 %v4037_v51  ;;  %v3653_v22 = vsub.f32 1.0, %v3649_v40  ;;  %v4111_v29 = vand.u32 2147483647, %v4107_v43  ;;  %v4835_v31 = vpack.c.bf16 %v6466_v27, %v6453_v55  ;;  %v4108_v0 = vsub.f32 %v5137_v12, %v4818_v35 }
 0x18f   : > { %v3294_v54 = vrot.slane %v3286_v5, %v5140_v13  ;;  %v3654_v63 = vsub.f32 1.0, %v3650_v48  ;;  %v6580_v7 = vrot.slane %v3287_v37, %v5140_v13  ;;  %v4114_v10 = vsub.f32 1.0, %v4110_v62 }
 0x190   : > { %v6582_v1 = vmax.f32 %v3653_v22, 0.0  ;;  %v4115_v46 = vsub.f32 1.0, %v4111_v29  ;;  %v4109_v56 = vsub.f32 %v5137_v12, %v4819_v26  ;;  %v6585_v47 = vand.u32 2147483647, %v4108_v0 }
 0x191   : > { %v3310_v14 = vrot.slane %v3294_v54, %v5140_v13  ;;  %v6588_v3 = vmax.f32 %v3654_v63, 0.0  ;;  %v3302_v50 = vcombine.high %v3294_v54, %v3294_v54  ;;  %v6592_v33 = vrot.slane %v6580_v7, %v5140_v13 }
 0x192   : > { %v3303_v52 = vcombine.high %v6580_v7, %v6580_v7  ;;  %v6596_v21 = vmax.f32 %v4114_v10, 0.0  ;;  %v6598_v39 = vmax.f32 %v4115_v46, 0.0  ;;  %v6600_v42 = vand.u32 2147483647, %v4109_v56 }
 0x193   : > { %v3407_v12 = vrot.slane %v3310_v14, %v5121_v8  ;;  %v3749_v20 = vcombine.low %v6582_v1, %v6588_v3  ;;  %v3403_v35 = vrot.slane %v3310_v14, %v5105_v6  ;;  %v3324_v28 = vrot.slane %v3302_v50, %v5140_v13 }
 0x194   : > { %v3332_v44 = vcombine.high %v3310_v14, %v3310_v14  ;;  %v6609_v45 = vrot.slane %v6592_v33, %v5121_v8  ;;  %v3750_v53 = vcombine.high %v6582_v1, %v6588_v3  ;;  %v6615_v26 = vrot.slane %v6592_v33, %v5105_v6 }
 0x195   : > { %v3529_v57 = vmul.f32 %v3407_v12, %v6398_v38  ;;  %v3531_v2 = vmul.f32 %v3407_v12, %v6402_v49  ;;  %v3757_v16 = vrot.slane %v3749_v20, %v5140_v13  ;;  %v3528_v18 = vmul.f32 %v3403_v35, %v6396_v30 }
 0x196   : > { %v3530_v60 = vmul.f32 %v3403_v35, %v6400_v17  ;;  %v3415_v32 = vrot.slane %v3324_v28, %v5121_v8  ;;  %v3411_v15 = vrot.slane %v3324_v28, %v5105_v6  ;;  %v3423_v34 = vrot.slane %v3332_v44, %v5121_v8 }
 0x197   : > { %v3577_v51 = vpack.c.bf16 %v3531_v2, %v3529_v57  ;;  %v3773_v40 = vrot.slane %v3757_v16, %v5140_v13  ;;  %v3765_v43 = vcombine.high %v3757_v16, %v3757_v16  ;;  %v3419_v5 = vrot.slane %v3332_v44, %v5105_v6 }
 0x198   : > { %v3576_v48 = vpack.c.bf16 %v3530_v60, %v3528_v18  ;;  %v3533_v37 = vmul.f32 %v3415_v32, %v6398_v38  ;;  %v3535_v62 = vmul.f32 %v3415_v32, %v6402_v49  ;;  %v3532_v22 = vmul.f32 %v3411_v15, %v6396_v30 }
 0x199   : > { %3608 = vmatprep.subr.bf16.mxu0 %v3577_v51  ;;  %v3870_v29 = vrot.slane %v3773_v40, %v5121_v8  ;;  %v3866_v0 = vrot.slane %v3773_v40, %v5105_v6  ;;  %v3787_v54 = vrot.slane %v3765_v43, %v5140_v13  ;;  %v3534_v63 = vmul.f32 %v3411_v15, %v6400_v17 }
 0x19a   : > { %3609 = vmatpush1.bf16.msra.mxu0 %v3576_v48  ;;  %v3579_v10 = vpack.c.bf16 %v3535_v62, %v3533_v37  ;;  %v3537_v46 = vmul.f32 %v3423_v34, %v6398_v38  ;;  %v3539_v56 = vmul.f32 %v3423_v34, %v6402_v49  ;;  %v3795_v14 = vcombine.high %v3773_v40, %v3773_v40 }
 0x19b   : > { %v3992_v50 = vmul.f32 %v3870_v29, %v6442_v23  ;;  %v3994_v12 = vmul.f32 %v3870_v29, %v6446_v59  ;;  %v3991_v20 = vmul.f32 %v3866_v0, %v6440_v4  ;;  %v3993_v35 = vmul.f32 %v3866_v0, %v6444_v36 }
 0x19c   : > { %3610 = vmatprep.subr.bf16.mxu0 %v3579_v10  ;;  %v3878_v44 = vrot.slane %v3787_v54, %v5121_v8  ;;  %v3578_v57 = vpack.c.bf16 %v3534_v63, %v3532_v22  ;;  %v3874_v2 = vrot.slane %v3787_v54, %v5105_v6  ;;  %v3581_v16 = vpack.c.bf16 %v3539_v56, %v3537_v46 }
 0x19d   : > { %v4040_v18 = vpack.c.bf16 %v3994_v12, %v3992_v50  ;;  %v4039_v60 = vpack.c.bf16 %v3993_v35, %v3991_v20  ;;  %v3886_v32 = vrot.slane %v3795_v14, %v5121_v8  ;;  %v3536_v15 = vmul.f32 %v3419_v5, %v6396_v30 }
 0x19e   : > { %v3996_v34 = vmul.f32 %v3878_v44, %v6442_v23  ;;  %v3998_v51 = vmul.f32 %v3878_v44, %v6446_v59  ;;  %3611 = vmatpush1.bf16.msra.mxu0 %v3578_v57  ;;  %v3995_v40 = vmul.f32 %v3874_v2, %v6440_v4  ;;  %v3997_v43 = vmul.f32 %v3874_v2, %v6444_v36 }
 0x19f   : > { %4071 = vmatprep.subr.bf16.mxu1 %v4040_v18  ;;  %3612 = vmatprep.subr.bf16.mxu0 %v3581_v16  ;;  %v4000_v48 = vmul.f32 %v3886_v32, %v6442_v23  ;;  %v4002_v37 = vmul.f32 %v3886_v32, %v6446_v59  ;;  %v3538_v62 = vmul.f32 %v3419_v5, %v6400_v17  ;;  %v4116_v22 = vsub.f32 1.0, %v6585_v47 }
 0x1a0   : > { %4072 = vmatpush1.bf16.msra.mxu1 %v4039_v60  ;;  %v4042_v29 = vpack.c.bf16 %v3998_v51, %v3996_v34  ;;  %v4041_v0 = vpack.c.bf16 %v3997_v43, %v3995_v40  ;;  %v3882_v63 = vrot.slane %v3795_v14, %v5105_v6  ;;  %v3334_v10 = vcombine.high %v3324_v28, %v3324_v28 }
 0x1a1   : > { %v4044_v46 = vpack.c.bf16 %v4002_v37, %v4000_v48  ;;  %v3580_v56 = vpack.c.bf16 %v3538_v62, %v3536_v15  ;;  %v3797_v50 = vcombine.high %v3787_v54, %v3787_v54  ;;  %v3545_v12 = vmul.f32 %v6609_v45, %v6398_v38 }
 0x1a2   : > { %4073 = vmatprep.subr.bf16.mxu1 %v4042_v29  ;;  %v3999_v20 = vmul.f32 %v3882_v63, %v6440_v4  ;;  %v4001_v35 = vmul.f32 %v3882_v63, %v6444_v36  ;;  %v3431_v5 = vrot.slane %v3334_v10, %v5121_v8  ;;  %v3427_v47 = vrot.slane %v3334_v10, %v5105_v6 }
 0x1a3   : > { %3613 = vmatpush1.bf16.msra.mxu0 %v3580_v56  ;;  %v3894_v44 = vrot.slane %v3797_v50, %v5121_v8  ;;  %v3890_v28 = vrot.slane %v3797_v50, %v5105_v6  ;;  %v3547_v54 = vmul.f32 %v6609_v45, %v6402_v49  ;;  %v3764_v14 = vrot.slane %v3750_v53, %v5140_v13 }
 0x1a4   : > { %4074 = vmatpush1.bf16.msra.mxu1 %v4041_v0  ;;  %v4043_v57 = vpack.c.bf16 %v4001_v35, %v3999_v20  ;;  %v3541_v2 = vmul.f32 %v3431_v5, %v6398_v38  ;;  %v3543_v16 = vmul.f32 %v3431_v5, %v6402_v49  ;;  %v3540_v18 = vmul.f32 %v3427_v47, %v6396_v30 }
 0x1a5   : > { %4075 = vmatprep.subr.bf16.mxu1 %v4044_v46  ;;  %v4004_v60 = vmul.f32 %v3894_v44, %v6442_v23  ;;  %v4006_v32 = vmul.f32 %v3894_v44, %v6446_v59  ;;  %v3542_v45 = vmul.f32 %v3427_v47, %v6400_v17  ;;  %v4003_v15 = vmul.f32 %v3890_v28, %v6440_v4 }
 0x1a6   : > { %v3583_v34 = vpack.c.bf16 %v3543_v16, %v3541_v2  ;;  %v4005_v1 = vmul.f32 %v3890_v28, %v6444_v36  ;;  %v3585_v3 = vpack.c.bf16 %v3547_v54, %v3545_v12  ;;  %v3780_v53 = vrot.slane %v3764_v14, %v5140_v13 }
 0x1a7   : > { %v4046_v51 = vpack.c.bf16 %v4006_v32, %v4004_v60  ;;  %v3582_v40 = vpack.c.bf16 %v3542_v45, %v3540_v18  ;;  %v3544_v43 = vmul.f32 %v6615_v26, %v6396_v30  ;;  %v3546_v48 = vmul.f32 %v6615_v26, %v6400_v17 }
 0x1a8   : > { %4076 = vmatpush1.bf16.msra.mxu1 %v4043_v57  ;;  %3614 = vmatprep.subr.bf16.mxu0 %v3583_v34  ;;  %v4045_v37 = vpack.c.bf16 %v4005_v1, %v4003_v15  ;;  %v3902_v62 = vrot.slane %v3780_v53, %v5121_v8  ;;  %v3898_v29 = vrot.slane %v3780_v53, %v5105_v6  ;;  %v4117_v0 = vsub.f32 1.0, %v6600_v42 }
 0x1a9   : > { %4077 = vmatprep.subr.bf16.mxu1 %v4046_v51  ;;  %3615 = vmatpush1.bf16.msra.mxu0 %v3582_v40  ;;  %v3584_v63 = vpack.c.bf16 %v3546_v48, %v3544_v43  ;;  %v3331_v10 = vrot.slane %v3303_v52, %v5140_v13  ;;  %v3766_v46 = vcombine.high %v3764_v14, %v3764_v14  ;;  %v6687_v56 = vmax.f32 %v4116_v22, 0.0 }
 0x1aa   : > { %3616 = vmatprep.subr.bf16.mxu0 %v3585_v3  ;;  %v4008_v26 = vmul.f32 %v3902_v62, %v6442_v23  ;;  %v4010_v50 = vmul.f32 %v3902_v62, %v6446_v59  ;;  %v4007_v12 = vmul.f32 %v3898_v29, %v6440_v4  ;;  %v4009_v20 = vmul.f32 %v3898_v29, %v6444_v36 }
 0x1ab   : > { %v3447_v35 = vrot.slane %v3331_v10, %v5121_v8  ;;  %v3794_v5 = vrot.slane %v3766_v46, %v5140_v13  ;;  %v3443_v47 = vrot.slane %v3331_v10, %v5105_v6  ;;  %v3333_v7 = vcombine.high %v6592_v33, %v6592_v33 }
 0x1ac   : > { %4078 = vmatpush1.bf16.msra.mxu1 %v4045_v37  ;;  %v4048_v52 = vpack.c.bf16 %v4010_v50, %v4008_v26  ;;  %v4047_v22 = vpack.c.bf16 %v4009_v20, %v4007_v12  ;;  %v3796_v44 = vcombine.high %v3780_v53, %v3780_v53  ;;  %v3335_v28 = vcombine.high %v3331_v10, %v3331_v10 }
 0x1ad   : > { %3617 = vmatpush1.bf16.msra.mxu0 %v3584_v63  ;;  %v3549_v54 = vmul.f32 %v3447_v35, %v6398_v38  ;;  %v3551_v14 = vmul.f32 %v3447_v35, %v6402_v49  ;;  %v3910_v57 = vrot.slane %v3794_v5, %v5121_v8  ;;  %v3548_v2 = vmul.f32 %v3443_v47, %v6396_v30 }
 0x1ae   : > { %4079 = vmatprep.subr.bf16.mxu1 %v4048_v52  ;;  %v3550_v16 = vmul.f32 %v3443_v47, %v6400_v17  ;;  %v3906_v18 = vrot.slane %v3794_v5, %v5105_v6  ;;  %v3455_v33 = vrot.slane %v3333_v7, %v5121_v8  ;;  %v3918_v60 = vrot.slane %v3796_v44, %v5121_v8 }
 0x1af   : > { %v3587_v32 = vpack.c.bf16 %v3551_v14, %v3549_v54  ;;  %v4012_v45 = vmul.f32 %v3910_v57, %v6442_v23  ;;  %v4014_v15 = vmul.f32 %v3910_v57, %v6446_v59  ;;  %v3451_v34 = vrot.slane %v3333_v7, %v5105_v6 }
 0x1b0   : > { %4080 = vmatpush1.bf16.msra.mxu1 %v4047_v22  ;;  %v3586_v1 = vpack.c.bf16 %v3550_v16, %v3548_v2  ;;  %v4011_v3 = vmul.f32 %v3906_v18, %v6440_v4  ;;  %v4013_v53 = vmul.f32 %v3906_v18, %v6444_v36  ;;  %v3553_v51 = vmul.f32 %v3455_v33, %v6398_v38 }
 0x1b1   : > { %3618 = vmatprep.subr.bf16.mxu0 %v3587_v32  ;;  %v4050_v40 = vpack.c.bf16 %v4014_v15, %v4012_v45  ;;  %v3555_v43 = vmul.f32 %v3455_v33, %v6402_v49  ;;  %v4016_v48 = vmul.f32 %v3918_v60, %v6442_v23  ;;  %v4018_v37 = vmul.f32 %v3918_v60, %v6446_v59 }
 0x1b2   : > { %3619 = vmatpush1.bf16.msra.mxu0 %v3586_v1  ;;  %v4049_v62 = vpack.c.bf16 %v4013_v53, %v4011_v3  ;;  %v3552_v29 = vmul.f32 %v3451_v34, %v6396_v30  ;;  %v3554_v63 = vmul.f32 %v3451_v34, %v6400_v17  ;;  %v3914_v10 = vrot.slane %v3796_v44, %v5105_v6 }
 0x1b3   : > { %4081 = vmatprep.subr.bf16.mxu1 %v4050_v40  ;;  %v3589_v46 = vpack.c.bf16 %v3555_v43, %v3553_v51  ;;  %v4052_v26 = vpack.c.bf16 %v4018_v37, %v4016_v48  ;;  %v3463_v50 = vrot.slane %v3335_v28, %v5121_v8  ;;  %v3798_v12 = vcombine.high %v3794_v5, %v3794_v5 }
 0x1b4   : > { %4082 = vmatpush1.bf16.msra.mxu1 %v4049_v62  ;;  %v3588_v20 = vpack.c.bf16 %v3554_v63, %v3552_v29  ;;  %v4015_v35 = vmul.f32 %v3914_v10, %v6440_v4  ;;  %v4017_v47 = vmul.f32 %v3914_v10, %v6444_v36  ;;  %v3459_v7 = vrot.slane %v3335_v28, %v5105_v6  ;;  %v7044_v29 = vld [vmem:[#allocation6_spill] sm:$0xff] }
 0x1b5   : > { %3620 = vmatprep.subr.bf16.mxu0 %v3589_v46  ;;  %4083 = vmatprep.subr.bf16.mxu1 %v4052_v26  ;;  %v3557_v52 = vmul.f32 %v3463_v50, %v6398_v38  ;;  %v3559_v22 = vmul.f32 %v3463_v50, %v6402_v49  ;;  %v3926_v44 = vrot.slane %v3798_v12, %v5121_v8  ;;  %v4121_v54 = vmax.f32 %v4117_v0, 0.0 }
 0x1b6   : > { %3621 = vmatpush1.bf16.msra.mxu0 %v3588_v20  ;;  %v4051_v5 = vpack.c.bf16 %v4017_v47, %v4015_v35  ;;  %v3556_v14 = vmul.f32 %v3459_v7, %v6396_v30  ;;  %v3558_v57 = vmul.f32 %v3459_v7, %v6400_v17  ;;  %v3922_v2 = vrot.slane %v3798_v12, %v5105_v6 }
 0x1b7   : > { %v3591_v28 = vpack.c.bf16 %v3559_v22, %v3557_v52  ;;  %v4020_v16 = vmul.f32 %v3926_v44, %v6442_v23  ;;  %v4022_v38 = vmul.f32 %v3926_v44, %v6446_v59  ;;  %v4162_v49 = vcombine.low %v6596_v21, %v6598_v39 }
 0x1b8   : > { %4084 = vmatpush1.bf16.msra.mxu1 %v4051_v5  ;;  %v3590_v18 = vpack.c.bf16 %v3558_v57, %v3556_v14  ;;  %v4019_v42 = vmul.f32 %v3922_v2, %v6440_v4  ;;  %v4021_v0 = vmul.f32 %v3922_v2, %v6444_v36  ;;  %v4163_v30 = vcombine.high %v6596_v21, %v6598_v39 }
 0x1b9   : > { %3622 = vmatprep.subr.bf16.mxu0 %v3591_v28  ;;  %v4054_v17 = vpack.c.bf16 %v4022_v38, %v4020_v16  ;;  %v4170_v33 = vrot.slane %v4162_v49, %v5140_v13  ;;  %v4212_v23 = vcombine.low %v6687_v56, %v4121_v54  ;;  %v4213_v59 = vcombine.high %v6687_v56, %v4121_v54 }
 0x1ba   : > { %3623 = vmatpush1.bf16.msra.mxu0 %v3590_v18  ;;  %v4053_v60 = vpack.c.bf16 %v4021_v0, %v4019_v42  ;;  %v4177_v32 = vrot.slane %v4163_v30, %v5140_v13 }
 0x1bb   : > { %4085 = vmatprep.subr.bf16.mxu1 %v4054_v17  ;;  %v4186_v4 = vrot.slane %v4170_v33, %v5140_v13  ;;  %v4178_v45 = vcombine.high %v4170_v33, %v4170_v33  ;;  %v6745_v39 = vrot.slane %v4212_v23, %v5140_v13  ;;  %v6748_v15 = vrot.slane %v4213_v59, %v5140_v13 }
 0x1bc   : > { %4086 = vmatpush1.bf16.msra.mxu1 %v4053_v60  ;;  %v4193_v36 = vrot.slane %v4177_v32, %v5140_v13  ;;  %v4179_v21 = vcombine.high %v4177_v32, %v4177_v32 }
 0x1bd   : > { %3625 = vmatmul.mubr.bf16.vlgmr.msra.gmra.mrb[12].mxu0 %v5387_v25  ;;  %v4269_v56 = vrot.slane %v4186_v4, %v5121_v8  ;;  %v4265_v34 = vrot.slane %v4186_v4, %v5105_v6  ;;  %v4200_v1 = vrot.slane %v4178_v45, %v5140_v13  ;;  %v4208_v3 = vcombine.high %v4186_v4, %v4186_v4 }
 0x1be   : > { %v4301_v53 = vrot.slane %v4193_v36, %v5121_v8  ;;  %v4297_v51 = vrot.slane %v4193_v36, %v5105_v6  ;;  %v4207_v40 = vrot.slane %v4179_v21, %v5140_v13  ;;  %4836 = vmatprep.subr.bf16.mxu1 %v4835_v31  ;;  %v4209_v43 = vcombine.high %v4193_v36, %v4193_v36 }
 0x1bf   : > { %4088 = vmatmul.mubr.bf16.vlgmr.msra.gmra.mrb[12].mxu1 %v5387_v25  ;;  %v4423_v48 = vmul.f32 %v4269_v56, %v5241_v61  ;;  %v4425_v37 = vmul.f32 %v4269_v56, %v5247_v19  ;;  %v4422_v62 = vmul.f32 %v4265_v34, %v5237_v58  ;;  %v4424_v63 = vmul.f32 %v4265_v34, %v7044_v29 }
 0x1c0   : > { %v4277_v10 = vrot.slane %v4200_v1, %v5121_v8  ;;  %v4273_v46 = vrot.slane %v4200_v1, %v5105_v6  ;;  %v4285_v26 = vrot.slane %v4208_v3, %v5121_v8  ;;  %v4281_v55 = vrot.slane %v4208_v3, %v5105_v6  ;;  %4838 = vmatpush1.bf16.msra.mxu1 %v4837_v24 }
 0x1c1   : > { %v4487_v27 = vpack.c.bf16 %v4425_v37, %v4423_v48  ;;  %v4486_v31 = vpack.c.bf16 %v4424_v63, %v4422_v62  ;;  %v4210_v50 = vcombine.high %v4200_v1, %v4200_v1  ;;  %v6773_v12 = vmul.f32 %v4301_v53, %v5241_v61  ;;  %4550 = vmatprep.mubr.bf16.mxu0 %v5385_v41 }
 0x1c2   : > { %v4427_v20 = vmul.f32 %v4277_v10, %v5241_v61  ;;  %v4429_v35 = vmul.f32 %v4277_v10, %v5247_v19  ;;  %v4426_v47 = vmul.f32 %v4273_v46, %v5237_v58  ;;  %v4428_v7 = vmul.f32 %v4273_v46, %v7044_v29 }
 0x1c3   : > { %4518 = vmatprep.subr.bf16.mxu0 %v4487_v27  ;;  %v4431_v11 = vmul.f32 %v4285_v26, %v5241_v61  ;;  %v4433_v9 = vmul.f32 %v4285_v26, %v5247_v19  ;;  %v4430_v24 = vmul.f32 %v4281_v55, %v5237_v58  ;;  %v4432_v52 = vmul.f32 %v4281_v55, %v7044_v29 }
 0x1c4   : > { %4519 = vmatpush1.bf16.msra.mxu0 %v4486_v31  ;;  %v4489_v22 = vpack.c.bf16 %v4429_v35, %v4427_v20  ;;  %v4488_v41 = vpack.c.bf16 %v4428_v7, %v4426_v47  ;;  %v4293_v44 = vrot.slane %v4210_v50, %v5121_v8  ;;  %v4289_v54 = vrot.slane %v4210_v50, %v5105_v6 }
 0x1c5   : > { %v4491_v5 = vpack.c.bf16 %v4433_v9, %v4431_v11  ;;  %v4490_v14 = vpack.c.bf16 %v4432_v52, %v4430_v24  ;;  %v4441_v57 = vmul.f32 %v4301_v53, %v5247_v19  ;;  %v6788_v2 = vmul.f32 %v4297_v51, %v5237_v58 }
 0x1c6   : > { %4520 = vmatprep.subr.bf16.mxu0 %v4489_v22  ;;  %v4435_v28 = vmul.f32 %v4293_v44, %v5241_v61  ;;  %v4437_v16 = vmul.f32 %v4293_v44, %v5247_v19  ;;  %v4434_v38 = vmul.f32 %v4289_v54, %v5237_v58  ;;  %v4436_v49 = vmul.f32 %v4289_v54, %v7044_v29 }
 0x1c7   : > { %v4495_v18 = vpack.c.bf16 %v4441_v57, %v6773_v12  ;;  %v6796_v42 = vmul.f32 %v4297_v51, %v7044_v29  ;;  %v4309_v0 = vrot.slane %v4207_v40, %v5121_v8  ;;  %v4305_v30 = vrot.slane %v4207_v40, %v5105_v6 }
 0x1c8   : > { %4521 = vmatpush1.bf16.msra.mxu0 %v4488_v41  ;;  %v4493_v17 = vpack.c.bf16 %v4437_v16, %v4435_v28  ;;  %v4492_v33 = vpack.c.bf16 %v4436_v49, %v4434_v38  ;;  %v4317_v23 = vrot.slane %v4209_v43, %v5121_v8  ;;  %v4313_v59 = vrot.slane %v4209_v43, %v5105_v6 }
 0x1c9   : > { %4522 = vmatprep.subr.bf16.mxu0 %v4491_v5  ;;  %v4494_v60 = vpack.c.bf16 %v6796_v42, %v6788_v2  ;;  %v4443_v32 = vmul.f32 %v4309_v0, %v5241_v61  ;;  %v4445_v4 = vmul.f32 %v4309_v0, %v5247_v19  ;;  %v6807_v45 = vmul.f32 %v4305_v30, %v5237_v58 }
 0x1ca   : > { %v6810_v36 = vmul.f32 %v4305_v30, %v7044_v29  ;;  %v6813_v21 = vmul.f32 %v4317_v23, %v5241_v61  ;;  %v6816_v56 = vmul.f32 %v4317_v23, %v5247_v19  ;;  %v6819_v34 = vmul.f32 %v4313_v59, %v5237_v58 }
 0x1cb   : > { %v6821_v1 = vpop.f32.mrb[4].mxu0  ;;  %v4497_v3 = vpack.c.bf16 %v4445_v4, %v4443_v32  ;;  %v6824_v53 = vmul.f32 %v4313_v59, %v7044_v29  ;;  %v4211_v51 = vcombine.high %v4207_v40, %v4207_v40  ;;  %v4236_v43 = vrot.slane %v6745_v39, %v5140_v13 }
 0x1cc   : > { %v6828_v48 = vpop.f32.mrb[5].mxu0  ;;  %4523 = vmatpush1.bf16.msra.mxu0 %v4490_v14  ;;  %v4496_v37 = vpack.c.bf16 %v6810_v36, %v6807_v45  ;;  %v4499_v62 = vpack.c.bf16 %v6816_v56, %v6813_v21  ;;  %v4228_v63 = vcombine.high %v6745_v39, %v6745_v39  ;;  %v4243_v10 = vrot.slane %v6748_v15, %v5140_v13 }
 0x1cd   : > { %v1778_v46 = vpop.f32.mrb[6].mxu0  ;;  %4524 = vmatprep.subr.bf16.mxu0 %v4493_v17  ;;  %v4498_v40 = vpack.c.bf16 %v6824_v53, %v6819_v34  ;;  %v4325_v26 = vrot.slane %v4211_v51, %v5121_v8  ;;  %v4321_v55 = vrot.slane %v4211_v51, %v5105_v6  ;;  %v4333_v27 = vrot.slane %v4236_v43, %v5121_v8  ;;  %v6843_v31 = vpop.f32.mrb[4].mxu1 }
 0x1ce   : > { %v1779_v50 = vpop.f32.mrb[7].mxu0  ;;  %v4329_v12 = vrot.slane %v4236_v43, %v5105_v6  ;;  %v4250_v39 = vrot.slane %v4228_v63, %v5140_v13  ;;  %v4258_v20 = vcombine.high %v4236_v43, %v4236_v43  ;;  %v4365_v35 = vrot.slane %v4243_v10, %v5121_v8  ;;  %v6848_v47 = vpop.f32.mrb[5].mxu1 }
 0x1cf   : > { %v6851_v7 = vmul.f32 %v4325_v26, %v5241_v61  ;;  %v6854_v11 = vmul.f32 %v4325_v26, %v5247_v19  ;;  %v6857_v9 = vmul.f32 %v4321_v55, %v5237_v58  ;;  %v6860_v24 = vmul.f32 %v4321_v55, %v7044_v29  ;;  %v2241_v52 = vpop.f32.mrb[6].mxu1 }
 0x1d0   : > { %4525 = vmatpush1.bf16.msra.mxu0 %v4492_v33  ;;  %v6863_v22 = vmul.f32 %v4333_v27, %v5241_v61  ;;  %v6866_v41 = vmul.f32 %v4333_v27, %v5247_v19  ;;  %v6869_v44 = vmul.f32 %v4329_v12, %v5237_v58  ;;  %v6872_v54 = vmul.f32 %v4329_v12, %v7044_v29  ;;  %v2242_v5 = vpop.f32.mrb[7].mxu1 }
 0x1d1   : > { %4526 = vmatprep.subr.bf16.mxu0 %v4495_v18  ;;  %v4501_v14 = vpack.c.bf16 %v6854_v11, %v6851_v7  ;;  %v4500_v57 = vpack.c.bf16 %v6860_v24, %v6857_v9  ;;  %v4341_v2 = vrot.slane %v4250_v39, %v5121_v8  ;;  %v4337_v28 = vrot.slane %v4250_v39, %v5105_v6 }
 0x1d2   : > { %v4503_v16 = vpack.c.bf16 %v6866_v41, %v6863_v22  ;;  %v4502_v38 = vpack.c.bf16 %v6872_v54, %v6869_v44  ;;  %v4349_v49 = vrot.slane %v4258_v20, %v5121_v8  ;;  %v4345_v18 = vrot.slane %v4258_v20, %v5105_v6 }
 0x1d3   : > { %v6887_v42 = vmul.f32 %v4341_v2, %v5241_v61  ;;  %v6890_v0 = vmul.f32 %v4341_v2, %v5247_v19  ;;  %v6893_v30 = vmul.f32 %v4337_v28, %v5237_v58  ;;  %v6896_v17 = vmul.f32 %v4337_v28, %v7044_v29 }
 0x1d4   : > { %4527 = vmatpush1.bf16.msra.mxu0 %v4494_v60  ;;  %v6899_v33 = vmul.f32 %v4349_v49, %v5241_v61  ;;  %v6902_v23 = vmul.f32 %v4349_v49, %v5247_v19  ;;  %v6905_v59 = vmul.f32 %v4345_v18, %v5237_v58  ;;  %v6908_v32 = vmul.f32 %v4345_v18, %v7044_v29 }
 0x1d5   : > { %4528 = vmatprep.subr.bf16.mxu0 %v4497_v3  ;;  %v4505_v4 = vpack.c.bf16 %v6890_v0, %v6887_v42  ;;  %v4504_v45 = vpack.c.bf16 %v6896_v17, %v6893_v30  ;;  %v4260_v60 = vcombine.high %v4250_v39, %v4250_v39  ;;  %v4471_v36 = vmul.f32 %v4365_v35, %v5241_v61 }
 0x1d6   : > { %v4507_v51 = vpack.c.bf16 %v6902_v23, %v6899_v33  ;;  %v4506_v43 = vpack.c.bf16 %v6908_v32, %v6905_v59  ;;  %v4473_v63 = vmul.f32 %v4365_v35, %v5247_v19  ;;  %v4361_v46 = vrot.slane %v4243_v10, %v5105_v6 }
 0x1d7   : > { %v4357_v3 = vrot.slane %v4260_v60, %v5121_v8  ;;  %v4353_v26 = vrot.slane %v4260_v60, %v5105_v6  ;;  %v4229_v55 = vcombine.high %v6748_v15, %v6748_v15  ;;  %v4259_v27 = vcombine.high %v4243_v10, %v4243_v10 }
 0x1d8   : > { %4529 = vmatpush1.bf16.msra.mxu0 %v4496_v37  ;;  %v4511_v50 = vpack.c.bf16 %v4473_v63, %v4471_v36  ;;  %v4470_v12 = vmul.f32 %v4361_v46, %v5237_v58  ;;  %v4472_v39 = vmul.f32 %v4361_v46, %v7044_v29  ;;  %v4841_v20 = vpack.c.bf16 %v6843_v31, %v6821_v1 }
 0x1d9   : > { %4530 = vmatprep.subr.bf16.mxu0 %v4499_v62  ;;  %v4467_v35 = vmul.f32 %v4357_v3, %v5241_v61  ;;  %v4469_v7 = vmul.f32 %v4357_v3, %v5247_v19  ;;  %v4466_v15 = vmul.f32 %v4353_v26, %v5237_v58  ;;  %v4468_v37 = vmul.f32 %v4353_v26, %v7044_v29 }
 0x1da   : > { %v4510_v10 = vpack.c.bf16 %v4472_v39, %v4470_v12  ;;  %v4257_v11 = vrot.slane %v4229_v55, %v5140_v13  ;;  %v4381_v52 = vrot.slane %v4259_v27, %v5121_v8  ;;  %v4377_v5 = vrot.slane %v4259_v27, %v5105_v6  ;;  %v4561_v27 = vld [vmem:[%s7032_s4] sm:$0xff] }
 0x1db   : > { %v4509_v1 = vpack.c.bf16 %v4469_v7, %v4467_v35  ;;  %v4508_v31 = vpack.c.bf16 %v4468_v37, %v4466_v15  ;;  %v4839_v21 = vpack.c.bf16 %v6848_v47, %v6828_v48 }
 0x1dc   : > { %4531 = vmatpush1.bf16.msra.mxu0 %v4498_v40  ;;  %v4373_v56 = vrot.slane %v4257_v11, %v5121_v8  ;;  %v4369_v62 = vrot.slane %v4257_v11, %v5105_v6  ;;  %v4479_v2 = vmul.f32 %v4381_v52, %v5241_v61  ;;  %v4481_v13 = vmul.f32 %v4381_v52, %v5247_v19 }
 0x1dd   : > { %4532 = vmatprep.subr.bf16.mxu0 %v4501_v14  ;;  %v4478_v28 = vmul.f32 %v4377_v5, %v5237_v58  ;;  %v4480_v49 = vmul.f32 %v4377_v5, %v7044_v29  ;;  %v4261_v18 = vcombine.high %v4257_v11, %v4257_v11  ;;  %4840 = vmatprep.subr.bf16.mxu1 %v4839_v21 }
 0x1de   : > { %v4475_v48 = vmul.f32 %v4373_v56, %v5241_v61  ;;  %v4477_v34 = vmul.f32 %v4373_v56, %v5247_v19  ;;  %v4474_v53 = vmul.f32 %v4369_v62, %v5237_v58  ;;  %v4476_v40 = vmul.f32 %v4369_v62, %v7044_v29  ;;  %4842 = vmatpush1.bf16.msra.mxu1 %v4841_v20 }
 0x1df   : > { %v4515_v47 = vpack.c.bf16 %v4481_v13, %v4479_v2  ;;  %v4514_v42 = vpack.c.bf16 %v4480_v49, %v4478_v28  ;;  %v4389_v0 = vrot.slane %v4261_v18, %v5121_v8  ;;  %v4385_v14 = vrot.slane %v4261_v18, %v5105_v6 }
 0x1e0   : > { %4533 = vmatpush1.bf16.msra.mxu0 %v4500_v57  ;;  %v4513_v30 = vpack.c.bf16 %v4477_v34, %v4475_v48  ;;  %v4512_v17 = vpack.c.bf16 %v4476_v40, %v4474_v53  ;;  %v5003_v57 = vmov 0.0  }
 0x1e1   : > { %4534 = vmatprep.subr.bf16.mxu0 %v4503_v16  ;;  %v4483_v33 = vmul.f32 %v4389_v0, %v5241_v61  ;;  %v4485_v23 = vmul.f32 %v4389_v0, %v5247_v19  ;;  %v4482_v59 = vmul.f32 %v4385_v14, %v5237_v58  ;;  %v4484_v8 = vmul.f32 %v4385_v14, %v7044_v29  ;;  %v4580_v16 = vld [vmem:[%s7033_s5] sm:$0xff] }
 0x1e2   : > { %4654 = vmatprep.mubr.f32.mxu1 %v5003_v57 }
 0x1e3   : > { %v4517_v32 = vpack.c.bf16 %v4485_v23, %v4483_v33  ;;  %v4516_v6 = vpack.c.bf16 %v4484_v8, %v4482_v59 }
 0x1e4   : > { %4535 = vmatpush1.bf16.msra.mxu0 %v4502_v38  ;;  %v5004_v38 = vmov 0  }
 0x1e5   : > { %4536 = vmatprep.subr.bf16.mxu0 %v4505_v4  ;;  %4909 = vset.pattern.permute.xlu0 %v5004_v38 }
 0x1e6   : > { %4583 = vperm.xlu0 %4909, %v4580_v16  }
 0x1e8   : > { %4537 = vmatpush1.bf16.msra.mxu0 %v4504_v45 }
 0x1e9   : > { %4538 = vmatprep.subr.bf16.mxu0 %v4507_v51 }
 0x1ec   : > { %4539 = vmatpush1.bf16.msra.mxu0 %v4506_v43 }
 0x1ed   : > { %4540 = vmatprep.subr.bf16.mxu0 %v4509_v1 }
 0x1f0   : > { %4541 = vmatpush1.bf16.msra.mxu0 %v4508_v31 }
 0x1f1   : > { %4542 = vmatprep.subr.bf16.mxu0 %v4511_v50 }
 0x1f4   : > { %4543 = vmatpush1.bf16.msra.mxu0 %v4510_v10 }
 0x1f5   : > { %4544 = vmatprep.subr.bf16.mxu0 %v4513_v30 }
 0x1f8   : > { %4545 = vmatpush1.bf16.msra.mxu0 %v4512_v17 }
 0x1f9   : > { %4546 = vmatprep.subr.bf16.mxu0 %v4515_v47 }
 0x1fc   : > { %4547 = vmatpush1.bf16.msra.mxu0 %v4514_v42 }
 0x1fd   : > { %4548 = vmatprep.subr.bf16.mxu0 %v4517_v32 }
 0x200   : > { %4549 = vmatpush1.bf16.msra.mxu0 %v4516_v6 }
 0x203   : > { %4551 = vmatmul.mubr.bf16.vlgmr.msra.gmra.mrb[16].mxu0 %v5387_v25 }
 0x22e   : > { %v2700_v58 = vpop.f32.mrb[8].mxu0 }
 0x22f   : > { %v3163_v61 = vpop.f32.mrb[8].mxu1  ;;  %v2702_v19 = vpop.f32.mrb[9].mxu0 }
 0x230   : > { %v4845_v29 = vpack.c.bf16 %v3163_v61, %v2700_v58  ;;  %v3165_v9 = vpop.f32.mrb[9].mxu1  ;;  %v2704_v24 = vpop.f32.mrb[10].mxu0 }
 0x231   : > { %v4843_v22 = vpack.c.bf16 %v3165_v9, %v2702_v19  ;;  %v2705_v41 = vpop.f32.mrb[11].mxu0  ;;  %v3167_v44 = vpop.f32.mrb[10].mxu1 }
 0x232   : > { %v3168_v54 = vpop.f32.mrb[11].mxu1 }
 0x233   : > { %4844 = vmatprep.subr.bf16.mxu1 %v4843_v22 }
 0x234   : > { %4846 = vmatpush1.bf16.msra.mxu1 %v4845_v29 }
 0x265   : > { %v4584_v39 = vpop.permute.xlu0 %4583 }
 0x290   : > { %v3626_v25 = vpop.f32.mrb[12].mxu0 }
 0x291   : > { %v3628_v4 = vpop.f32.mrb[13].mxu0 }
 0x292   : > { %v4089_v45 = vpop.f32.mrb[12].mxu1  ;;  %v3630_v60 = vpop.f32.mrb[14].mxu0 }
 0x293   : > { %v4849_v36 = vpack.c.bf16 %v4089_v45, %v3626_v25  ;;  %v4091_v51 = vpop.f32.mrb[13].mxu1  ;;  %v3631_v43 = vpop.f32.mrb[15].mxu0 }
 0x294   : > { %v4847_v63 = vpack.c.bf16 %v4091_v51, %v3628_v4  ;;  %v4093_v46 = vpop.f32.mrb[14].mxu1 }
 0x295   : > { %v4094_v3 = vpop.f32.mrb[15].mxu1 }
 0x296   : > { %4848 = vmatprep.subr.bf16.mxu1 %v4847_v63 }
 0x297   : > { %4850 = vmatpush1.bf16.msra.mxu1 %v4849_v36 }
 0x2d6   : > { %v4552_v26 = vpop.f32.mrb[16].mxu0 }
 0x2d7   : > { %v4554_v55 = vpop.f32.mrb[17].mxu0 }
 0x2d8   : > { %v4556_v50 = vpop.f32.mrb[18].mxu0  ;;  %4606 = vmatprep.subr.mxu1 %v4554_v55 }
 0x2d9   : > { %v4557_v12 = vpop.f32.mrb[19].mxu0  ;;  %4607 = vmatpush1.msra.mxu1 %v4552_v26 }
 0x2da   : > { %4824 = vmatmul.mubr.msk.f32.vlgmr.msra.gmra.mrb[16].mxu1 %vm4586_vm0, %v4561_v27 }
 0x3ad   : > { %v4656_v20 = vpop.f32.mrb[16].mxu1 }
 0x3ae   : > { %v4657_v35 = vadd.f32 %v4656_v20, %v4584_v39  ;;  %v4658_v7 = vpop.f32.mrb[17].mxu1 }
 0x3af   : > { %v4659_v15 = vadd.f32 %v4658_v7, %v4584_v39 }
 0x3b0   : > { %4661 = vst [vmem:[%s336_s19] sm:$0xff] %v4657_v35 }
 0x3b1   : > { %4662 = vst [vmem:[%s336_s19 + $0x8] sm:$0xff] %v4659_v15 }
 0x3b2   : > { %4935 = shalt.err (!%p4932_p5)
}
 0x3b3   : > { %s4936_s14 = scalar_lea.hbm %s6981_s30, 256  ;;  %s4940_s17 = scalar_lea.hbm %s7034_s6, 512 }
 0x3b4   : > { %p4937_p6 = scmp.ne.s32.totalorder %s6981_s30, %s4936_s14  ;;  %p4941_p10 = scmp.lt.u32.totalorder %s6981_s30, %s7034_s6 }
 0x3b5   : > { %p4942_p11 = scmp.lt.u32.totalorder %s4940_s17, %s4936_s14  ;;  %p4944_p13 = scmp.lt.u32.totalorder %s4936_s14, %s6981_s30 }
 0x3b6   : > { %p4938_p7 = pnand %p4937_p6, %p5081_p4 }
 0x3b7   : > { %p4943_p12 = por %p4942_p11, %p4941_p10 }
 0x3b8   : > { %p4939_p9 = pneg %p4938_p7 }
 0x3b9   : > { %p4945_p0 = por %p4944_p13, %p4943_p12 }
 0x3bb   : > { %p4946_p1 = pnand %p4945_p0, %p4939_p9 }
 0x3bd   : > { %4949 = shalt.err (!%p4946_p1)
}
 0x3be   : > { %4851 = dma.vmem_to_hbm [thread:$0]  (%p5081_p4), %s6983_s20, 256, %s6981_s30, %s4664_s8  }
 0x3bf PF: > { %p4857_p2 = scmp.ge.s32.totalorder %s5000_s26, 2  ;;  %s4692_s27 = sand.u32 1, %s4980_s21  }
 0x3c0   : > { %s4693_s28 = scalar_lea.sflag [#allocation4], %s4692_s27 }
 0x3c1   : > { %p4854_p3 = pnand %p4857_p2, %p5088_p8 }
 0x3c3   : > { %4975 = dma.done.wait (!%p4854_p3), %s4693_s28, 256  }
 0x3c4   : > { %4977 = vsyncadd (!%p4854_p3), %s4693_s28, 4294967040  ;;  %s19_s26 = sadd.s32 1, %s5000_s26   ;;  %s7045_s21 = smov %s4984_s22 }
 0x3c5   : > { %p16_p5 = scmp.ge.s32.totalorder %s19_s26, 4   ;;  %s7046_s22 = smov %s4988_s23 }
 0x3c6   : > { %s7047_s23 = smov %s5094_s10  ;;  %s7048_s24 = smov %s4996_s25 }
 0x3c7   : > { %s7049_s25 = smov %s7051_s29  ;;  %18 = sbr.rel (!%p16_p5) target bundleno = 4 (0x4), region = 88 }
 0x3ce   :  { %4698 = vsyncpa [#allocation4], 1 }
 0x3cf   :  { %4700 = vsyncpa [#allocation4 + $0x1], 1 }

</bundles_post_ra>
